<compile_context>
chip_gen: v5e
topology: v5e:2x2
jax: 0.10.0
libtpu: 0.0.40
codegen_flags: <defaults>
</compile_context>

<pallas_src>
import jax
import jax.numpy as jnp
from jax import lax
from jax.experimental import pallas as pl
from jax.experimental.pallas import tpu as pltpu

BN_EPS = 1e-5


def _make_block_kernel(H, W, Cin, Cmid, Cout, block_type):
    """Fused per-batch-element kernel: BN1->ReLU->conv1->BN2->ReLU->conv2 [+res]."""

    def kernel(x_ref, w1_ref, w2_ref, s1_ref, b1_ref, s2_ref, b2_ref,
               out_ref, pad1_ref, pad2_ref):
        # ---- keep the 1-pixel border of both padded scratches at zero -------
        # Scratch persists across grid steps (and per-core on megacore), so we
        # re-zero just the border every step: 4 thin slab stores per scratch.
        pad1_ref[0:1, :, :] = jnp.zeros((1, W + 2, Cin), jnp.float32)
        pad1_ref[H + 1:H + 2, :, :] = jnp.zeros((1, W + 2, Cin), jnp.float32)
        pad1_ref[:, 0:1, :] = jnp.zeros((H + 2, 1, Cin), jnp.float32)
        pad1_ref[:, W + 1:W + 2, :] = jnp.zeros((H + 2, 1, Cin), jnp.float32)

        pad2_ref[0:1, :, :] = jnp.zeros((1, W + 2, Cmid), jnp.float32)
        pad2_ref[H + 1:H + 2, :, :] = jnp.zeros((1, W + 2, Cmid), jnp.float32)
        pad2_ref[:, 0:1, :] = jnp.zeros((H + 2, 1, Cmid), jnp.float32)
        pad2_ref[:, W + 1:W + 2, :] = jnp.zeros((H + 2, 1, Cmid), jnp.float32)

        # ---- stage 1: BN1 + ReLU (f32 VPU) ----------------------------------
        x = x_ref[0].astype(jnp.float32)                       # (H, W, Cin)
        h1 = jnp.maximum(x * s1_ref[...] + b1_ref[...], 0.0)   # (H, W, Cin)
        pad1_ref[1:H + 1, 1:W + 1, :] = h1

        # ---- stage 1 conv: im2col -> single bf16 MXU matmul (K = 9*Cin) -----
        p1 = pad1_ref[...]
        patch1 = jnp.concatenate(
            [p1[kh:kh + H, kw:kw + W, :] for kh in range(3) for kw in range(3)],
            axis=-1,
        ).reshape(H * W, 9 * Cin).astype(jnp.bfloat16)
        y1 = jnp.dot(patch1, w1_ref[...],
                     preferred_element_type=jnp.float32)       # (H*W, Cmid) f32

        # ---- stage 2: BN2 + ReLU (f32 VPU), intermediate stays in VMEM ------
        h2 = jnp.maximum(y1 * s2_ref[...] + b2_ref[...], 0.0)  # (H*W, Cmid)
        pad2_ref[1:H + 1, 1:W + 1, :] = h2.reshape(H, W, Cmid)

        # ---- stage 2 conv ----------------------------------------------------
        p2 = pad2_ref[...]
        patch2 = jnp.concatenate(
            [p2[kh:kh + H, kw:kw + W, :] for kh in range(3) for kw in range(3)],
            axis=-1,
        ).reshape(H * W, 9 * Cmid).astype(jnp.bfloat16)
        y2 = jnp.dot(patch2, w2_ref[...],
                     preferred_element_type=jnp.float32)       # (H*W, Cout) f32

        # ---- residual add (f32); dropblock is identity -----------------------
        if block_type == "half_preact":
            res = h1.reshape(H * W, Cin)
        else:  # both_preact
            res = x.reshape(H * W, Cin)
        out_ref[0] = (y2 + res).reshape(H, W, Cout).astype(out_ref.dtype)

    return kernel


def _fold_bn(gamma, beta, mean, var, eps=BN_EPS):
    scale = gamma / jnp.sqrt(var + eps)
    bias = beta - mean * scale
    return scale, bias


def basic_block_fmd_forward(x_nchw, params, block_type="both_preact"):
    """Pallas forward of BasicBlock_fmd (stride=1, downsample=None, eval mode)."""
    # TODO(synk): stride>1 / downsample path not implemented (PyTorch default is
    # stride=1, downsample=None, the only case where the residual add is
    # shape-valid without a downsample module).
    # TODO(synk): for large images, tile the grid over (N, H-tiles) with a 2-row
    # halo so per-step blocks stay inside v7x's 64 MiB VMEM.
    x = jnp.transpose(x_nchw, (0, 2, 3, 1)).astype(jnp.float32)  # NCHW -> NHWC
    N, H, W, Cin = x.shape

    w1 = jnp.asarray(params["w1"], jnp.float32)   # (3, 3, Cin,  Cmid)  HWIO
    w2 = jnp.asarray(params["w2"], jnp.float32)   # (3, 3, Cmid, Cout)  HWIO
    Cmid, Cout = w1.shape[-1], w2.shape[-1]

    s1, b1 = _fold_bn(params["bn1_gamma"], params["bn1_beta"],
                      params["bn1_mean"], params["bn1_var"])
    s2, b2 = _fold_bn(params["bn2_gamma"], params["bn2_beta"],
                      params["bn2_mean"], params["bn2_var"])

    # Pre-flatten conv weights to (9*C, Cout) bf16: the 3x3 taps live in the
    # MXU contraction dimension and each stage is a single matmul.
    w1f = w1.reshape(9 * Cin, Cmid).astype(jnp.bfloat16)
    w2f = w2.reshape(9 * Cmid, Cout).astype(jnp.bfloat16)

    kernel = _make_block_kernel(H, W, Cin, Cmid, Cout, block_type)

    out = pl.pallas_call(
        kernel,
        out_shape=jax.ShapeDtypeStruct((N, H, W, Cout), jnp.float32),
        grid_spec=pltpu.PrefetchScalarGridSpec(
            num_scalar_prefetch=0,
            grid=(N,),
            in_specs=[
                pl.BlockSpec((1, H, W, Cin), lambda n: (n, 0, 0, 0)),   # x
                pl.BlockSpec((9 * Cin, Cmid), lambda n: (0, 0)),        # w1 (resident)
                pl.BlockSpec((9 * Cmid, Cout), lambda n: (0, 0)),       # w2 (resident)
                pl.BlockSpec((1, Cin), lambda n: (0, 0)),               # bn1 scale
                pl.BlockSpec((1, Cin), lambda n: (0, 0)),               # bn1 bias
                pl.BlockSpec((1, Cmid), lambda n: (0, 0)),              # bn2 scale
                pl.BlockSpec((1, Cmid), lambda n: (0, 0)),              # bn2 bias
            ],
            out_specs=pl.BlockSpec((1, H, W, Cout), lambda n: (n, 0, 0, 0)),
            scratch_shapes=[
                pltpu.VMEM((H + 2, W + 2, Cin), jnp.float32),   # padded h1
                pltpu.VMEM((H + 2, W + 2, Cmid), jnp.float32),  # padded h2
            ],
        ),
        compiler_params=pltpu.CompilerParams(
            dimension_semantics=("parallel",)),
    )(x, w1f, w2f,
      s1.reshape(1, Cin), b1.reshape(1, Cin),
      s2.reshape(1, Cmid), b2.reshape(1, Cmid))

    return jnp.transpose(out, (0, 3, 1, 2))  # NHWC -> NCHW


def _reference_forward(x_nchw, params, block_type="both_preact"):
    """Pure-JAX reference (lax.conv) with matching bf16 MXU operand rounding."""
    x = jnp.transpose(x_nchw, (0, 2, 3, 1)).astype(jnp.float32)
    s1, b1 = _fold_bn(params["bn1_gamma"], params["bn1_beta"],
                      params["bn1_mean"], params["bn1_var"])
    s2, b2 = _fold_bn(params["bn2_gamma"], params["bn2_beta"],
                      params["bn2_mean"], params["bn2_var"])
    w1 = jnp.asarray(params["w1"], jnp.float32).astype(jnp.bfloat16)
    w2 = jnp.asarray(params["w2"], jnp.float32).astype(jnp.bfloat16)

    h1 = jnp.maximum(x * s1 + b1, 0.0)
    y1 = lax.conv_general_dilated(h1.astype(jnp.bfloat16), w1, (1, 1), "SAME",
                                  dimension_numbers=("NHWC", "HWIO", "NHWC"),
                                  preferred_element_type=jnp.float32)
    h2 = jnp.maximum(y1 * s2 + b2, 0.0)
    y2 = lax.conv_general_dilated(h2.astype(jnp.bfloat16), w2, (1, 1), "SAME",
                                  dimension_numbers=("NHWC", "HWIO", "NHWC"),
                                  preferred_element_type=jnp.float32)
    res = x if block_type == "both_preact" else h1
    return jnp.transpose(y2 + res, (0, 3, 1, 2))


if __name__ == "__main__":
    key = jax.random.PRNGKey(0)
    N, C, H, W = 2, 4, 16, 16  # in_plane == out_plane, stride=1, downsample=None
    ks = jax.random.split(key, 12)

    x = jax.random.normal(ks[0], (N, C, H, W), jnp.float32)
    params = {
        # conv weights stored in HWIO (PyTorch OIHW transposed)
        "w1": jax.random.normal(ks[1], (3, 3, C, C), jnp.float32) * 0.1,
        "w2": jax.random.normal(ks[2], (3, 3, C, C), jnp.float32) * 0.1,
        "bn1_gamma": jax.random.uniform(ks[3], (C,), jnp.float32, 0.5, 1.5),
        "bn1_beta": jax.random.normal(ks[4], (C,), jnp.float32) * 0.1,
        "bn1_mean": jax.random.normal(ks[5], (C,), jnp.float32) * 0.1,
        "bn1_var": jax.random.uniform(ks[6], (C,), jnp.float32, 0.5, 1.5),
        "bn2_gamma": jax.random.uniform(ks[7], (C,), jnp.float32, 0.5, 1.5),
        "bn2_beta": jax.random.normal(ks[8], (C,), jnp.float32) * 0.1,
        "bn2_mean": jax.random.normal(ks[9], (C,), jnp.float32) * 0.1,
        "bn2_var": jax.random.uniform(ks[10], (C,), jnp.float32, 0.5, 1.5),
    }

    for bt in ("both_preact", "half_preact"):
        out = jax.block_until_ready(basic_block_fmd_forward(x, params, bt))
        ref = jax.block_until_ready(_reference_forward(x, params, bt))
        assert out.shape == (N, C, H, W)
        # bf16 MXU operands on both sides; tolerance covers accumulation-order
        # and rare bf16 rounding-boundary differences.
        assert jnp.allclose(out, ref, atol=2e-2, rtol=2e-2), f"mismatch ({bt})"

    print("KERNEL_OK")
</pallas_src>

<mosaic_0001>
module attributes {stable_mosaic.version = 11 : i64} {
  func.func @kernel(%arg0: i32, %arg1: memref<1x16x16x4xf32, #tpu.memory_space<vmem>>, %arg2: memref<36x4xbf16, #tpu.memory_space<vmem>>, %arg3: memref<36x4xbf16, #tpu.memory_space<vmem>>, %arg4: memref<1x4xf32, #tpu.memory_space<vmem>>, %arg5: memref<1x4xf32, #tpu.memory_space<vmem>>, %arg6: memref<1x4xf32, #tpu.memory_space<vmem>>, %arg7: memref<1x4xf32, #tpu.memory_space<vmem>>, %arg8: memref<1x16x16x4xf32, #tpu.memory_space<vmem>>, %arg9: memref<18x18x4xf32, #tpu.memory_space<vmem>>, %arg10: memref<18x18x4xf32, #tpu.memory_space<vmem>>) attributes {dimension_semantics = [#tpu.dimension_semantics<parallel>], iteration_bounds = array<i64: 2>, scalar_prefetch = 0 : i64, scratch_operands = 2 : i64, tpu.core_type = #tpu.core_type<tc>, window_params = [{transform_indices = @transform_0, window_bounds = array<i64: 1, 16, 16, 4>}, {pipeline_mode = #tpu.pipeline_mode<synchronous>, transform_indices = @transform_1, window_bounds = array<i64: 36, 4>}, {pipeline_mode = #tpu.pipeline_mode<synchronous>, transform_indices = @transform_2, window_bounds = array<i64: 36, 4>}, {pipeline_mode = #tpu.pipeline_mode<synchronous>, transform_indices = @transform_3, window_bounds = array<i64: 1, 4>}, {pipeline_mode = #tpu.pipeline_mode<synchronous>, transform_indices = @transform_4, window_bounds = array<i64: 1, 4>}, {pipeline_mode = #tpu.pipeline_mode<synchronous>, transform_indices = @transform_5, window_bounds = array<i64: 1, 4>}, {pipeline_mode = #tpu.pipeline_mode<synchronous>, transform_indices = @transform_6, window_bounds = array<i64: 1, 4>}, {transform_indices = @transform_7, window_bounds = array<i64: 1, 16, 16, 4>}]} {
    %cst = arith.constant 0.000000e+00 : f32
    %0 = vector.broadcast %cst : f32 to vector<1x18x4xf32>
    %c0 = arith.constant 0 : index
    %c0_0 = arith.constant 0 : index
    %c0_1 = arith.constant 0 : index
    %1 = vector.load %arg9[%c0, %c0_0, %c0_1] : memref<18x18x4xf32, #tpu.memory_space<vmem>>, vector<1x18x4xf32>
    tpu.vector_store %arg9[%c0, %c0_0, %c0_1], %0 {strides = array<i32>} : memref<18x18x4xf32, #tpu.memory_space<vmem>>, vector<1x18x4xf32>,
    %cst_2 = arith.constant 0.000000e+00 : f32
    %2 = vector.broadcast %cst_2 : f32 to vector<1x18x4xf32>
    %c17 = arith.constant 17 : index
    %c0_3 = arith.constant 0 : index
    %c0_4 = arith.constant 0 : index
    %3 = vector.load %arg9[%c17, %c0_3, %c0_4] : memref<18x18x4xf32, #tpu.memory_space<vmem>>, vector<1x18x4xf32>
    tpu.vector_store %arg9[%c17, %c0_3, %c0_4], %2 {strides = array<i32>} : memref<18x18x4xf32, #tpu.memory_space<vmem>>, vector<1x18x4xf32>,
    %cst_5 = arith.constant 0.000000e+00 : f32
    %4 = vector.broadcast %cst_5 : f32 to vector<18x1x4xf32>
    %c0_6 = arith.constant 0 : index
    %c0_7 = arith.constant 0 : index
    %c0_8 = arith.constant 0 : index
    %5 = vector.load %arg9[%c0_6, %c0_7, %c0_8] : memref<18x18x4xf32, #tpu.memory_space<vmem>>, vector<18x1x4xf32>
    tpu.vector_store %arg9[%c0_6, %c0_7, %c0_8], %4 {strides = array<i32>} : memref<18x18x4xf32, #tpu.memory_space<vmem>>, vector<18x1x4xf32>,
    %cst_9 = arith.constant 0.000000e+00 : f32
    %6 = vector.broadcast %cst_9 : f32 to vector<18x1x4xf32>
    %c0_10 = arith.constant 0 : index
    %c17_11 = arith.constant 17 : index
    %c0_12 = arith.constant 0 : index
    %7 = vector.load %arg9[%c0_10, %c17_11, %c0_12] : memref<18x18x4xf32, #tpu.memory_space<vmem>>, vector<18x1x4xf32>
    tpu.vector_store %arg9[%c0_10, %c17_11, %c0_12], %6 {strides = array<i32>} : memref<18x18x4xf32, #tpu.memory_space<vmem>>, vector<18x1x4xf32>,
    %cst_13 = arith.constant 0.000000e+00 : f32
    %8 = vector.broadcast %cst_13 : f32 to vector<1x18x4xf32>
    %c0_14 = arith.constant 0 : index
    %c0_15 = arith.constant 0 : index
    %c0_16 = arith.constant 0 : index
    %9 = vector.load %arg10[%c0_14, %c0_15, %c0_16] : memref<18x18x4xf32, #tpu.memory_space<vmem>>, vector<1x18x4xf32>
    tpu.vector_store %arg10[%c0_14, %c0_15, %c0_16], %8 {strides = array<i32>} : memref<18x18x4xf32, #tpu.memory_space<vmem>>, vector<1x18x4xf32>,
    %cst_17 = arith.constant 0.000000e+00 : f32
    %10 = vector.broadcast %cst_17 : f32 to vector<1x18x4xf32>
    %c17_18 = arith.constant 17 : index
    %c0_19 = arith.constant 0 : index
    %c0_20 = arith.constant 0 : index
    %11 = vector.load %arg10[%c17_18, %c0_19, %c0_20] : memref<18x18x4xf32, #tpu.memory_space<vmem>>, vector<1x18x4xf32>
    tpu.vector_store %arg10[%c17_18, %c0_19, %c0_20], %10 {strides = array<i32>} : memref<18x18x4xf32, #tpu.memory_space<vmem>>, vector<1x18x4xf32>,
    %cst_21 = arith.constant 0.000000e+00 : f32
    %12 = vector.broadcast %cst_21 : f32 to vector<18x1x4xf32>
    %c0_22 = arith.constant 0 : index
    %c0_23 = arith.constant 0 : index
    %c0_24 = arith.constant 0 : index
    %13 = vector.load %arg10[%c0_22, %c0_23, %c0_24] : memref<18x18x4xf32, #tpu.memory_space<vmem>>, vector<18x1x4xf32>
    tpu.vector_store %arg10[%c0_22, %c0_23, %c0_24], %12 {strides = array<i32>} : memref<18x18x4xf32, #tpu.memory_space<vmem>>, vector<18x1x4xf32>,
    %cst_25 = arith.constant 0.000000e+00 : f32
    %14 = vector.broadcast %cst_25 : f32 to vector<18x1x4xf32>
    %c0_26 = arith.constant 0 : index
    %c17_27 = arith.constant 17 : index
    %c0_28 = arith.constant 0 : index
    %15 = vector.load %arg10[%c0_26, %c17_27, %c0_28] : memref<18x18x4xf32, #tpu.memory_space<vmem>>, vector<18x1x4xf32>
    tpu.vector_store %arg10[%c0_26, %c17_27, %c0_28], %14 {strides = array<i32>} : memref<18x18x4xf32, #tpu.memory_space<vmem>>, vector<18x1x4xf32>,
    %c0_29 = arith.constant 0 : index
    %c0_30 = arith.constant 0 : index
    %c0_31 = arith.constant 0 : index
    %c0_32 = arith.constant 0 : index
    %16 = vector.load %arg1[%c0_29, %c0_30, %c0_31, %c0_32] : memref<1x16x16x4xf32, #tpu.memory_space<vmem>>, vector<1x16x16x4xf32>
    %17 = vector.shape_cast %16 : vector<1x16x16x4xf32> to vector<16x16x4xf32>
    %c0_33 = arith.constant 0 : index
    %c0_34 = arith.constant 0 : index
    %18 = vector.load %arg4[%c0_33, %c0_34] : memref<1x4xf32, #tpu.memory_space<vmem>>, vector<1x4xf32>
    %19 = vector.shape_cast %18 : vector<1x4xf32> to vector<1x1x4xf32>
    %20 = vector.broadcast %19 : vector<1x1x4xf32> to vector<16x16x4xf32>
    %21 = arith.mulf %17, %20 : vector<16x16x4xf32>
    %c0_35 = arith.constant 0 : index
    %c0_36 = arith.constant 0 : index
    %22 = vector.load %arg5[%c0_35, %c0_36] : memref<1x4xf32, #tpu.memory_space<vmem>>, vector<1x4xf32>
    %23 = vector.shape_cast %22 : vector<1x4xf32> to vector<1x1x4xf32>
    %24 = vector.broadcast %23 : vector<1x1x4xf32> to vector<16x16x4xf32>
    %25 = arith.addf %21, %24 : vector<16x16x4xf32>
    %cst_37 = arith.constant 0.000000e+00 : f32
    %26 = vector.broadcast %cst_37 : f32 to vector<16x16x4xf32>
    %27 = arith.maximumf %25, %26 : vector<16x16x4xf32>
    %c1 = arith.constant 1 : index
    %c1_38 = arith.constant 1 : index
    %c0_39 = arith.constant 0 : index
    %28 = vector.load %arg9[%c1, %c1_38, %c0_39] : memref<18x18x4xf32, #tpu.memory_space<vmem>>, vector<16x16x4xf32>
    tpu.vector_store %arg9[%c1, %c1_38, %c0_39], %27 {strides = array<i32>} : memref<18x18x4xf32, #tpu.memory_space<vmem>>, vector<16x16x4xf32>,
    %c0_40 = arith.constant 0 : index
    %c0_41 = arith.constant 0 : index
    %c0_42 = arith.constant 0 : index
    %29 = vector.load %arg9[%c0_40, %c0_41, %c0_42] : memref<18x18x4xf32, #tpu.memory_space<vmem>>, vector<18x18x4xf32>
    %30 = vector.extract_strided_slice %29 {offsets = [0, 0, 0], sizes = [16, 16, 4], strides = [1, 1, 1]} : vector<18x18x4xf32> to vector<16x16x4xf32>
    %31 = vector.extract_strided_slice %29 {offsets = [0, 1, 0], sizes = [16, 16, 4], strides = [1, 1, 1]} : vector<18x18x4xf32> to vector<16x16x4xf32>
    %32 = vector.extract_strided_slice %29 {offsets = [0, 2, 0], sizes = [16, 16, 4], strides = [1, 1, 1]} : vector<18x18x4xf32> to vector<16x16x4xf32>
    %33 = vector.extract_strided_slice %29 {offsets = [1, 0, 0], sizes = [16, 16, 4], strides = [1, 1, 1]} : vector<18x18x4xf32> to vector<16x16x4xf32>
    %34 = vector.extract_strided_slice %29 {offsets = [1, 1, 0], sizes = [16, 16, 4], strides = [1, 1, 1]} : vector<18x18x4xf32> to vector<16x16x4xf32>
    %35 = vector.extract_strided_slice %29 {offsets = [1, 2, 0], sizes = [16, 16, 4], strides = [1, 1, 1]} : vector<18x18x4xf32> to vector<16x16x4xf32>
    %36 = vector.extract_strided_slice %29 {offsets = [2, 0, 0], sizes = [16, 16, 4], strides = [1, 1, 1]} : vector<18x18x4xf32> to vector<16x16x4xf32>
    %37 = vector.extract_strided_slice %29 {offsets = [2, 1, 0], sizes = [16, 16, 4], strides = [1, 1, 1]} : vector<18x18x4xf32> to vector<16x16x4xf32>
    %38 = vector.extract_strided_slice %29 {offsets = [2, 2, 0], sizes = [16, 16, 4], strides = [1, 1, 1]} : vector<18x18x4xf32> to vector<16x16x4xf32>
    %39 = tpu.concatenate %30, %31, %32, %33, %34, %35, %36, %37, %38 in 2 : vector<16x16x4xf32>, vector<16x16x4xf32>, vector<16x16x4xf32>, vector<16x16x4xf32>, vector<16x16x4xf32>, vector<16x16x4xf32>, vector<16x16x4xf32>, vector<16x16x4xf32>, vector<16x16x4xf32> -> vector<16x16x36xf32>
    %40 = vector.shape_cast %39 : vector<16x16x36xf32> to vector<256x36xf32>
    %41 = arith.truncf %40 : vector<256x36xf32> to vector<256x36xbf16>
    %c0_43 = arith.constant 0 : index
    %c0_44 = arith.constant 0 : index
    %42 = vector.load %arg2[%c0_43, %c0_44] : memref<36x4xbf16, #tpu.memory_space<vmem>>, vector<36x4xbf16>
    %cst_45 = arith.constant dense<0.000000e+00> : vector<256x4xf32>
    %43 = tpu.matmul %41, %42, %cst_45 {dimension_numbers = #tpu.dot_dimension_numbers<[1], [0], [0], [1], [0, 0, 1, 1], [], []>} : vector<256x36xbf16>, vector<36x4xbf16>, vector<256x4xf32> -> vector<256x4xf32>
    %c0_46 = arith.constant 0 : index
    %c0_47 = arith.constant 0 : index
    %44 = vector.load %arg6[%c0_46, %c0_47] : memref<1x4xf32, #tpu.memory_space<vmem>>, vector<1x4xf32>
    %45 = vector.broadcast %44 : vector<1x4xf32> to vector<256x4xf32>
    %46 = arith.mulf %43, %45 : vector<256x4xf32>
    %c0_48 = arith.constant 0 : index
    %c0_49 = arith.constant 0 : index
    %47 = vector.load %arg7[%c0_48, %c0_49] : memref<1x4xf32, #tpu.memory_space<vmem>>, vector<1x4xf32>
    %48 = vector.broadcast %47 : vector<1x4xf32> to vector<256x4xf32>
    %49 = arith.addf %46, %48 : vector<256x4xf32>
    %cst_50 = arith.constant 0.000000e+00 : f32
    %50 = vector.broadcast %cst_50 : f32 to vector<256x4xf32>
    %51 = arith.maximumf %49, %50 : vector<256x4xf32>
    %52 = vector.shape_cast %51 : vector<256x4xf32> to vector<16x16x4xf32>
    %c1_51 = arith.constant 1 : index
    %c1_52 = arith.constant 1 : index
    %c0_53 = arith.constant 0 : index
    %53 = vector.load %arg10[%c1_51, %c1_52, %c0_53] : memref<18x18x4xf32, #tpu.memory_space<vmem>>, vector<16x16x4xf32>
    tpu.vector_store %arg10[%c1_51, %c1_52, %c0_53], %52 {strides = array<i32>} : memref<18x18x4xf32, #tpu.memory_space<vmem>>, vector<16x16x4xf32>,
    %c0_54 = arith.constant 0 : index
    %c0_55 = arith.constant 0 : index
    %c0_56 = arith.constant 0 : index
    %54 = vector.load %arg10[%c0_54, %c0_55, %c0_56] : memref<18x18x4xf32, #tpu.memory_space<vmem>>, vector<18x18x4xf32>
    %55 = vector.extract_strided_slice %54 {offsets = [0, 0, 0], sizes = [16, 16, 4], strides = [1, 1, 1]} : vector<18x18x4xf32> to vector<16x16x4xf32>
    %56 = vector.extract_strided_slice %54 {offsets = [0, 1, 0], sizes = [16, 16, 4], strides = [1, 1, 1]} : vector<18x18x4xf32> to vector<16x16x4xf32>
    %57 = vector.extract_strided_slice %54 {offsets = [0, 2, 0], sizes = [16, 16, 4], strides = [1, 1, 1]} : vector<18x18x4xf32> to vector<16x16x4xf32>
    %58 = vector.extract_strided_slice %54 {offsets = [1, 0, 0], sizes = [16, 16, 4], strides = [1, 1, 1]} : vector<18x18x4xf32> to vector<16x16x4xf32>
    %59 = vector.extract_strided_slice %54 {offsets = [1, 1, 0], sizes = [16, 16, 4], strides = [1, 1, 1]} : vector<18x18x4xf32> to vector<16x16x4xf32>
    %60 = vector.extract_strided_slice %54 {offsets = [1, 2, 0], sizes = [16, 16, 4], strides = [1, 1, 1]} : vector<18x18x4xf32> to vector<16x16x4xf32>
    %61 = vector.extract_strided_slice %54 {offsets = [2, 0, 0], sizes = [16, 16, 4], strides = [1, 1, 1]} : vector<18x18x4xf32> to vector<16x16x4xf32>
    %62 = vector.extract_strided_slice %54 {offsets = [2, 1, 0], sizes = [16, 16, 4], strides = [1, 1, 1]} : vector<18x18x4xf32> to vector<16x16x4xf32>
    %63 = vector.extract_strided_slice %54 {offsets = [2, 2, 0], sizes = [16, 16, 4], strides = [1, 1, 1]} : vector<18x18x4xf32> to vector<16x16x4xf32>
    %64 = tpu.concatenate %55, %56, %57, %58, %59, %60, %61, %62, %63 in 2 : vector<16x16x4xf32>, vector<16x16x4xf32>, vector<16x16x4xf32>, vector<16x16x4xf32>, vector<16x16x4xf32>, vector<16x16x4xf32>, vector<16x16x4xf32>, vector<16x16x4xf32>, vector<16x16x4xf32> -> vector<16x16x36xf32>
    %65 = vector.shape_cast %64 : vector<16x16x36xf32> to vector<256x36xf32>
    %66 = arith.truncf %65 : vector<256x36xf32> to vector<256x36xbf16>
    %c0_57 = arith.constant 0 : index
    %c0_58 = arith.constant 0 : index
    %67 = vector.load %arg3[%c0_57, %c0_58] : memref<36x4xbf16, #tpu.memory_space<vmem>>, vector<36x4xbf16>
    %cst_59 = arith.constant dense<0.000000e+00> : vector<256x4xf32>
    %68 = tpu.matmul %66, %67, %cst_59 {dimension_numbers = #tpu.dot_dimension_numbers<[1], [0], [0], [1], [0, 0, 1, 1], [], []>} : vector<256x36xbf16>, vector<36x4xbf16>, vector<256x4xf32> -> vector<256x4xf32>
    %69 = vector.shape_cast %17 : vector<16x16x4xf32> to vector<256x4xf32>
    %70 = arith.addf %68, %69 : vector<256x4xf32>
    %71 = vector.shape_cast %70 : vector<256x4xf32> to vector<16x16x4xf32>
    %c0_60 = arith.constant 0 : index
    %c0_61 = arith.constant 0 : index
    %c0_62 = arith.constant 0 : index
    %c0_63 = arith.constant 0 : index
    %72 = vector.load %arg8[%c0_60, %c0_61, %c0_62, %c0_63] : memref<1x16x16x4xf32, #tpu.memory_space<vmem>>, vector<1x16x16x4xf32>
    %73 = vector.shape_cast %72 : vector<1x16x16x4xf32> to vector<16x16x4xf32>
    %74 = vector.shape_cast %71 : vector<16x16x4xf32> to vector<1x16x16x4xf32>
    tpu.vector_store %arg8[%c0_60, %c0_61, %c0_62, %c0_63], %74 {strides = array<i32>} : memref<1x16x16x4xf32, #tpu.memory_space<vmem>>, vector<1x16x16x4xf32>,
    return
  }
  func.func @transform_0(%arg0: i32) -> (i32, i32, i32, i32) {
    %c0_i32 = arith.constant 0 : i32
    %c0_i32_0 = arith.constant 0 : i32
    %c0_i32_1 = arith.constant 0 : i32
    %c0_i32_2 = arith.constant 0 : i32
    return %arg0, %c0_i32, %c0_i32_0, %c0_i32_1 : i32, i32, i32, i32
  }
  func.func @transform_1(%arg0: i32) -> (i32, i32) {
    %c0_i32 = arith.constant 0 : i32
    %c0_i32_0 = arith.constant 0 : i32
    %c0_i32_1 = arith.constant 0 : i32
    return %c0_i32, %c0_i32_0 : i32, i32
  }
  func.func @transform_2(%arg0: i32) -> (i32, i32) {
    %c0_i32 = arith.constant 0 : i32
    %c0_i32_0 = arith.constant 0 : i32
    %c0_i32_1 = arith.constant 0 : i32
    return %c0_i32, %c0_i32_0 : i32, i32
  }
  func.func @transform_3(%arg0: i32) -> (i32, i32) {
    %c0_i32 = arith.constant 0 : i32
    %c0_i32_0 = arith.constant 0 : i32
    %c0_i32_1 = arith.constant 0 : i32
    return %c0_i32, %c0_i32_0 : i32, i32
  }
  func.func @transform_4(%arg0: i32) -> (i32, i32) {
    %c0_i32 = arith.constant 0 : i32
    %c0_i32_0 = arith.constant 0 : i32
    %c0_i32_1 = arith.constant 0 : i32
    return %c0_i32, %c0_i32_0 : i32, i32
  }
  func.func @transform_5(%arg0: i32) -> (i32, i32) {
    %c0_i32 = arith.constant 0 : i32
    %c0_i32_0 = arith.constant 0 : i32
    %c0_i32_1 = arith.constant 0 : i32
    return %c0_i32, %c0_i32_0 : i32, i32
  }
  func.func @transform_6(%arg0: i32) -> (i32, i32) {
    %c0_i32 = arith.constant 0 : i32
    %c0_i32_0 = arith.constant 0 : i32
    %c0_i32_1 = arith.constant 0 : i32
    return %c0_i32, %c0_i32_0 : i32, i32
  }
  func.func @transform_7(%arg0: i32) -> (i32, i32, i32, i32) {
    %c0_i32 = arith.constant 0 : i32
    %c0_i32_0 = arith.constant 0 : i32
    %c0_i32_1 = arith.constant 0 : i32
    %c0_i32_2 = arith.constant 0 : i32
    return %arg0, %c0_i32, %c0_i32_0, %c0_i32_1 : i32, i32, i32, i32
  }
}

</mosaic_0001>

<bundles_post_ra>
// kernel: tpu_custom_call.1
= control target key start
LH: loop header
LB: loop body
LE: loop exit
PB: predicated region body
PF: predicated region fallthrough
CT: control target
= control target key end

     0   :  { %s5272_s24 = smov 0   ;;  %s8582_s0 = inlined_call_operand.vmem [shape: f32[2,16,16,4], index: 0, kind: input, shape index: {}]   ;;  %s8583_s1 = inlined_call_operand.vmem [shape: bf16[36,4], index: 1, kind: input, shape index: {}]   ;;  %s8584_s2 = inlined_call_operand.vmem [shape: bf16[36,4], index: 2, kind: input, shape index: {}]   ;;  %s8585_s3 = inlined_call_operand.vmem [shape: f32[1,4], index: 3, kind: input, shape index: {}]   ;;  %s8586_s4 = inlined_call_operand.vmem [shape: f32[1,4], index: 4, kind: input, shape index: {}]   ;;  %s8587_s5 = inlined_call_operand.vmem [shape: f32[1,4], index: 5, kind: input, shape index: {}]   ;;  %s8588_s6 = inlined_call_operand.vmem [shape: f32[1,4], index: 6, kind: input, shape index: {}]   ;;  %s8589_s7 = inlined_call_operand.vmem [shape: f32[2,16,16,4], index: 7, kind: output, shape index: {}]  }
   0x1 LB: > { %s3749_s25 = sadd.s32 4294967295, %s5221_s24   ;;  %p3753_p0 = scmp.ge.s32.totalorder %s5221_s24, 1  ;;  %s5221_s24 = sphi %s5272_s24, %s17_s24  }
   0x2   : > { %p237_p1 = scmp.lt.s32.totalorder %s5221_s24, 3 }
   0x4   : > { %p238_p2 = pnand %p3753_p0, %p237_p1 }
   0x6   : > { %241 = sbr.rel (%p238_p2) target bundleno = 1340 (0x53c), region = 48 }
   0xb   : > { %vm280_vm0 = vcmask 31744   ;;  %vm283_vm1 = vcmask 25600   ;;  %v5223_v0 = vmov 0.0   ;;  %vm289_vm2 = vcmask 24576   ;;  %s5224_s26 = smov 4   ;;  %p269_p3 = scmp.lt.s32.totalorder %s3749_s25, 1 }
   0xc   : > { %281 = vst.msk [vmem:[#allocation2] sm:$0xff] %vm280_vm0, %v5223_v0  ;;  %vm640_vm3 = vcmask 1046528   ;;  %v5435_v10 = vld [vmem:[%s8585_s3] ss:$0 sm:$0xff]  ;;  %vm817_vm4 = vcmask 1045504   ;;  %s5225_s12 = smov 8  }
   0xd   : > { %282 = vst.msk [vmem:[#allocation2 + $0x8] sm:$0xff] %vm280_vm0, %v5223_v0  ;;  %s8962_s25 = smov (!%p269_p3, %s3749_s25), 1  ;;  %v5451_v14 = vld [vmem:[%s8586_s4] ss:$0 sm:$0xff]  ;;  %s5226_s13 = smov 12   ;;  %vm1944_vm5 = vcmask 1041408  }
   0xe   : > { %284 = vst.msk [vmem:[#allocation2 + $0x10] sm:$0x3] %vm283_vm1, %v5223_v0  ;;  %s3808_s27 = sshll.u32 %s8962_s25, 8  ;;  %s5227_s14 = smov 16   ;;  %vm1661_vm6 = vcmask 97280   ;;  %vm1628_vm7 = vcmask 64512  }
   0xf   : > { %290 = vst.msk [vmem:[#allocation2] sm:$0x1] %vm289_vm2, %v5223_v0  ;;  %s5426_s30 = scalar_lea.vmem %s8582_s0, %s3808_s27  ;;  %s5228_s15 = smov 20   ;;  %vm1694_vm8 = vcmask 130048   ;;  %vm1760_vm9 = vcmask 195584   ;;  %vm1727_vm10 = vcmask 162816  }
  0x10   : > { %308 = vst.msk [vmem:[#allocation2 + $0x11] sm:$0x1] %vm289_vm2, %v5223_v0  ;;  %v375_v11 = vld [vmem:[%s5426_s30 + $0x30] sm:$0xff]  ;;  %v376_v12 = vld [vmem:[%s5426_s30 + $0x38] sm:$0xff]  ;;  %v369_v18 = vld [vmem:[%s5426_s30] sm:$0xff]  ;;  %s5229_s16 = smov 24  }
  0x11   : > { %286 = vst.msk [vmem:[#allocation2 + $0x198] sm:$0xff] %vm280_vm0, %v5223_v0  ;;  %v411_v13 = vmul.f32 %v5435_v10, %v375_v11  ;;  %v412_v15 = vmul.f32 %v5435_v10, %v376_v12  ;;  %v371_v16 = vld [vmem:[%s5426_s30 + $0x10] sm:$0xff]  ;;  %v372_v17 = vld [vmem:[%s5426_s30 + $0x18] sm:$0xff]  ;;  %v370_v20 = vld [vmem:[%s5426_s30 + $0x8] sm:$0xff]  ;;  %v405_v26 = vmul.f32 %v5435_v10, %v369_v18  ;;  %s5230_s17 = smov 28   ;;  %s5231_s18 = smov 32  }
  0x12   : > { %287 = vst.msk [vmem:[#allocation2 + $0x1a0] sm:$0xff] %vm280_vm0, %v5223_v0  ;;  %v377_v22 = vld [vmem:[%s5426_s30 + $0x40] sm:$0xff]  ;;  %v378_v23 = vld [vmem:[%s5426_s30 + $0x48] sm:$0xff]  ;;  %v407_v24 = vmul.f32 %v5435_v10, %v371_v16  ;;  %v408_v25 = vmul.f32 %v5435_v10, %v372_v17  ;;  %v379_v29 = vld [vmem:[%s5426_s30 + $0x50] sm:$0xff]  ;;  %v406_v30 = vmul.f32 %v5435_v10, %v370_v20  ;;  %vm1793_vm11 = vcmask 228352  }
  0x13   : > { %288 = vst.msk [vmem:[#allocation2 + $0x1a8] sm:$0x3] %vm283_vm1, %v5223_v0  ;;  %v447_v19 = vadd.f32 %v5451_v14, %v411_v13  ;;  %v448_v21 = vadd.f32 %v5451_v14, %v412_v15  ;;  %v373_v27 = vld [vmem:[%s5426_s30 + $0x20] sm:$0xff]  ;;  %v374_v28 = vld [vmem:[%s5426_s30 + $0x28] sm:$0xff]  ;;  %v413_v32 = vmul.f32 %v5435_v10, %v377_v22  ;;  %v414_v33 = vmul.f32 %v5435_v10, %v378_v23  ;;  %v380_v34 = vld [vmem:[%s5426_s30 + $0x58] sm:$0xff] }
  0x14   : > { %v5296_v1 = vld [vmem:[#allocation2 + $0x8] sm:$0xff]  ;;  %291 = vst.msk [vmem:[#allocation2 + $0x18] sm:$0x1] %vm289_vm2, %v5223_v0  ;;  %v409_v36 = vmul.f32 %v5435_v10, %v373_v27  ;;  %v410_v37 = vmul.f32 %v5435_v10, %v374_v28  ;;  %v415_v38 = vmul.f32 %v5435_v10, %v379_v29  ;;  %v443_v39 = vadd.f32 %v5451_v14, %v407_v24  ;;  %v383_v44 = vld [vmem:[%s5426_s30 + $0x70] sm:$0xff]  ;;  %v384_v47 = vld [vmem:[%s5426_s30 + $0x78] sm:$0xff] }
  0x15   : > { %v642_v2 = vrot.slane %v5296_v1, 1  ;;  %292 = vst.msk [vmem:[#allocation2 + $0x30] sm:$0x1] %vm289_vm2, %v5223_v0  ;;  %v479_v31 = vmax.f32 %v447_v19, 0.0  ;;  %v480_v35 = vmax.f32 %v448_v21, 0.0  ;;  %v5497_v40 = vadd.f32 %v5451_v14, %v408_v25  ;;  %v381_v51 = vld [vmem:[%s5426_s30 + $0x60] sm:$0xff] }
  0x16   : > { %v5303_v3 = vld [vmem:[#allocation2] sm:$0xff]  ;;  %293 = vst.msk [vmem:[#allocation2 + $0x48] sm:$0x1] %vm289_vm2, %v5223_v0  ;;  %v5500_v41 = vadd.f32 %v5451_v14, %v405_v26  ;;  %v5505_v42 = vadd.f32 %v5451_v14, %v406_v30  ;;  %v416_v43 = vmul.f32 %v5435_v10, %v380_v34  ;;  %v5511_v45 = vadd.f32 %v5451_v14, %v413_v32  ;;  %v382_v52 = vld [vmem:[%s5426_s30 + $0x68] sm:$0xff]  ;;  %v391_v16 = vld [vmem:[%s5426_s30 + $0xb0] sm:$0xff] }
  0x17   : > { %v5307_v4 = vld [vmem:[#allocation2 + $0x10] sm:$0x3]  ;;  %v641_v5 = vrot.slane %v5303_v3, 1  ;;  %294 = vst.msk [vmem:[#allocation2 + $0x60] sm:$0x1] %vm289_vm2, %v5223_v0  ;;  %v5514_v46 = vadd.f32 %v5451_v14, %v414_v33  ;;  %v5519_v48 = vadd.f32 %v5451_v14, %v409_v36  ;;  %v5522_v49 = vadd.f32 %v5451_v14, %v410_v37  ;;  %v385_v57 = vld [vmem:[%s5426_s30 + $0x80] sm:$0xff] }
  0x18   : > { %v644_v6 = vrot.slane %v5307_v4, 1  ;;  %295 = vst.msk [vmem:[#allocation2 + $0x78] sm:$0x1] %vm289_vm2, %v5223_v0  ;;  %v5525_v50 = vadd.f32 %v5451_v14, %v415_v38  ;;  %v475_v53 = vmax.f32 %v443_v39, 0.0  ;;  %v476_v54 = vmax.f32 %v5497_v40, 0.0  ;;  %v386_v61 = vld [vmem:[%s5426_s30 + $0x88] sm:$0xff] }
  0x19   : > { %v643_v7 = vsel %vm640_vm3, %v641_v5, %v642_v2  ;;  %296 = vst.msk [vmem:[#allocation2 + $0x90] sm:$0x1] %vm289_vm2, %v5223_v0  ;;  %v473_v55 = vmax.f32 %v5500_v41, 0.0  ;;  %v419_v56 = vmul.f32 %v5435_v10, %v383_v44  ;;  %v474_v58 = vmax.f32 %v5505_v42, 0.0  ;;  %v389_v62 = vld [vmem:[%s5426_s30 + $0xa0] sm:$0xff]  ;;  %v390_v63 = vld [vmem:[%s5426_s30 + $0xa8] sm:$0xff] }
  0x1a   : > { %v645_v8 = vsel %vm640_vm3, %v642_v2, %v644_v6  ;;  %297 = vst.msk [vmem:[#allocation2 + $0xa8] sm:$0x1] %vm289_vm2, %v5223_v0  ;;  %v5539_v59 = vadd.f32 %v5451_v14, %v416_v43  ;;  %v420_v60 = vmul.f32 %v5435_v10, %v384_v47  ;;  %v481_v2 = vmax.f32 %v5511_v45, 0.0  ;;  %v392_v21 = vld [vmem:[%s5426_s30 + $0xb8] sm:$0xff]  ;;  %v395_v36 = vld [vmem:[%s5426_s30 + $0xd0] sm:$0xff] }
  0x1b   : > { %v3837_v9 = vpack.i.bf16 %v645_v8, %v643_v7  ;;  %298 = vst.msk [vmem:[#allocation2 + $0xc0] sm:$0x1] %vm289_vm2, %v5223_v0  ;;  %v482_v5 = vmax.f32 %v5514_v46, 0.0  ;;  %v417_v6 = vmul.f32 %v5435_v10, %v381_v51  ;;  %v418_v7 = vmul.f32 %v5435_v10, %v382_v52  ;;  %v387_v8 = vld [vmem:[%s5426_s30 + $0x90] sm:$0xff]  ;;  %v396_v45 = vld [vmem:[%s5426_s30 + $0xd8] sm:$0xff] }
  0x1c   : > { %299 = vst.msk [vmem:[#allocation2 + $0xd8] sm:$0x1] %vm289_vm2, %v5223_v0  ;;  %v477_v11 = vmax.f32 %v5519_v48, 0.0  ;;  %v478_v12 = vmax.f32 %v5522_v49, 0.0  ;;  %v483_v13 = vmax.f32 %v5525_v50, 0.0  ;;  %v421_v15 = vmul.f32 %v5435_v10, %v385_v57 }
  0x1d   : > { %3838 = vrot.lane.b32.xlu0 %v3837_v9, %s5224_s26  ;;  %300 = vst.msk [vmem:[#allocation2 + $0xf0] sm:$0x1] %vm289_vm2, %v5223_v0  ;;  %v388_v9 = vld [vmem:[%s5426_s30 + $0x98] sm:$0xff]  ;;  %v5563_v17 = vadd.f32 %v5451_v14, %v419_v56  ;;  %v422_v18 = vmul.f32 %v5435_v10, %v386_v61  ;;  %v425_v19 = vmul.f32 %v5435_v10, %v389_v62  ;;  %v484_v23 = vmax.f32 %v5539_v59, 0.0 }
  0x1e   : > { %301 = vst.msk [vmem:[#allocation2 + $0x108] sm:$0x1] %vm289_vm2, %v5223_v0  ;;  %v426_v20 = vmul.f32 %v5435_v10, %v390_v63  ;;  %v5575_v24 = vadd.f32 %v5451_v14, %v420_v60  ;;  %v423_v25 = vmul.f32 %v5435_v10, %v387_v8  ;;  %v424_v26 = vmul.f32 %v5435_v10, %v388_v9  ;;  %v394_v60 = vld [vmem:[%s5426_s30 + $0xc8] sm:$0xff] }
  0x1f   : > { %302 = vst.msk [vmem:[#allocation2 + $0x120] sm:$0x1] %vm289_vm2, %v5223_v0  ;;  %v5589_v30 = vadd.f32 %v5451_v14, %v418_v7  ;;  %v5596_v34 = vadd.f32 %v5451_v14, %v421_v15  ;;  %v487_v37 = vmax.f32 %v5563_v17, 0.0  ;;  %v5603_v38 = vadd.f32 %v5451_v14, %v422_v18 }
  0x20   : > { %303 = vst.msk [vmem:[#allocation2 + $0x138] sm:$0x1] %vm289_vm2, %v5223_v0  ;;  %v5606_v39 = vadd.f32 %v5451_v14, %v425_v19  ;;  %v5609_v40 = vadd.f32 %v5451_v14, %v426_v20  ;;  %v5615_v43 = vadd.f32 %v5451_v14, %v423_v25  ;;  %v5618_v44 = vadd.f32 %v5451_v14, %v424_v26 }
  0x21   : > { %304 = vst.msk [vmem:[#allocation2 + $0x150] sm:$0x1] %vm289_vm2, %v5223_v0  ;;  %v488_v47 = vmax.f32 %v5575_v24, 0.0  ;;  %v431_v49 = vmul.f32 %v5435_v10, %v395_v36  ;;  %v486_v52 = vmax.f32 %v5589_v30, 0.0  ;;  %v490_v56 = vmax.f32 %v5603_v38, 0.0 }
  0x22   : > { %305 = vst.msk [vmem:[#allocation2 + $0x168] sm:$0x1] %vm289_vm2, %v5223_v0  ;;  %v493_v57 = vmax.f32 %v5606_v39, 0.0  ;;  %v432_v59 = vmul.f32 %v5435_v10, %v396_v45  ;;  %v491_v62 = vmax.f32 %v5615_v43, 0.0  ;;  %v492_v63 = vmax.f32 %v5618_v44, 0.0 }
  0x23   : > { %306 = vst.msk [vmem:[#allocation2 + $0x180] sm:$0x1] %vm289_vm2, %v5223_v0  ;;  %v430_v50 = vmul.f32 %v5435_v10, %v394_v60  ;;  %vm1826_vm12 = vcmask 261120   ;;  %vm1895_vm13 = vcmask 293888  }
  0x24   : > { %309 = vst.msk [vmem:[#allocation2 + $0x29] sm:$0x1] %vm289_vm2, %v5223_v0 }
  0x25   : > { %310 = vst.msk [vmem:[#allocation2 + $0x41] sm:$0x1] %vm289_vm2, %v5223_v0 }
  0x26   : > { %311 = vst.msk [vmem:[#allocation2 + $0x59] sm:$0x1] %vm289_vm2, %v5223_v0 }
  0x27   : > { %312 = vst.msk [vmem:[#allocation2 + $0x71] sm:$0x1] %vm289_vm2, %v5223_v0 }
  0x28   : > { %313 = vst.msk [vmem:[#allocation2 + $0x89] sm:$0x1] %vm289_vm2, %v5223_v0 }
  0x29   : > { %314 = vst.msk [vmem:[#allocation2 + $0xa1] sm:$0x1] %vm289_vm2, %v5223_v0 }
  0x2a   : > { %315 = vst.msk [vmem:[#allocation2 + $0xb9] sm:$0x1] %vm289_vm2, %v5223_v0 }
  0x2b   : > { %316 = vst.msk [vmem:[#allocation2 + $0xd1] sm:$0x1] %vm289_vm2, %v5223_v0 }
  0x2c   : > { %317 = vst.msk [vmem:[#allocation2 + $0xe9] sm:$0x1] %vm289_vm2, %v5223_v0 }
  0x2d   : > { %318 = vst.msk [vmem:[#allocation2 + $0x101] sm:$0x1] %vm289_vm2, %v5223_v0 }
  0x2e   : > { %319 = vst.msk [vmem:[#allocation2 + $0x119] sm:$0x1] %vm289_vm2, %v5223_v0 }
  0x2f   : > { %320 = vst.msk [vmem:[#allocation2 + $0x131] sm:$0x1] %vm289_vm2, %v5223_v0 }
  0x30   : > { %321 = vst.msk [vmem:[#allocation2 + $0x149] sm:$0x1] %vm289_vm2, %v5223_v0 }
  0x31   : > { %322 = vst.msk [vmem:[#allocation2 + $0x161] sm:$0x1] %vm289_vm2, %v5223_v0 }
  0x32   : > { %323 = vst.msk [vmem:[#allocation2 + $0x179] sm:$0x1] %vm289_vm2, %v5223_v0 }
  0x33   : > { %324 = vst.msk [vmem:[#allocation2 + $0x191] sm:$0x1] %vm289_vm2, %v5223_v0 }
  0x34   : > { %326 = vst.msk [vmem:[#allocation3] sm:$0xff] %vm280_vm0, %v5223_v0 }
  0x35   : > { %327 = vst.msk [vmem:[#allocation3 + $0x8] sm:$0xff] %vm280_vm0, %v5223_v0 }
  0x36   : > { %328 = vst.msk [vmem:[#allocation3 + $0x10] sm:$0x3] %vm283_vm1, %v5223_v0 }
  0x37   : > { %330 = vst.msk [vmem:[#allocation3 + $0x198] sm:$0xff] %vm280_vm0, %v5223_v0 }
  0x38   : > { %331 = vst.msk [vmem:[#allocation3 + $0x1a0] sm:$0xff] %vm280_vm0, %v5223_v0 }
  0x39   : > { %332 = vst.msk [vmem:[#allocation3 + $0x1a8] sm:$0x3] %vm283_vm1, %v5223_v0 }
  0x3a   : > { %334 = vst.msk [vmem:[#allocation3 + $0x18] sm:$0x1] %vm289_vm2, %v5223_v0 }
  0x3b   : > { %335 = vst.msk [vmem:[#allocation3 + $0x30] sm:$0x1] %vm289_vm2, %v5223_v0 }
  0x3c   : > { %336 = vst.msk [vmem:[#allocation3 + $0x48] sm:$0x1] %vm289_vm2, %v5223_v0 }
  0x3d   : > { %337 = vst.msk [vmem:[#allocation3 + $0x60] sm:$0x1] %vm289_vm2, %v5223_v0 }
  0x3e   : > { %338 = vst.msk [vmem:[#allocation3 + $0x78] sm:$0x1] %vm289_vm2, %v5223_v0 }
  0x3f   : > { %339 = vst.msk [vmem:[#allocation3 + $0x90] sm:$0x1] %vm289_vm2, %v5223_v0 }
  0x40   : > { %340 = vst.msk [vmem:[#allocation3 + $0xa8] sm:$0x1] %vm289_vm2, %v5223_v0 }
  0x41   : > { %341 = vst.msk [vmem:[#allocation3 + $0xc0] sm:$0x1] %vm289_vm2, %v5223_v0 }
  0x42   : > { %342 = vst.msk [vmem:[#allocation3 + $0xd8] sm:$0x1] %vm289_vm2, %v5223_v0 }
  0x43   : > { %343 = vst.msk [vmem:[#allocation3 + $0xf0] sm:$0x1] %vm289_vm2, %v5223_v0 }
  0x44   : > { %344 = vst.msk [vmem:[#allocation3 + $0x108] sm:$0x1] %vm289_vm2, %v5223_v0 }
  0x45   : > { %345 = vst.msk [vmem:[#allocation3 + $0x120] sm:$0x1] %vm289_vm2, %v5223_v0 }
  0x46   : > { %346 = vst.msk [vmem:[#allocation3 + $0x138] sm:$0x1] %vm289_vm2, %v5223_v0 }
  0x47   : > { %347 = vst.msk [vmem:[#allocation3 + $0x150] sm:$0x1] %vm289_vm2, %v5223_v0 }
  0x48   : > { %348 = vst.msk [vmem:[#allocation3 + $0x168] sm:$0x1] %vm289_vm2, %v5223_v0 }
  0x49   : > { %349 = vst.msk [vmem:[#allocation3 + $0x180] sm:$0x1] %vm289_vm2, %v5223_v0 }
  0x4a   : > { %352 = vst.msk [vmem:[#allocation3 + $0x29] sm:$0x1] %vm289_vm2, %v5223_v0 }
  0x4b   : > { %8722 = vst [vmem:[#allocation4_spill] sm:$0xff] %v5435_v10 }
  0x4c   : > { %353 = vst.msk [vmem:[#allocation3 + $0x41] sm:$0x1] %vm289_vm2, %v5223_v0 }
  0x4d   : > { %354 = vst.msk [vmem:[#allocation3 + $0x59] sm:$0x1] %vm289_vm2, %v5223_v0 }
  0x4e   : > { %355 = vst.msk [vmem:[#allocation3 + $0x71] sm:$0x1] %vm289_vm2, %v5223_v0 }
  0x4f   : > { %356 = vst.msk [vmem:[#allocation3 + $0x89] sm:$0x1] %vm289_vm2, %v5223_v0 }
  0x50   : > { %8723 = vst [vmem:[#allocation5_spill] sm:$0xff] %v5451_v14 }
  0x51   : > { %357 = vst.msk [vmem:[#allocation3 + $0xa1] sm:$0x1] %vm289_vm2, %v5223_v0 }
  0x52   : > { %358 = vst.msk [vmem:[#allocation3 + $0xb9] sm:$0x1] %vm289_vm2, %v5223_v0 }
  0x53   : > { %359 = vst.msk [vmem:[#allocation3 + $0xd1] sm:$0x1] %vm289_vm2, %v5223_v0 }
  0x54   : > { %360 = vst.msk [vmem:[#allocation3 + $0xe9] sm:$0x1] %vm289_vm2, %v5223_v0 }
  0x55   : > { %361 = vst.msk [vmem:[#allocation3 + $0x101] sm:$0x1] %vm289_vm2, %v5223_v0 }
  0x56   : > { %362 = vst.msk [vmem:[#allocation3 + $0x119] sm:$0x1] %vm289_vm2, %v5223_v0 }
  0x57   : > { %363 = vst.msk [vmem:[#allocation3 + $0x131] sm:$0x1] %vm289_vm2, %v5223_v0 }
  0x58   : > { %364 = vst.msk [vmem:[#allocation3 + $0x149] sm:$0x1] %vm289_vm2, %v5223_v0 }
  0x59   : > { %365 = vst.msk [vmem:[#allocation3 + $0x161] sm:$0x1] %vm289_vm2, %v5223_v0 }
  0x5a   : > { %366 = vst.msk [vmem:[#allocation3 + $0x179] sm:$0x1] %vm289_vm2, %v5223_v0 }
  0x5b   : > { %367 = vst.msk [vmem:[#allocation3 + $0x191] sm:$0x1] %vm289_vm2, %v5223_v0 }
  0x5c   : > { %512 = vst.msk [vmem:[#allocation2 + $0x61] sm:$0xff] %vm280_vm0, %v479_v31  ;;  %v427_v31 = vmul.f32 %v5435_v10, %v391_v16 }
  0x5d   : > { %513 = vst.msk [vmem:[#allocation2 + $0x69] sm:$0xff] %vm280_vm0, %v480_v35  ;;  %v428_v35 = vmul.f32 %v5435_v10, %v392_v21  ;;  %v5679_v21 = vadd.f32 %v5451_v14, %v432_v59 }
  0x5e   : > { %307 = vst.msk [vmem:[#allocation2 + $0x198] sm:$0x1] %vm289_vm2, %v5223_v0  ;;  %v5626_v48 = vadd.f32 %v5451_v14, %v427_v31 }
  0x5f   : > { %325 = vst.msk [vmem:[#allocation2 + $0x1a9] sm:$0x1] %vm289_vm2, %v5223_v0  ;;  %v500_v60 = vmax.f32 %v5679_v21, 0.0 }
  0x60   : > { %333 = vst.msk [vmem:[#allocation3] sm:$0x1] %vm289_vm2, %v5223_v0  ;;  %v495_v9 = vmax.f32 %v5626_v48, 0.0 }
  0x61   : > { %350 = vst.msk [vmem:[#allocation3 + $0x198] sm:$0x1] %vm289_vm2, %v5223_v0 }
  0x62   : > { %351 = vst.msk [vmem:[#allocation3 + $0x11] sm:$0x1] %vm289_vm2, %v5223_v0 }
  0x63   : > { %v5569_v22 = vld [vmem:[#allocation2 + $0x60] sm:$0xff]  ;;  %368 = vst.msk [vmem:[#allocation3 + $0x1a9] sm:$0x1] %vm289_vm2, %v5223_v0  ;;  %v5586_v0 = vadd.f32 %v5451_v14, %v417_v6 }
  0x64   : > { %v5579_v27 = vld [vmem:[#allocation2 + $0x68] sm:$0xff]  ;;  %v5581_v28 = vld [vmem:[#allocation2 + $0x70] sm:$0x3]  ;;  %v661_v29 = vrot.slane %v5569_v22, 1  ;;  %508 = vst.msk [vmem:[#allocation2 + $0x31] sm:$0xff] %vm280_vm0, %v475_v53  ;;  %v489_v53 = vmax.f32 %v5596_v34, 0.0 }
  0x65   : > { %v662_v32 = vrot.slane %v5579_v27, 1  ;;  %v664_v33 = vrot.slane %v5581_v28, 1  ;;  %509 = vst.msk [vmem:[#allocation2 + $0x39] sm:$0xff] %vm280_vm0, %v476_v54  ;;  %v485_v51 = vmax.f32 %v5586_v0, 0.0  ;;  %v5634_v54 = vadd.f32 %v5451_v14, %v428_v35 }
  0x66   : > { %506 = vst.msk [vmem:[#allocation2 + $0x19] sm:$0xff] %vm280_vm0, %v473_v55  ;;  %v393_v55 = vld [vmem:[%s5426_s30 + $0xc0] sm:$0xff] }
  0x67   : > { %v663_v41 = vsel %vm640_vm3, %v661_v29, %v662_v32  ;;  %v665_v42 = vsel %vm640_vm3, %v662_v32, %v664_v33  ;;  %507 = vst.msk [vmem:[#allocation2 + $0x21] sm:$0xff] %vm280_vm0, %v474_v58  ;;  %v494_v58 = vmax.f32 %v5609_v40, 0.0  ;;  %v496_v18 = vmax.f32 %v5634_v54, 0.0 }
  0x68   : > { %v5621_v46 = vpack.i.bf16 %v665_v42, %v663_v41  ;;  %514 = vst.msk [vmem:[#allocation2 + $0x79] sm:$0xff] %vm280_vm0, %v481_v2  ;;  %v397_v2 = vld [vmem:[%s5426_s30 + $0xe0] sm:$0xff] }
  0x69   : > { %515 = vst.msk [vmem:[#allocation2 + $0x81] sm:$0xff] %vm280_vm0, %v482_v5  ;;  %v398_v5 = vld [vmem:[%s5426_s30 + $0xe8] sm:$0xff]  ;;  %v433_v24 = vmul.f32 %v5435_v10, %v397_v2  ;;  %v5721_v2 = vadd.f32 %v5451_v14, %v430_v50 }
  0x6a   : > { %8724 = vst [vmem:[#allocation6_spill] sm:$0xff] %v5621_v46  ;;  %3858 = vrot.lane.b32.xlu2 %v5621_v46, %s5224_s26  ;;  %v434_v25 = vmul.f32 %v5435_v10, %v398_v5 }
  0x6b   : > { %510 = vst.msk [vmem:[#allocation2 + $0x49] sm:$0xff] %vm280_vm0, %v477_v11  ;;  %v5645_v61 = vld [vmem:[#allocation2 + $0x30] sm:$0xff]  ;;  %v5662_v11 = vadd.f32 %v5451_v14, %v431_v49  ;;  %v5746_v38 = vadd.f32 %v5451_v14, %v433_v24 }
  0x6c   : > { %511 = vst.msk [vmem:[#allocation2 + $0x51] sm:$0xff] %vm280_vm0, %v478_v12  ;;  %v5652_v6 = vld [vmem:[#allocation2 + $0x38] sm:$0xff]  ;;  %v5654_v7 = vld [vmem:[#allocation2 + $0x40] sm:$0x3]  ;;  %v651_v8 = vrot.slane %v5645_v61, 1  ;;  %v429_v12 = vmul.f32 %v5435_v10, %v393_v55  ;;  %v470_v40 = vadd.f32 %v5451_v14, %v434_v25 }
  0x6d   : > { %516 = vst.msk [vmem:[#allocation2 + $0x91] sm:$0xff] %vm280_vm0, %v483_v13  ;;  %v652_v15 = vrot.slane %v5652_v6, 1  ;;  %v654_v16 = vrot.slane %v5654_v7, 1  ;;  %v5667_v17 = vld [vmem:[#allocation2 + $0x18] sm:$0xff]  ;;  %v499_v35 = vmax.f32 %v5662_v11, 0.0 }
  0x6e   : > { %517 = vst.msk [vmem:[#allocation2 + $0x99] sm:$0xff] %vm280_vm0, %v484_v23  ;;  %v5672_v13 = vld [vmem:[#allocation2 + $0x20] sm:$0xff]  ;;  %v5674_v19 = vld [vmem:[#allocation2 + $0x28] sm:$0x3]  ;;  %v646_v20 = vrot.slane %v5667_v17, 1  ;;  %v5700_v36 = vadd.f32 %v5451_v14, %v429_v12 }
  0x6f   : > { %520 = vst.msk [vmem:[#allocation2 + $0xc1] sm:$0xff] %vm280_vm0, %v487_v37  ;;  %v653_v23 = vsel %vm640_vm3, %v651_v8, %v652_v15  ;;  %v655_v26 = vsel %vm640_vm3, %v652_v15, %v654_v16  ;;  %v647_v29 = vrot.slane %v5672_v13, 1  ;;  %v649_v0 = vrot.slane %v5674_v19, 1  ;;  %v5687_v30 = vld [vmem:[#allocation2 + $0x78] sm:$0xff] }
  0x70   : > { %521 = vst.msk [vmem:[#allocation2 + $0xc9] sm:$0xff] %vm280_vm0, %v488_v47  ;;  %v5690_v31 = vpack.i.bf16 %v655_v26, %v653_v23  ;;  %v5692_v32 = vld [vmem:[#allocation2 + $0x80] sm:$0xff]  ;;  %v5694_v33 = vld [vmem:[#allocation2 + $0x88] sm:$0x3]  ;;  %v666_v34 = vrot.slane %v5687_v30, 1  ;;  %v497_v21 = vmax.f32 %v5700_v36, 0.0 }
  0x71   : > { %518 = vst.msk [vmem:[#allocation2 + $0xa9] sm:$0xff] %vm280_vm0, %v485_v51  ;;  %v648_v37 = vsel %vm640_vm3, %v646_v20, %v647_v29  ;;  %v650_v41 = vsel %vm640_vm3, %v647_v29, %v649_v0  ;;  %v667_v42 = vrot.slane %v5692_v32, 1  ;;  %v669_v45 = vrot.slane %v5694_v33, 1 }
  0x72   : > { %8725 = vst [vmem:[#allocation7_spill] sm:$0xff] %v5690_v31  ;;  %v5706_v47 = vld [vmem:[#allocation2 + $0x48] sm:$0xff]  ;;  %3848 = vrot.lane.b32.xlu1 %v5690_v31, %s5224_s26  ;;  %v5711_v49 = vpack.i.bf16 %v650_v41, %v648_v37  ;;  %v498_v36 = vmax.f32 %v5721_v2, 0.0  ;;  %v501_v2 = vmax.f32 %v5746_v38, 0.0  ;;  %v502_v38 = vmax.f32 %v470_v40, 0.0 }
  0x73   : > { %519 = vst.msk [vmem:[#allocation2 + $0xb1] sm:$0xff] %vm280_vm0, %v486_v52  ;;  %v5713_v51 = vld [vmem:[#allocation2 + $0x50] sm:$0xff]  ;;  %v5715_v55 = vld [vmem:[#allocation2 + $0x58] sm:$0x3]  ;;  %v656_v59 = vrot.slane %v5706_v47, 1  ;;  %v668_v52 = vsel %vm640_vm3, %v666_v34, %v667_v42  ;;  %v670_v5 = vsel %vm640_vm3, %v667_v42, %v669_v45 }
  0x74   : > { %8726 = vst [vmem:[#allocation8_spill] sm:$0xff] %v5711_v49  ;;  %v657_v8 = vrot.slane %v5713_v51, 1  ;;  %v659_v12 = vrot.slane %v5715_v55, 1  ;;  %v5727_v15 = vld [vmem:[#allocation2 + $0x90] sm:$0xff]  ;;  %3843 = vrot.lane.b32.xlu0 %v5711_v49, %s5224_s26 }
  0x75   : > { %522 = vst.msk [vmem:[#allocation2 + $0xd9] sm:$0xff] %vm280_vm0, %v489_v53  ;;  %v5734_v53 = vpack.i.bf16 %v670_v5, %v668_v52  ;;  %v5736_v16 = vld [vmem:[#allocation2 + $0x98] sm:$0xff]  ;;  %v5738_v50 = vld [vmem:[#allocation2 + $0xa0] sm:$0x3]  ;;  %v671_v20 = vrot.slane %v5727_v15, 1 }
  0x76   : > { %523 = vst.msk [vmem:[#allocation2 + $0xe1] sm:$0xff] %vm280_vm0, %v490_v56  ;;  %v658_v56 = vsel %vm640_vm3, %v656_v59, %v657_v8  ;;  %v660_v23 = vsel %vm640_vm3, %v657_v8, %v659_v12  ;;  %v672_v26 = vrot.slane %v5736_v16, 1  ;;  %v674_v29 = vrot.slane %v5738_v50, 1  ;;  %v5752_v0 = vld [vmem:[#allocation2 + $0xc0] sm:$0xff] }
  0x77   : > { %8727 = vst [vmem:[#allocation9_spill] sm:$0xff] %v5734_v53  ;;  %3863 = vrot.lane.b32.xlu2 %v5734_v53, %s5224_s26  ;;  %v5759_v39 = vpack.i.bf16 %v660_v23, %v658_v56  ;;  %v5763_v24 = vld [vmem:[#allocation2 + $0xd0] sm:$0x3]  ;;  %v681_v34 = vrot.slane %v5752_v0, 1 }
  0x78   : > { %526 = vst.msk [vmem:[#allocation2 + $0x109] sm:$0xff] %vm280_vm0, %v493_v57  ;;  %v5761_v57 = vld [vmem:[#allocation2 + $0xc8] sm:$0xff]  ;;  %v675_v37 = vsel %vm640_vm3, %v672_v26, %v674_v29  ;;  %v684_v42 = vrot.slane %v5763_v24, 1 }
  0x79   : > { %527 = vst.msk [vmem:[#allocation2 + $0x111] sm:$0xff] %vm280_vm0, %v494_v58  ;;  %v673_v58 = vsel %vm640_vm3, %v671_v20, %v672_v26  ;;  %v682_v41 = vrot.slane %v5761_v57, 1  ;;  %v5775_v45 = vld [vmem:[#allocation2 + $0xa8] sm:$0xff] }
  0x7a   : > { %8728 = vst [vmem:[#allocation10_spill] sm:$0xff] %v5759_v39  ;;  %v5780_v43 = vpack.i.bf16 %v675_v37, %v673_v58  ;;  %v5784_v59 = vld [vmem:[#allocation2 + $0xb8] sm:$0x3]  ;;  %v676_v25 = vrot.slane %v5775_v45, 1  ;;  %3853 = vrot.lane.b32.xlu1 %v5759_v39, %s5224_s26 }
  0x7b   : > { %524 = vst.msk [vmem:[#allocation2 + $0xf1] sm:$0xff] %vm280_vm0, %v491_v62  ;;  %v5782_v62 = vld [vmem:[#allocation2 + $0xb0] sm:$0xff]  ;;  %v683_v52 = vsel %vm640_vm3, %v681_v34, %v682_v41  ;;  %v685_v44 = vsel %vm640_vm3, %v682_v41, %v684_v42  ;;  %v679_v5 = vrot.slane %v5784_v59, 1 }
  0x7c   : > { %525 = vst.msk [vmem:[#allocation2 + $0xf9] sm:$0xff] %vm280_vm0, %v492_v63  ;;  %v677_v63 = vrot.slane %v5782_v62, 1  ;;  %v5795_v8 = vld [vmem:[#allocation2 + $0xd8] sm:$0xff]  ;;  %v5802_v48 = vpack.i.bf16 %v685_v44, %v683_v52  ;;  %3868 = vrot.lane.b32.xlu0 %v5780_v43, %s5224_s26 }
  0x7d   : > { %8729 = vst [vmem:[#allocation11_spill] sm:$0xff] %v5780_v43  ;;  %v5806_v12 = vld [vmem:[#allocation2 + $0xe8] sm:$0x3]  ;;  %v686_v20 = vrot.slane %v5795_v8, 1 }
  0x7e   : > { %528 = vst.msk [vmem:[#allocation2 + $0x121] sm:$0xff] %vm280_vm0, %v495_v9  ;;  %v5804_v9 = vld [vmem:[#allocation2 + $0xe0] sm:$0xff]  ;;  %v678_v54 = vsel %vm640_vm3, %v676_v25, %v677_v63  ;;  %v689_v23 = vrot.slane %v5806_v12, 1 }
  0x7f   : > { %529 = vst.msk [vmem:[#allocation2 + $0x129] sm:$0xff] %vm280_vm0, %v496_v18  ;;  %v680_v18 = vsel %vm640_vm3, %v677_v63, %v679_v5  ;;  %v687_v56 = vrot.slane %v5804_v9, 1  ;;  %v5816_v26 = vld [vmem:[#allocation2 + $0x108] sm:$0xff]  ;;  %3878 = vrot.lane.b32.xlu2 %v5802_v48, %s5224_s26 }
  0x80   : > { %8730 = vst [vmem:[#allocation12_spill] sm:$0xff] %v5802_v48  ;;  %v5821_v29 = vld [vmem:[#allocation2 + $0x110] sm:$0xff]  ;;  %v5823_v11 = vld [vmem:[#allocation2 + $0x118] sm:$0x3]  ;;  %v5836_v41 = vpack.i.bf16 %v680_v18, %v678_v54 }
  0x81   : > { %532 = vst.msk [vmem:[#allocation2 + $0x151] sm:$0xff] %vm280_vm0, %v499_v35  ;;  %v696_v35 = vrot.slane %v5816_v26, 1  ;;  %v688_v34 = vsel %vm640_vm3, %v686_v20, %v687_v56  ;;  %v690_v40 = vsel %vm640_vm3, %v687_v56, %v689_v23  ;;  %v697_v58 = vrot.slane %v5821_v29, 1 }
  0x82   : > { %533 = vst.msk [vmem:[#allocation2 + $0x159] sm:$0xff] %vm280_vm0, %v500_v60  ;;  %v699_v37 = vrot.slane %v5823_v11, 1  ;;  %v5831_v60 = vld [vmem:[#allocation2 + $0xf0] sm:$0xff]  ;;  %v5851_v20 = vpack.i.bf16 %v690_v40, %v688_v34  ;;  %3873 = vrot.lane.b32.xlu1 %v5836_v41, %s5224_s26 }
  0x83   : > { %530 = vst.msk [vmem:[#allocation2 + $0x139] sm:$0xff] %vm280_vm0, %v497_v21  ;;  %v5838_v42 = vld [vmem:[#allocation2 + $0xf8] sm:$0xff]  ;;  %v5840_v21 = vld [vmem:[#allocation2 + $0x100] sm:$0x3]  ;;  %v691_v25 = vrot.slane %v5831_v60, 1  ;;  %v698_v52 = vsel %vm640_vm3, %v696_v35, %v697_v58 }
  0x84   : > { %531 = vst.msk [vmem:[#allocation2 + $0x141] sm:$0xff] %vm280_vm0, %v498_v36  ;;  %v700_v44 = vsel %vm640_vm3, %v697_v58, %v699_v37  ;;  %v692_v63 = vrot.slane %v5838_v42, 1  ;;  %v694_v36 = vrot.slane %v5840_v21, 1  ;;  %3883 = vrot.lane.b32.xlu0 %v5851_v20, %s5224_s26 }
  0x85   : > { %8731 = vst [vmem:[#allocation13_spill] sm:$0xff] %v5836_v41  ;;  %v5848_v5 = vld [vmem:[#allocation2 + $0x120] sm:$0xff]  ;;  %v5864_v58 = vpack.i.bf16 %v700_v44, %v698_v52 }
  0x86   : > { %534 = vst.msk [vmem:[#allocation2 + $0x169] sm:$0xff] %vm280_vm0, %v501_v2  ;;  %v5853_v54 = vld [vmem:[#allocation2 + $0x128] sm:$0xff]  ;;  %v5855_v18 = vld [vmem:[#allocation2 + $0x130] sm:$0x3]  ;;  %v701_v2 = vrot.slane %v5848_v5, 1  ;;  %v695_v37 = vsel %vm640_vm3, %v692_v63, %v694_v36 }
  0x87   : > { %535 = vst.msk [vmem:[#allocation2 + $0x171] sm:$0xff] %vm280_vm0, %v502_v38  ;;  %v702_v56 = vrot.slane %v5853_v54, 1  ;;  %v704_v23 = vrot.slane %v5855_v18, 1  ;;  %v693_v38 = vsel %vm640_vm3, %v691_v25, %v692_v63  ;;  %3893 = vrot.lane.b32.xlu2 %v5864_v58, %s5224_s26 }
  0x88   : > { %8732 = vst [vmem:[#allocation14_spill] sm:$0xff] %v5851_v20  ;;  %v5860_v35 = vld [vmem:[#allocation2 + $0x150] sm:$0xff]  ;;  %v5887_v63 = vpack.i.bf16 %v695_v37, %v693_v38 }
  0x89   : > { %8733 = vst [vmem:[#allocation15_spill] sm:$0xff] %v5864_v58  ;;  %v5867_v34 = vld [vmem:[#allocation2 + $0x158] sm:$0xff]  ;;  %v5869_v40 = vld [vmem:[#allocation2 + $0x160] sm:$0x3]  ;;  %v711_v48 = vrot.slane %v5860_v35, 1  ;;  %v703_v44 = vsel %vm640_vm3, %v701_v2, %v702_v56  ;;  %v705_v41 = vsel %vm640_vm3, %v702_v56, %v704_v23 }
  0x8a   : > { %v712_v53 = vrot.slane %v5867_v34, 1  ;;  %v714_v43 = vrot.slane %v5869_v40, 1  ;;  %v5875_v46 = vld [vmem:[#allocation2 + $0x138] sm:$0xff]  ;;  %8734 = vst [vmem:[#allocation16_spill] sm:$0xff] %v5887_v63  ;;  %v5900_v23 = vpack.i.bf16 %v705_v41, %v703_v44  ;;  %3888 = vrot.lane.b32.xlu1 %v5887_v63, %s5224_s26  ;;  %v824_v41 = vrot.slane %v5672_v13, 2 }
  0x8b   : > { %v5879_v52 = vld [vmem:[#allocation2 + $0x140] sm:$0xff]  ;;  %v5881_v25 = vld [vmem:[#allocation2 + $0x148] sm:$0x3]  ;;  %v706_v36 = vrot.slane %v5875_v46, 1  ;;  %v826_v44 = vrot.slane %v5674_v19, 2 }
  0x8c   : > { %v713_v49 = vsel %vm640_vm3, %v711_v48, %v712_v53  ;;  %v715_v14 = vsel %vm640_vm3, %v712_v53, %v714_v43  ;;  %v707_v2 = vrot.slane %v5879_v52, 1  ;;  %v709_v56 = vrot.slane %v5881_v25, 1  ;;  %8736 = vst [vmem:[#allocation18_spill] sm:$0xff] %v5900_v23  ;;  %3898 = vrot.lane.b32.xlu0 %v5900_v23, %s5224_s26 }
  0x8d   : > { %v5890_v31 = vld [vmem:[#allocation2 + $0x168] sm:$0xff]  ;;  %v5907_v10 = vpack.i.bf16 %v715_v14, %v713_v49  ;;  %v823_v48 = vrot.slane %v5667_v17, 2  ;;  %v821_v14 = vrot.slane %v5307_v4, 2  ;;  %v829_v4 = vrot.slane %v5652_v6, 2 }
  0x8e   : > { %v5892_v39 = vld [vmem:[#allocation2 + $0x170] sm:$0xff]  ;;  %v5894_v20 = vld [vmem:[#allocation2 + $0x178] sm:$0x3]  ;;  %v716_v38 = vrot.slane %v5890_v31, 1  ;;  %v708_v53 = vsel %vm640_vm3, %v706_v36, %v707_v2  ;;  %v710_v43 = vsel %vm640_vm3, %v707_v2, %v709_v56  ;;  %v818_v36 = vrot.slane %v5303_v3, 2 }
  0x8f   : > { %8735 = vst [vmem:[#allocation17_spill] sm:$0xff] %v5894_v20  ;;  %v717_v37 = vrot.slane %v5892_v39, 1  ;;  %v719_v58 = vrot.slane %v5894_v20, 1  ;;  %3908 = vrot.lane.b32.xlu2 %v5907_v10, %s5224_s26  ;;  %v5921_v49 = vpack.i.bf16 %v710_v43, %v708_v53  ;;  %v819_v2 = vrot.slane %v5296_v1, 2 }
  0x90   : > { %v825_v19 = vsel %vm817_vm4, %v823_v48, %v824_v41  ;;  %v827_v56 = vsel %vm817_vm4, %v824_v41, %v826_v44  ;;  %v833_v43 = vrot.slane %v5706_v47, 2  ;;  %v834_v41 = vrot.slane %v5713_v51, 2 }
  0x91   : > { %v718_v20 = vsel %vm640_vm3, %v716_v38, %v717_v37  ;;  %v720_v63 = vsel %vm640_vm3, %v717_v37, %v719_v58  ;;  %v831_v38 = vrot.slane %v5654_v7, 2  ;;  %v828_v58 = vrot.slane %v5645_v61, 2 }
  0x92   : > { %v5927_v23 = vpack.i.bf16 %v720_v63, %v718_v20  ;;  %v841_v37 = vrot.slane %v5581_v28, 2  ;;  %3903 = vrot.lane.b32.xlu1 %v5921_v49, %s5224_s26  ;;  %v5935_v3 = vpack.i.bf16 %v827_v56, %v825_v19  ;;  %v820_v1 = vsel %vm817_vm4, %v818_v36, %v819_v2 }
  0x93   : > { %v822_v48 = vsel %vm817_vm4, %v819_v2, %v821_v14  ;;  %v838_v20 = vrot.slane %v5569_v22, 2  ;;  %v839_v63 = vrot.slane %v5579_v27, 2  ;;  %v830_v7 = vsel %vm817_vm4, %v828_v58, %v829_v4 }
  0x94   : > { %3913 = vrot.lane.b32.xlu0 %v5927_v23, %s5224_s26  ;;  %v832_v28 = vsel %vm817_vm4, %v829_v4, %v831_v38  ;;  %v3917_v53 = vpack.i.bf16 %v822_v48, %v820_v1  ;;  %v836_v44 = vrot.slane %v5715_v55, 2  ;;  %v843_v19 = vrot.slane %v5687_v30, 2 }
  0x95   : > { %v840_v14 = vsel %vm817_vm4, %v838_v20, %v839_v63  ;;  %v842_v36 = vsel %vm817_vm4, %v839_v63, %v841_v37  ;;  %v5952_v2 = vpack.i.bf16 %v832_v28, %v830_v7  ;;  %v844_v56 = vrot.slane %v5692_v32, 2 }
  0x96   : > { %v846_v38 = vrot.slane %v5694_v33, 2  ;;  %v835_v58 = vsel %vm817_vm4, %v833_v43, %v834_v41  ;;  %v5959_v4 = vpack.i.bf16 %v842_v36, %v840_v14  ;;  %v837_v55 = vsel %vm817_vm4, %v834_v41, %v836_v44 }
  0x97   : > { %3923 = vrot.lane.b32.xlu2 %v5935_v3, %s5225_s12  ;;  %v853_v1 = vrot.slane %v5775_v45, 2  ;;  %v854_v37 = vrot.slane %v5782_v62, 2  ;;  %v856_v48 = vrot.slane %v5784_v59, 2  ;;  %v845_v20 = vsel %vm817_vm4, %v843_v19, %v844_v56 }
  0x98   : > { %v847_v33 = vsel %vm817_vm4, %v844_v56, %v846_v38  ;;  %v5969_v63 = vpack.i.bf16 %v837_v55, %v835_v58  ;;  %v848_v7 = vrot.slane %v5727_v15, 2  ;;  %v849_v28 = vrot.slane %v5736_v16, 2 }
  0x99   : > { %v855_v59 = vsel %vm817_vm4, %v853_v1, %v854_v37  ;;  %v857_v43 = vsel %vm817_vm4, %v854_v37, %v856_v48  ;;  %v5978_v41 = vpack.i.bf16 %v847_v33, %v845_v20  ;;  %v858_v44 = vrot.slane %v5752_v0, 2 }
  0x9a   : > { %3918 = vrot.lane.b32.xlu1 %v3917_v53, %s5225_s12  ;;  %v851_v53 = vrot.slane %v5738_v50, 2  ;;  %v859_v14 = vrot.slane %v5761_v57, 2  ;;  %v861_v36 = vrot.slane %v5763_v24, 2  ;;  %v850_v19 = vsel %vm817_vm4, %v848_v7, %v849_v28 }
  0x9b   : > { %v5986_v56 = vpack.i.bf16 %v857_v43, %v855_v59  ;;  %v868_v38 = vrot.slane %v5831_v60, 2  ;;  %v869_v58 = vrot.slane %v5838_v42, 2  ;;  %v871_v55 = vrot.slane %v5840_v21, 2 }
  0x9c   : > { %3928 = vrot.lane.b32.xlu0 %v5952_v2, %s5225_s12  ;;  %v852_v50 = vsel %vm817_vm4, %v849_v28, %v851_v53  ;;  %v860_v24 = vsel %vm817_vm4, %v858_v44, %v859_v14  ;;  %v862_v1 = vsel %vm817_vm4, %v859_v14, %v861_v36  ;;  %v863_v48 = vrot.slane %v5795_v8, 2 }
  0x9d   : > { %v5996_v37 = vpack.i.bf16 %v852_v50, %v850_v19  ;;  %v864_v20 = vrot.slane %v5804_v9, 2  ;;  %v866_v33 = vrot.slane %v5806_v12, 2  ;;  %v870_v21 = vsel %vm817_vm4, %v868_v38, %v869_v58 }
  0x9e   : > { %v872_v7 = vsel %vm817_vm4, %v869_v58, %v871_v55  ;;  %v6005_v28 = vpack.i.bf16 %v862_v1, %v860_v24  ;;  %v873_v53 = vrot.slane %v5816_v26, 2  ;;  %v874_v59 = vrot.slane %v5821_v29, 2 }
  0x9f   : > { %3938 = vrot.lane.b32.xlu2 %v5959_v4, %s5225_s12  ;;  %v876_v43 = vrot.slane %v5823_v11, 2  ;;  %v865_v44 = vsel %vm817_vm4, %v863_v48, %v864_v20  ;;  %v6013_v14 = vpack.i.bf16 %v872_v7, %v870_v21  ;;  %v867_v12 = vsel %vm817_vm4, %v864_v20, %v866_v33 }
  0xa0   : > { %v883_v36 = vrot.slane %v5875_v46, 2  ;;  %v884_v19 = vrot.slane %v5879_v52, 2  ;;  %v886_v50 = vrot.slane %v5881_v25, 2  ;;  %v875_v11 = vsel %vm817_vm4, %v873_v53, %v874_v59 }
  0xa1   : > { %v877_v38 = vsel %vm817_vm4, %v874_v59, %v876_v43  ;;  %v6023_v58 = vpack.i.bf16 %v867_v12, %v865_v44  ;;  %v878_v55 = vrot.slane %v5848_v5, 2  ;;  %v879_v24 = vrot.slane %v5853_v54, 2 }
  0xa2   : > { %3933 = vrot.lane.b32.xlu1 %v5969_v63, %s5225_s12  ;;  %v881_v1 = vrot.slane %v5855_v18, 2  ;;  %v885_v25 = vsel %vm817_vm4, %v883_v36, %v884_v19  ;;  %v887_v48 = vsel %vm817_vm4, %v884_v19, %v886_v50  ;;  %v6032_v20 = vpack.i.bf16 %v877_v38, %v875_v11  ;;  %v8737_v19 = vld [vmem:[#allocation17_spill] sm:$0xff] }
  0xa3   : > { %v888_v33 = vrot.slane %v5860_v35, 2  ;;  %v889_v21 = vrot.slane %v5867_v34, 2  ;;  %v891_v7 = vrot.slane %v5869_v40, 2  ;;  %v6039_v53 = vpack.i.bf16 %v887_v48, %v885_v25  ;;  %v400_v25 = vld [vmem:[%s5426_s30 + $0xf8] sm:$0xff]  ;;  %v8738_v48 = vld [vmem:[#allocation4_spill] sm:$0xff] }
  0xa4   : > { %3943 = vrot.lane.b32.xlu0 %v5978_v41, %s5225_s12  ;;  %v880_v18 = vsel %vm817_vm4, %v878_v55, %v879_v24  ;;  %v882_v59 = vsel %vm817_vm4, %v879_v24, %v881_v1  ;;  %v893_v40 = vrot.slane %v5890_v31, 2  ;;  %v894_v36 = vrot.slane %v5892_v39, 2  ;;  %v399_v1 = vld [vmem:[%s5426_s30 + $0xf0] sm:$0xff] }
  0xa5   : > { %v890_v43 = vsel %vm817_vm4, %v888_v33, %v889_v21  ;;  %v892_v44 = vsel %vm817_vm4, %v889_v21, %v891_v7  ;;  %v6047_v12 = vpack.i.bf16 %v882_v59, %v880_v18  ;;  %v896_v50 = vrot.slane %v8737_v19, 2  ;;  %v8739_v18 = vld [vmem:[#allocation5_spill] sm:$0xff]  ;;  %v8745_v19 = vld [vmem:[#allocation10_spill] sm:$0xff] }
  0xa6   : > { %v6054_v11 = vpack.i.bf16 %v892_v44, %v890_v43  ;;  %v3997_v38 = vpack.i.bf16 %v5672_v13, %v5667_v17  ;;  %v895_v55 = vsel %vm817_vm4, %v893_v40, %v894_v36  ;;  %v435_v33 = vmul.f32 %v8738_v48, %v399_v1 }
  0xa7   : > { %3953 = vrot.lane.b32.xlu2 %v5986_v56, %s5225_s12  ;;  %v897_v24 = vsel %vm817_vm4, %v894_v36, %v896_v50  ;;  %v436_v21 = vmul.f32 %v8738_v48, %v400_v25  ;;  %v6075_v59 = vpack.i.bf16 %v5652_v6, %v5645_v61  ;;  %v4012_v40 = vpack.i.bf16 %v5579_v27, %v5569_v22  ;;  %v8747_v50 = vld [vmem:[#allocation6_spill] sm:$0xff]  ;;  %v8752_v25 = vld [vmem:[#allocation9_spill] sm:$0xff] }
  0xa8   : > { %v6068_v7 = vpack.i.bf16 %v897_v24, %v895_v55  ;;  %v471_v17 = vadd.f32 %v8739_v18, %v435_v33  ;;  %v6087_v36 = vpack.i.bf16 %v5713_v51, %v5706_v47  ;;  %v6094_v6 = vpack.i.bf16 %v5692_v32, %v5687_v30  ;;  %v8750_v24 = vld [vmem:[#allocation11_spill] sm:$0xff]  ;;  %v8753_v48 = vld [vmem:[#allocation13_spill] sm:$0xff] }
  0xa9   : > { %v472_v13 = vadd.f32 %v8739_v18, %v436_v21  ;;  %v6100_v22 = vpack.i.bf16 %v5782_v62, %v5775_v45  ;;  %v6106_v47 = vpack.i.bf16 %v5736_v16, %v5727_v15  ;;  %v6112_v30 = vpack.i.bf16 %v5761_v57, %v5752_v0  ;;  %v6144_v45 = vpop.permute.xlu0 %3838  ;;  %v8756_v18 = vld [vmem:[#allocation14_spill] sm:$0xff] }
  0xaa   : > { %3948 = vrot.lane.b32.xlu1 %v5996_v37, %s5225_s12  ;;  %v503_v43 = vmax.f32 %v471_v17, 0.0  ;;  %v6120_v51 = vpack.i.bf16 %v5838_v42, %v5831_v60  ;;  %v6126_v15 = vpack.i.bf16 %v5804_v9, %v5795_v8  ;;  %v6132_v16 = vpack.i.bf16 %v5821_v29, %v5816_v26 }
  0xab   : > { %v504_v44 = vmax.f32 %v472_v13, 0.0  ;;  %v6140_v57 = vpack.i.bf16 %v5879_v52, %v5875_v46  ;;  %v6148_v62 = vpack.i.bf16 %v5853_v54, %v5848_v5  ;;  %v6158_v46 = vpack.i.bf16 %v5867_v34, %v5860_v35  ;;  %v8742_v35 = vld [vmem:[#allocation8_spill] sm:$0xff] }
  0xac   : > { %3958 = vrot.lane.b32.xlu0 %v6005_v28, %s5225_s12  ;;  %536 = vst.msk [vmem:[#allocation2 + $0x181] sm:$0xff] %vm280_vm0, %v503_v43  ;;  %v6176_v5 = vpack.i.bf16 %v5892_v39, %v5890_v31  ;;  %v8746_v39 = vld [vmem:[#allocation7_spill] sm:$0xff]  ;;  %v8758_v13 = vld [vmem:[#allocation12_spill] sm:$0xff] }
  0xad   : > { %537 = vst.msk [vmem:[#allocation2 + $0x189] sm:$0xff] %vm280_vm0, %v504_v44  ;;  %v8759_v43 = vld [vmem:[#allocation16_spill] sm:$0xff] }
  0xaf   : > { %3968 = vrot.lane.b32.xlu2 %v6013_v14, %s5225_s12 }
  0xb2   : > { %3963 = vrot.lane.b32.xlu1 %v6023_v58, %s5225_s12 }
  0xb3   : > { %v6152_v8 = vld [vmem:[#allocation2 + $0x180] sm:$0xff] }
  0xb4   : > { %3973 = vrot.lane.b32.xlu0 %v6032_v20, %s5225_s12  ;;  %v6154_v9 = vld [vmem:[#allocation2 + $0x188] sm:$0xff] }
  0xb5   : > { %v6166_v29 = vpack.i.bf16 %v6154_v9, %v6152_v8 }
  0xb7   : > { %3983 = vrot.lane.b32.xlu2 %v6039_v53, %s5225_s12 }
  0xba   : > { %3978 = vrot.lane.b32.xlu1 %v6047_v12, %s5225_s12 }
  0xbc   : > { %3988 = vrot.lane.b32.xlu0 %v6054_v11, %s5225_s12 }
  0xbf   : > { %3998 = vrot.lane.b32.xlu2 %v3997_v38, %s5226_s13 }
  0xc2   : > { %3993 = vrot.lane.b32.xlu1 %v6068_v7, %s5225_s12 }
  0xc4   : > { %4003 = vrot.lane.b32.xlu0 %v6075_v59, %s5226_s13  ;;  %v6090_v61 = vpop.permute.xlu2 %3858 }
  0xc7   : > { %4013 = vrot.lane.b32.xlu2 %v4012_v40, %s5226_s13 }
  0xca   : > { %4008 = vrot.lane.b32.xlu1 %v6087_v36, %s5226_s13 }
  0xcc   : > { %4018 = vrot.lane.b32.xlu0 %v6094_v6, %s5226_s13 }
  0xcf   : > { %4028 = vrot.lane.b32.xlu2 %v6100_v22, %s5226_s13 }
  0xd1   : > { %v6114_v32 = vpop.permute.xlu2 %3863 }
  0xd2   : > { %4023 = vrot.lane.b32.xlu1 %v6106_v47, %s5226_s13 }
  0xd4   : > { %4033 = vrot.lane.b32.xlu0 %v6112_v30, %s5226_s13 }
  0xd7   : > { %4043 = vrot.lane.b32.xlu2 %v6120_v51, %s5226_s13 }
  0xd9   : > { %v6134_v0 = vpop.permute.xlu2 %3878 }
  0xda   : > { %4038 = vrot.lane.b32.xlu1 %v6126_v15, %s5226_s13 }
  0xdc   : > { %4048 = vrot.lane.b32.xlu0 %v6132_v16, %s5226_s13 }
  0xdf   : > { %4058 = vrot.lane.b32.xlu2 %v6140_v57, %s5226_s13 }
  0xe1   : > { %v6160_v26 = vpop.permute.xlu2 %3893 }
  0xe2   : > { %8740 = vst [vmem:[#allocation17_spill] sm:$0xff] %v6160_v26  ;;  %4053 = vrot.lane.b32.xlu1 %v6148_v62, %s5226_s13 }
  0xe4   : > { %4063 = vrot.lane.b32.xlu0 %v6158_v46, %s5226_s13  ;;  %v6170_v60 = vpop.permute.xlu1 %3848 }
  0xe6   : > { %v6172_v42 = vpop.permute.xlu0 %3843 }
  0xe7   : > { %4073 = vrot.lane.b32.xlu2 %v6166_v29, %s5226_s13 }
  0xe9   : > { %v6180_v54 = vpop.permute.xlu2 %3908 }
  0xea   : > { %8741 = vst [vmem:[#allocation4_spill] sm:$0xff] %v6180_v54  ;;  %4068 = vrot.lane.b32.xlu1 %v6176_v5, %s5226_s13 }
  0xec   : > { %4078 = vrot.lane.b32.xlu0 %v8742_v35, %s5227_s14  ;;  %v6186_v34 = vpop.permute.xlu1 %3853  ;;  %v8762_v35 = vld [vmem:[#allocation18_spill] sm:$0xff] }
  0xed   : > { %8743 = vst [vmem:[#allocation5_spill] sm:$0xff] %v6186_v34 }
  0xee   : > { %v6188_v52 = vpop.permute.xlu0 %3868 }
  0xef   : > { %8744 = vst [vmem:[#allocation8_spill] sm:$0xff] %v6188_v52  ;;  %4088 = vrot.lane.b32.xlu2 %v8745_v19, %s5227_s14  ;;  %v1093_v52 = vrot.slane %v6152_v8, 1 }
  0xf1   : > { %v6192_v31 = vpop.permute.xlu2 %3923 }
  0xf2   : > { %4083 = vrot.lane.b32.xlu1 %v8746_v39, %s5227_s14 }
  0xf4   : > { %4093 = vrot.lane.b32.xlu0 %v8747_v50, %s5227_s14  ;;  %v6198_v38 = vpop.permute.xlu1 %3873 }
  0xf5   : > { %8748 = vst [vmem:[#allocation10_spill] sm:$0xff] %v6198_v38  ;;  %v588_v38 = vld [vmem:[#allocation2 + $0x190] sm:$0x3] }
  0xf6   : > { %v6200_v55 = vpop.permute.xlu0 %3883  ;;  %v1096_v54 = vrot.slane %v588_v38, 1 }
  0xf7   : > { %8749 = vst [vmem:[#allocation7_spill] sm:$0xff] %v6200_v55  ;;  %4103 = vrot.lane.b32.xlu2 %v8750_v24, %s5227_s14 }
  0xf9   : > { %v6204_v1 = vpop.permute.xlu2 %3938 }
  0xfa   : > { %8751 = vst [vmem:[#allocation6_spill] sm:$0xff] %v6204_v1  ;;  %4098 = vrot.lane.b32.xlu1 %v8752_v25, %s5227_s14  ;;  %v8764_v1 = vld [vmem:[#allocation15_spill] sm:$0xff] }
  0xfc   : > { %4108 = vrot.lane.b32.xlu0 %v8753_v48, %s5227_s14  ;;  %v6210_v33 = vpop.permute.xlu1 %3888 }
  0xfd   : > { %8754 = vst [vmem:[#allocation11_spill] sm:$0xff] %v6210_v33 }
  0xfe   : > { %v6212_v21 = vpop.permute.xlu0 %3898 }
  0xff   : > { %8755 = vst [vmem:[#allocation9_spill] sm:$0xff] %v6212_v21  ;;  %4118 = vrot.lane.b32.xlu2 %v8756_v18, %s5227_s14 }
 0x101   : > { %v6216_v17 = vpop.permute.xlu2 %3953 }
 0x102   : > { %8757 = vst [vmem:[#allocation13_spill] sm:$0xff] %v6216_v17  ;;  %4113 = vrot.lane.b32.xlu1 %v8758_v13, %s5227_s14  ;;  %v1094_v17 = vrot.slane %v6154_v9, 1 }
 0x104   : > { %4123 = vrot.lane.b32.xlu0 %v8759_v43, %s5227_s14  ;;  %v6222_v44 = vpop.permute.xlu1 %3903  ;;  %v1097_v33 = vsel %vm640_vm3, %v1094_v17, %v1096_v54 }
 0x105   : > { %8760 = vst [vmem:[#allocation14_spill] sm:$0xff] %v6222_v44 }
 0x106   : > { %v6224_v40 = vpop.permute.xlu0 %3913 }
 0x107   : > { %8761 = vst [vmem:[#allocation12_spill] sm:$0xff] %v6224_v40  ;;  %4133 = vrot.lane.b32.xlu2 %v8762_v35, %s5227_s14  ;;  %v1095_v40 = vsel %vm640_vm3, %v1093_v52, %v1094_v17 }
 0x109   : > { %v6228_v21 = vpop.permute.xlu2 %3968 }
 0x10a   : > { %8763 = vst [vmem:[#allocation16_spill] sm:$0xff] %v6228_v21  ;;  %4128 = vrot.lane.b32.xlu1 %v8764_v1, %s5227_s14  ;;  %v6244_v21 = vpack.i.bf16 %v1097_v33, %v1095_v40 }
 0x10c   : > { %4138 = vrot.lane.b32.xlu0 %v5921_v49, %s5227_s14  ;;  %v6236_v44 = vpop.permute.xlu1 %3918 }
 0x10e   : > { %v6240_v55 = vpop.permute.xlu0 %3928 }
 0x10f   : > { %8765 = vst [vmem:[#allocation18_spill] sm:$0xff] %v6240_v55  ;;  %4148 = vrot.lane.b32.xlu2 %v5927_v23, %s5227_s14 }
 0x111   : > { %v6246_v34 = vpop.permute.xlu2 %3983 }
 0x112   : > { %8766 = vst [vmem:[#allocation15_spill] sm:$0xff] %v6246_v34  ;;  %4143 = vrot.lane.b32.xlu1 %v5907_v10, %s5227_s14 }
 0x114   : > { %4153 = vrot.lane.b32.xlu0 %v6244_v21, %s5227_s14  ;;  %v6252_v26 = vpop.permute.xlu1 %3933 }
 0x115   : > { %8767 = vst [vmem:[#allocation19_spill] sm:$0xff] %v6252_v26 }
 0x116   : > { %v6254_v52 = vpop.permute.xlu0 %3943 }
 0x117   : > { %8768 = vst [vmem:[#allocation20_spill] sm:$0xff] %v6254_v52  ;;  %4163 = vrot.lane.b32.xlu2 %v5952_v2, %s5228_s15 }
 0x119   : > { %v6258_v54 = vpop.permute.xlu2 %3998 }
 0x11a   : > { %4158 = vrot.lane.b32.xlu1 %v5935_v3, %s5228_s15 }
 0x11c   : > { %4168 = vrot.lane.b32.xlu0 %v5969_v63, %s5228_s15  ;;  %v6264_v33 = vpop.permute.xlu1 %3948 }
 0x11d   : > { %8769 = vst [vmem:[#allocation21_spill] sm:$0xff] %v6264_v33 }
 0x11e   : > { %v6266_v17 = vpop.permute.xlu0 %3958 }
 0x11f   : > { %8770 = vst [vmem:[#allocation22_spill] sm:$0xff] %v6266_v17  ;;  %4178 = vrot.lane.b32.xlu2 %v5978_v41, %s5228_s15 }
 0x121   : > { %v6270_v40 = vpop.permute.xlu2 %4013 }
 0x122   : > { %8771 = vst [vmem:[#allocation23_spill] sm:$0xff] %v6270_v40  ;;  %4173 = vrot.lane.b32.xlu1 %v5959_v4, %s5228_s15 }
 0x124   : > { %4183 = vrot.lane.b32.xlu0 %v5996_v37, %s5228_s15  ;;  %v6276_v34 = vpop.permute.xlu1 %3963 }
 0x125   : > { %8772 = vst [vmem:[#allocation24_spill] sm:$0xff] %v6276_v34  ;;  %v1197_v34 = vrot.slane %v588_v38, 2 }
 0x126   : > { %v6278_v3 = vpop.permute.xlu0 %3973 }
 0x127   : > { %8773 = vst [vmem:[#allocation25_spill] sm:$0xff] %v6278_v3  ;;  %4193 = vrot.lane.b32.xlu2 %v6005_v28, %s5228_s15 }
 0x129   : > { %v6282_v33 = vpop.permute.xlu2 %4028 }
 0x12a   : > { %8774 = vst [vmem:[#allocation26_spill] sm:$0xff] %v6282_v33  ;;  %4188 = vrot.lane.b32.xlu1 %v5986_v56, %s5228_s15 }
 0x12c   : > { %4198 = vrot.lane.b32.xlu0 %v6023_v58, %s5228_s15  ;;  %v6288_v52 = vpop.permute.xlu1 %3978 }
 0x12d   : > { %8775 = vst [vmem:[#allocation27_spill] sm:$0xff] %v6288_v52  ;;  %v1195_v52 = vrot.slane %v6154_v9, 2 }
 0x12e   : > { %v6290_v40 = vpop.permute.xlu0 %3988 }
 0x12f   : > { %8776 = vst [vmem:[#allocation28_spill] sm:$0xff] %v6290_v40  ;;  %4208 = vrot.lane.b32.xlu2 %v6032_v20, %s5228_s15  ;;  %v1194_v40 = vrot.slane %v6152_v8, 2  ;;  %v1198_v17 = vsel %vm817_vm4, %v1195_v52, %v1197_v34 }
 0x131   : > { %v6294_v26 = vpop.permute.xlu2 %4043 }
 0x132   : > { %8777 = vst [vmem:[#allocation29_spill] sm:$0xff] %v6294_v26  ;;  %4203 = vrot.lane.b32.xlu1 %v6013_v14, %s5228_s15  ;;  %v1196_v26 = vsel %vm817_vm4, %v1194_v40, %v1195_v52  ;;  %v6334_v52 = vld [vmem:[#allocation2 + $0x60] sm:$0xff] }
 0x133   : > { %v6320_v8 = vpack.i.bf16 %v1198_v17, %v1196_v26  ;;  %v4247_v26 = vpack.i.bf16 %v5579_v27, %v6334_v52 }
 0x134   : > { %4213 = vrot.lane.b32.xlu0 %v6047_v12, %s5228_s15  ;;  %v6300_v33 = vpop.permute.xlu1 %3993 }
 0x135   : > { %8778 = vst [vmem:[#allocation30_spill] sm:$0xff] %v6300_v33 }
 0x136   : > { %v6302_v3 = vpop.permute.xlu0 %4003 }
 0x137   : > { %8779 = vst [vmem:[#allocation31_spill] sm:$0xff] %v6302_v3  ;;  %4223 = vrot.lane.b32.xlu2 %v6054_v11, %s5228_s15 }
 0x139   : > { %v6308_v55 = vpop.permute.xlu2 %4058 }
 0x13a   : > { %8780 = vst [vmem:[#allocation32_spill] sm:$0xff] %v6308_v55  ;;  %4218 = vrot.lane.b32.xlu1 %v6039_v53, %s5228_s15  ;;  %v3920_v55 = vunpack.i.l.bf16 %v6236_v44 }
 0x13c   : > { %4228 = vrot.lane.b32.xlu0 %v6068_v7, %s5228_s15  ;;  %v6316_v33 = vpop.permute.xlu1 %4008 }
 0x13e   : > { %v6318_v3 = vpop.permute.xlu0 %4018 }
 0x13f   : > { %4238 = vrot.lane.b32.xlu2 %v6075_v59, %s5229_s16 }
 0x141   : > { %v6324_v9 = vpop.permute.xlu2 %4073 }
 0x142   : > { %8781 = vst [vmem:[#allocation33_spill] sm:$0xff] %v6324_v9  ;;  %4233 = vrot.lane.b32.xlu1 %v6320_v8, %s5228_s15 }
 0x144   : > { %4243 = vrot.lane.b32.xlu0 %v6087_v36, %s5229_s16  ;;  %v6330_v34 = vpop.permute.xlu1 %4023 }
 0x145   : > { %8782 = vst [vmem:[#allocation34_spill] sm:$0xff] %v6330_v34 }
 0x146   : > { %v6332_v38 = vpop.permute.xlu0 %4033 }
 0x147   : > { %8783 = vst [vmem:[#allocation35_spill] sm:$0xff] %v6332_v38  ;;  %4253 = vrot.lane.b32.xlu2 %v6094_v6, %s5229_s16 }
 0x149   : > { %v6340_v59 = vpop.permute.xlu2 %4088 }
 0x14a   : > { %4248 = vrot.lane.b32.xlu1 %v4247_v26, %s5229_s16  ;;  %v6377_v26 = vld [vmem:[#allocation2 + $0x1a0] sm:$0xff] }
 0x14c   : > { %4258 = vrot.lane.b32.xlu0 %v6106_v47, %s5229_s16  ;;  %v6345_v36 = vpop.permute.xlu1 %4038 }
 0x14e   : > { %v6347_v17 = vpop.permute.xlu0 %4048 }
 0x14f   : > { %4268 = vrot.lane.b32.xlu2 %v6112_v30, %s5229_s16 }
 0x151   : > { %v6351_v40 = vpop.permute.xlu2 %4103 }
 0x152   : > { %8784 = vst [vmem:[#allocation36_spill] sm:$0xff] %v6351_v40  ;;  %4263 = vrot.lane.b32.xlu1 %v6100_v22, %s5229_s16  ;;  %v5123_v40 = vld [vmem:[#allocation2 + $0x68] sm:$0xff] }
 0x154   : > { %4273 = vrot.lane.b32.xlu0 %v6126_v15, %s5229_s16  ;;  %v6357_v27 = vpop.permute.xlu1 %4053  ;;  %v6375_v15 = vld [vmem:[#allocation2 + $0x198] sm:$0xff] }
 0x156   : > { %v6359_v6 = vpop.permute.xlu0 %4063 }
 0x157   : > { %8785 = vst [vmem:[#allocation37_spill] sm:$0xff] %v6359_v6  ;;  %4283 = vrot.lane.b32.xlu2 %v6132_v16, %s5229_s16 }
 0x159   : > { %v6363_v47 = vpop.permute.xlu2 %4118 }
 0x15a   : > { %4278 = vrot.lane.b32.xlu1 %v6120_v51, %s5229_s16  ;;  %v4312_v51 = vpack.i.bf16 %v6377_v26, %v6375_v15 }
 0x15c   : > { %4288 = vrot.lane.b32.xlu0 %v6148_v62, %s5229_s16  ;;  %v6369_v30 = vpop.permute.xlu1 %4068 }
 0x15d   : > { %8786 = vst [vmem:[#allocation38_spill] sm:$0xff] %v6369_v30 }
 0x15e   : > { %v6371_v22 = vpop.permute.xlu0 %4078 }
 0x15f   : > { %4298 = vrot.lane.b32.xlu2 %v6158_v46, %s5229_s16 }
 0x161   : > { %v6381_v16 = vpop.permute.xlu2 %4133 }
 0x162   : > { %4293 = vrot.lane.b32.xlu1 %v6140_v57, %s5229_s16 }
 0x164   : > { %4303 = vrot.lane.b32.xlu0 %v6176_v5, %s5229_s16  ;;  %v6387_v62 = vpop.permute.xlu1 %4083 }
 0x166   : > { %v6389_v9 = vpop.permute.xlu0 %4093 }
 0x167   : > { %4313 = vrot.lane.b32.xlu2 %v4312_v51, %s5229_s16  ;;  %v1395_v51 = vrot.slane %v6377_v26, 1 }
 0x169   : > { %v6398_v46 = vpop.permute.xlu2 %4148 }
 0x16a   : > { %4308 = vrot.lane.b32.xlu1 %v6166_v29, %s5229_s16  ;;  %8787 = vst [vmem:[#allocation39_spill] sm:$0xff] %v6398_v46 }
 0x16c   : > { %4318 = vrot.lane.b32.xlu0 %v8746_v39, %s5230_s17  ;;  %v6396_v57 = vpop.permute.xlu1 %4098 }
 0x16e   : > { %v6400_v30 = vpop.permute.xlu0 %4108 }
 0x16f   : > { %8788 = vst [vmem:[#allocation40_spill] sm:$0xff] %v6400_v30  ;;  %4328 = vrot.lane.b32.xlu2 %v8747_v50, %s5230_s17 }
 0x171   : > { %v6410_v5 = vpop.permute.xlu2 %4163 }
 0x172   : > { %4323 = vrot.lane.b32.xlu1 %v8745_v19, %s5230_s17 }
 0x174   : > { %4333 = vrot.lane.b32.xlu0 %v8752_v25, %s5230_s17  ;;  %v6408_v29 = vpop.permute.xlu1 %4113 }
 0x175   : > { %8789 = vst [vmem:[#allocation41_spill] sm:$0xff] %v6408_v29 }
 0x176   : > { %v6412_v39 = vpop.permute.xlu0 %4123 }
 0x177   : > { %4343 = vrot.lane.b32.xlu2 %v8753_v48, %s5230_s17 }
 0x179   : > { %v6426_v25 = vpop.permute.xlu2 %4178 }
 0x17a   : > { %4338 = vrot.lane.b32.xlu1 %v8750_v24, %s5230_s17 }
 0x17c   : > { %4348 = vrot.lane.b32.xlu0 %v8758_v13, %s5230_s17  ;;  %v6420_v50 = vpop.permute.xlu1 %4128  ;;  %v591_v13 = vld [vmem:[#allocation2 + $0x1a8] sm:$0x3] }
 0x17d   : > { %v1397_v29 = vrot.slane %v591_v13, 1 }
 0x17e   : > { %v6422_v19 = vpop.permute.xlu0 %4138 }
 0x17f   : > { %8790 = vst [vmem:[#allocation42_spill] sm:$0xff] %v6422_v19  ;;  %4358 = vrot.lane.b32.xlu2 %v8759_v43, %s5230_s17  ;;  %v1394_v43 = vrot.slane %v6375_v15, 1  ;;  %v3880_v19 = vunpack.i.l.bf16 %v6134_v0 }
 0x181   : > { %v6440_v46 = vpop.permute.xlu2 %4193 }
 0x182   : > { %4353 = vrot.lane.b32.xlu1 %v8756_v18, %s5230_s17  ;;  %8793 = vst [vmem:[#allocation45_spill] sm:$0xff] %v6440_v46  ;;  %v1396_v18 = vsel %vm640_vm3, %v1394_v43, %v1395_v51 }
 0x184   : > { %4363 = vrot.lane.b32.xlu0 %v8764_v1, %s5230_s17  ;;  %v6432_v48 = vpop.permute.xlu1 %4143 }
 0x185   : > { %8791 = vst [vmem:[#allocation43_spill] sm:$0xff] %v6432_v48 }
 0x186   : > { %v6434_v24 = vpop.permute.xlu0 %4153 }
 0x187   : > { %8792 = vst [vmem:[#allocation44_spill] sm:$0xff] %v6434_v24  ;;  %4373 = vrot.lane.b32.xlu2 %v5921_v49, %s5230_s17  ;;  %v1398_v49 = vsel %vm640_vm3, %v1395_v51, %v1397_v29 }
 0x188   : > { %v4392_v38 = vpack.i.bf16 %v1398_v49, %v1396_v18 }
 0x189   : > { %v6456_v46 = vpop.permute.xlu2 %4208 }
 0x18a   : > { %4368 = vrot.lane.b32.xlu1 %v8762_v35, %s5230_s17 }
 0x18c   : > { %4378 = vrot.lane.b32.xlu0 %v5907_v10, %s5230_s17  ;;  %v6446_v1 = vpop.permute.xlu1 %4158 }
 0x18e   : > { %v6450_v24 = vpop.permute.xlu0 %4168 }
 0x18f   : > { %4388 = vrot.lane.b32.xlu2 %v6244_v21, %s5230_s17 }
 0x191   : > { %v6473_v29 = vpop.permute.xlu2 %4223 }
 0x192   : > { %4383 = vrot.lane.b32.xlu1 %v5927_v23, %s5230_s17  ;;  %v1496_v23 = vrot.slane %v6377_v26, 2  ;;  %8796 = vst [vmem:[#allocation48_spill] sm:$0xff] %v6473_v29 }
 0x194   : > { %4393 = vrot.lane.b32.xlu0 %v4392_v38, %s5230_s17  ;;  %v6459_v10 = vpop.permute.xlu1 %4173  ;;  %v1495_v38 = vrot.slane %v6375_v15, 2 }
 0x196   : > { %v6461_v35 = vpop.permute.xlu0 %4183 }
 0x197   : > { %8794 = vst [vmem:[#allocation46_spill] sm:$0xff] %v6461_v35  ;;  %4403 = vrot.lane.b32.xlu2 %v5969_v63, %s5231_s18  ;;  %v1498_v63 = vrot.slane %v591_v13, 2 }
 0x19a   : > { %4398 = vrot.lane.b32.xlu1 %v5952_v2, %s5231_s18  ;;  %v1497_v2 = vsel %vm817_vm4, %v1495_v38, %v1496_v23 }
 0x19c   : > { %4408 = vrot.lane.b32.xlu0 %v5959_v4, %s5231_s18  ;;  %v6469_v21 = vpop.permute.xlu1 %4188  ;;  %v1499_v4 = vsel %vm817_vm4, %v1496_v23, %v1498_v63 }
 0x19d   : > { %8795 = vst [vmem:[#allocation47_spill] sm:$0xff] %v6469_v21  ;;  %v4472_v43 = vpack.i.bf16 %v1499_v4, %v1497_v2 }
 0x19e   : > { %v6475_v51 = vpop.permute.xlu0 %4198 }
 0x19f   : > { %4418 = vrot.lane.b32.xlu2 %v5996_v37, %s5231_s18  ;;  %v6491_v37 = vpop.permute.xlu2 %4238 }
 0x1a2   : > { %4413 = vrot.lane.b32.xlu1 %v5978_v41, %s5231_s18 }
 0x1a4   : > { %4423 = vrot.lane.b32.xlu0 %v5986_v56, %s5231_s18  ;;  %v6485_v15 = vpop.permute.xlu1 %4203 }
 0x1a6   : > { %v6487_v26 = vpop.permute.xlu0 %4213 }
 0x1a7   : > { %8797 = vst [vmem:[#allocation49_spill] sm:$0xff] %v6487_v26  ;;  %4433 = vrot.lane.b32.xlu2 %v6023_v58, %s5231_s18  ;;  %v6503_v56 = vpop.permute.xlu2 %4253 }
 0x1aa   : > { %4428 = vrot.lane.b32.xlu1 %v6005_v28, %s5231_s18 }
 0x1ac   : > { %4438 = vrot.lane.b32.xlu0 %v6013_v14, %s5231_s18  ;;  %v6497_v41 = vpop.permute.xlu1 %4218 }
 0x1ad   : > { %8798 = vst [vmem:[#allocation50_spill] sm:$0xff] %v6497_v41 }
 0x1ae   : > { %v6499_v13 = vpop.permute.xlu0 %4228 }
 0x1af   : > { %8799 = vst [vmem:[#allocation51_spill] sm:$0xff] %v6499_v13  ;;  %4448 = vrot.lane.b32.xlu2 %v6047_v12, %s5231_s18  ;;  %v6517_v14 = vpop.permute.xlu2 %4268 }
 0x1b0   : > { %8801 = vst [vmem:[#allocation53_spill] sm:$0xff] %v6517_v14 }
 0x1b2   : > { %4443 = vrot.lane.b32.xlu1 %v6032_v20, %s5231_s18 }
 0x1b4   : > { %4453 = vrot.lane.b32.xlu0 %v6039_v53, %s5231_s18  ;;  %v6509_v58 = vpop.permute.xlu1 %4233 }
 0x1b5   : > { %8800 = vst [vmem:[#allocation52_spill] sm:$0xff] %v6509_v58 }
 0x1b6   : > { %v6511_v28 = vpop.permute.xlu0 %4243 }
 0x1b7   : > { %4463 = vrot.lane.b32.xlu2 %v6068_v7, %s5231_s18  ;;  %v6528_v18 = vpop.permute.xlu2 %4283 }
 0x1ba   : > { %4458 = vrot.lane.b32.xlu1 %v6054_v11, %s5231_s18 }
 0x1bc   : > { %4468 = vrot.lane.b32.xlu0 %v6320_v8, %s5231_s18  ;;  %v6521_v12 = vpop.permute.xlu1 %4248 }
 0x1be   : > { %v6523_v20 = vpop.permute.xlu0 %4258 }
 0x1bf   : > { %8802 = vst [vmem:[#allocation54_spill] sm:$0xff] %v6523_v20  ;;  %v6536_v23 = vpop.permute.xlu2 %4298 }
 0x1c0   : > { %8805 = vst [vmem:[#allocation57_spill] sm:$0xff] %v6536_v23  ;;  %v3840_v23 = vunpack.i.l.bf16 %v6144_v45 }
 0x1c2   : > { %4473 = vrot.lane.b32.xlu1 %v4472_v43, %s5231_s18  ;;  %v1879_v43 = vld [vmem:[%s8583_s1 + $0x10] sm:$0x3] }
 0x1c4   : > { %v6526_v53 = vpop.permute.xlu1 %4263 }
 0x1c5   : > { %8803 = vst [vmem:[#allocation55_spill] sm:$0xff] %v6526_v53  ;;  %v5122_v53 = vld [vmem:[#allocation2 + $0x8] sm:$0xff] }
 0x1c6   : > { %v6530_v49 = vpop.permute.xlu0 %4273 }
 0x1c7   : > { %8804 = vst [vmem:[#allocation56_spill] sm:$0xff] %v6530_v49  ;;  %v6542_v63 = vpop.permute.xlu2 %4313  ;;  %v1889_v49 = vunpack.c.l.b16 %v1879_v43 }
 0x1c8   : > { %8808 = vst [vmem:[#allocation60_spill] sm:$0xff] %v6542_v63  ;;  %v3811_v63 = vld [vmem:[%s8583_s1 + $0x8] sm:$0xff] }
 0x1c9   : > { %v1892_v14 = vpack.c.b16 %v1889_v49, %v1889_v49  ;;  %v3810_v49 = vld [vmem:[%s8583_s1] sm:$0xff] }
 0x1cc   : > { %v6532_v7 = vpop.permute.xlu1 %4278 }
 0x1ce   : > { %v6534_v11 = vpop.permute.xlu0 %4288 }
 0x1cf   : > { %v6551_v58 = vpop.permute.xlu2 %4328 }
 0x1d4   : > { %v6538_v38 = vpop.permute.xlu1 %4293 }
 0x1d5   : > { %8806 = vst [vmem:[#allocation58_spill] sm:$0xff] %v6538_v38  ;;  %v4001_v38 = vunpack.i.h.bf16 %v6258_v54 }
 0x1d6   : > { %v6540_v8 = vpop.permute.xlu0 %4303 }
 0x1d7   : > { %8807 = vst [vmem:[#allocation59_spill] sm:$0xff] %v6540_v8  ;;  %v1946_v8 = vsel %vm1944_vm5, %v1892_v14, 0  ;;  %v6563_v21 = vpop.permute.xlu2 %4343 }
 0x1d8   : > { %1953 = vmatpush.bf16.msra.mxu0 %v1946_v8  ;;  %3814 = vmatpush.bf16.msra.mxu2 %v1946_v8  ;;  %8811 = vst [vmem:[#allocation63_spill] sm:$0xff] %v6563_v21  ;;  %v3860_v21 = vunpack.i.l.bf16 %v6090_v61 }
 0x1dc   : > { %v6544_v2 = vpop.permute.xlu1 %4308  ;;  %1954 = vmatpush.bf16.msra.mxu0 %v3811_v63  ;;  %3815 = vmatpush.bf16.msra.mxu2 %v3811_v63  ;;  %v3841_v63 = vunpack.i.h.bf16 %v6144_v45  ;;  %v5124_v45 = vld [vmem:[#allocation2] sm:$0xff] }
 0x1dd   : > { %8809 = vst [vmem:[#allocation61_spill] sm:$0xff] %v6544_v2 }
 0x1de   : > { %v6546_v4 = vpop.permute.xlu0 %4318  ;;  %v1597_v35 = vsel %vm280_vm0, %v5122_v53, %v3841_v63  ;;  %v6601_v53 = vsel %vm280_vm0, %v6334_v52, %v3860_v21  ;;  %v4000_v63 = vunpack.i.l.bf16 %v6258_v54  ;;  %v5127_v52 = vld [vmem:[#allocation2 + $0xc0] sm:$0xff]  ;;  %v4081_v54 = vunpack.i.h.bf16 %v6371_v22 }
 0x1df   : > { %v6574_v30 = vpop.permute.xlu2 %4358  ;;  %v6615_v21 = vsel %vm280_vm0, %v5127_v52, %v3880_v19  ;;  %v4241_v19 = vunpack.i.h.bf16 %v6491_v37 }
 0x1e0   : > { %1955 = vmatpush.bf16.msra.mxu0 %v3810_v49  ;;  %3816 = vmatpush.bf16.msra.mxu2 %v3810_v49  ;;  %v3866_v49 = vunpack.i.h.bf16 %v6114_v32 }
 0x1e4   : > { %v6553_v13 = vpop.permute.xlu1 %4323 }
 0x1e6   : > { %v6555_v29 = vpop.permute.xlu0 %4333 }
 0x1e7   : > { %v6586_v41 = vpop.permute.xlu2 %4373 }
 0x1e8   : > { %8815 = vst [vmem:[#allocation67_spill] sm:$0xff] %v6586_v41 }
 0x1ec   : > { %v6561_v2 = vpop.permute.xlu1 %4338 }
 0x1ed   : > { %8810 = vst [vmem:[#allocation62_spill] sm:$0xff] %v6561_v2 }
 0x1ee   : > { %v6565_v48 = vpop.permute.xlu0 %4348 }
 0x1ef   : > { %8812 = vst [vmem:[#allocation64_spill] sm:$0xff] %v6565_v48  ;;  %v3861_v48 = vunpack.i.h.bf16 %v6090_v61  ;;  %v1596_v61 = vsel %vm280_vm0, %v5124_v45, %v3840_v23  ;;  %v5126_v23 = vld [vmem:[#allocation2 + $0xc8] sm:$0xff]  ;;  %v4080_v45 = vunpack.i.l.bf16 %v6371_v22  ;;  %v4321_v22 = vunpack.i.h.bf16 %v6546_v4 }
 0x1f1   : > { %v6592_v34 = vsel %vm280_vm0, %v5123_v40, %v3861_v48  ;;  %v5125_v40 = vld [vmem:[#allocation2 + $0x80] sm:$0xff] }
 0x1f2   : > { %v6606_v48 = vsel %vm280_vm0, %v5125_v40, %v3866_v49  ;;  %v4160_v49 = vunpack.i.l.bf16 %v6446_v1  ;;  %v1629_v40 = vsel %vm1628_vm7, %v1596_v61, %v3920_v55  ;;  %v3851_v55 = vunpack.i.h.bf16 %v6170_v60 }
 0x1f3   : > { %8817 = vst [vmem:[#allocation69_spill] sm:$0xff] %v6606_v48  ;;  %v4240_v48 = vunpack.i.l.bf16 %v6491_v37 }
 0x1f4   : > { %v6570_v14 = vpop.permute.xlu1 %4353 }
 0x1f5   : > { %8813 = vst [vmem:[#allocation65_spill] sm:$0xff] %v6570_v14  ;;  %v3881_v14 = vunpack.i.h.bf16 %v6134_v0 }
 0x1f6   : > { %v6572_v43 = vpop.permute.xlu0 %4363 }
 0x1fc   : > { %v6576_v8 = vpop.permute.xlu1 %4368 }
 0x1fe   : > { %v6578_v6 = vpop.permute.xlu0 %4378 }
 0x1ff   : > { %8814 = vst [vmem:[#allocation66_spill] sm:$0xff] %v6578_v6  ;;  %v3921_v6 = vunpack.i.h.bf16 %v6236_v44  ;;  %v6609_v44 = vsel %vm280_vm0, %v5126_v23, %v3881_v14  ;;  %v4161_v23 = vunpack.i.h.bf16 %v6446_v1 }
 0x201   : > { %v1630_v0 = vsel %vm1628_vm7, %v1597_v35, %v3921_v6  ;;  %v4320_v35 = vunpack.i.l.bf16 %v6546_v4 }
 0x202   : > { %v1663_v14 = vsel %vm1661_vm6, %v1630_v0, %v4001_v38  ;;  %v3850_v38 = vunpack.i.l.bf16 %v6170_v60  ;;  %v3846_v0 = vunpack.i.h.bf16 %v6172_v42 }
 0x203   : > { %v1696_v1 = vsel %vm1694_vm8, %v1663_v14, %v4081_v54  ;;  %v3925_v54 = vunpack.i.l.bf16 %v6192_v31 }
 0x204   : > { %v6597_v2 = vpop.permute.xlu1 %4383  ;;  %v1729_v37 = vsel %vm1727_vm10, %v1696_v1, %v4161_v23  ;;  %v3926_v23 = vunpack.i.h.bf16 %v6192_v31 }
 0x205   : > { %8816 = vst [vmem:[#allocation68_spill] sm:$0xff] %v6597_v2  ;;  %v1762_v4 = vsel %vm1760_vm9, %v1729_v37, %v4241_v19  ;;  %v8820_v19 = vld [vmem:[#allocation17_spill] sm:$0xff] }
 0x206   : > { %v6612_v2 = vpop.permute.xlu0 %4393 }
 0x207   : > { %8818 = vst [vmem:[#allocation70_spill] sm:$0xff] %v6612_v2  ;;  %v1662_v2 = vsel %vm1661_vm6, %v1629_v40, %v4000_v63  ;;  %v3845_v63 = vunpack.i.l.bf16 %v6172_v42  ;;  %v1795_v42 = vsel %vm1793_vm11, %v1762_v4, %v4321_v22  ;;  %v5131_v4 = vld [vmem:[#allocation2 + $0x18] sm:$0xff] }
 0x208   : > { %v1695_v6 = vsel %vm1694_vm8, %v1662_v2, %v4080_v45  ;;  %v6637_v45 = vpop.permute.xlu2 %4388 }
 0x209   : > { %v1728_v61 = vsel %vm1727_vm10, %v1695_v6, %v4160_v49  ;;  %8819 = vst [vmem:[#allocation71_spill] sm:$0xff] %v6637_v45 }
 0x20a   : > { %v1761_v2 = vsel %vm1760_vm9, %v1728_v61, %v4240_v48  ;;  %v5128_v61 = vld [vmem:[#allocation2 + $0x38] sm:$0xff] }
 0x20b   : > { %v1794_v49 = vsel %vm1793_vm11, %v1761_v2, %v4320_v35  ;;  %v6650_v37 = vsel %vm280_vm0, %v5128_v61, %v3851_v55  ;;  %v5129_v35 = vld [vmem:[#allocation2 + $0x30] sm:$0xff]  ;;  %v5130_v2 = vld [vmem:[#allocation2 + $0x20] sm:$0xff]  ;;  %v8823_v61 = vld [vmem:[#allocation31_spill] sm:$0xff] }
 0x20c   : > { %v4399_v52 = vpop.permute.xlu1 %4398  ;;  %v6654_v22 = vsel %vm280_vm0, %v5129_v35, %v3850_v38  ;;  %v1599_v31 = vsel %vm280_vm0, %v5130_v2, %v3846_v0  ;;  %v4006_v1 = vunpack.i.h.bf16 %v8823_v61  ;;  %v4041_v0 = vunpack.i.h.bf16 %v6345_v36  ;;  %v8825_v2 = vld [vmem:[#allocation18_spill] sm:$0xff] }
 0x20d   : > { %v4401_v40 = vunpack.i.h.bf16 %v4399_v52  ;;  %v4400_v60 = vunpack.i.l.bf16 %v4399_v52  ;;  %v8821_v52 = vld [vmem:[#allocation22_spill] sm:$0xff]  ;;  %v1632_v38 = vsel %vm1628_vm7, %v1599_v31, %v3926_v23  ;;  %v8826_v23 = vld [vmem:[#allocation24_spill] sm:$0xff]  ;;  %v4165_v35 = vunpack.i.l.bf16 %v6410_v5 }
 0x20e   : > { %v6641_v14 = vpop.permute.xlu0 %4408  ;;  %v3961_v45 = vunpack.i.h.bf16 %v8821_v52  ;;  %v4245_v31 = vunpack.i.l.bf16 %v6511_v28 }
 0x20f   : > { %v1827_v48 = vsel %vm1826_vm12, %v1794_v49, %v4400_v60  ;;  %v1828_v6 = vsel %vm1826_vm12, %v1795_v42, %v4401_v40  ;;  %v1598_v40 = vsel %vm280_vm0, %v5131_v4, %v3845_v63  ;;  %v3960_v60 = vunpack.i.l.bf16 %v8821_v52  ;;  %v8822_v49 = vld [vmem:[#allocation5_spill] sm:$0xff] }
 0x210   : > { %v1859_v41 = vpack.c.bf16 %v1828_v6, %v1827_v48  ;;  %v1631_v55 = vsel %vm1628_vm7, %v1598_v40, %v3925_v54  ;;  %v4005_v48 = vunpack.i.l.bf16 %v8823_v61  ;;  %v8824_v6 = vld [vmem:[#allocation7_spill] sm:$0xff]  ;;  %v4040_v63 = vunpack.i.l.bf16 %v6345_v36 }
 0x211   : > { %v1646_v40 = vsel %vm1628_vm7, %v6609_v44, %v3961_v45  ;;  %v4086_v42 = vunpack.i.h.bf16 %v6387_v62  ;;  %v4085_v36 = vunpack.i.l.bf16 %v6387_v62  ;;  %v1665_v4 = vsel %vm1661_vm6, %v1632_v38, %v4006_v1  ;;  %v4404_v44 = vpop.permute.xlu2 %4403 }
 0x212   : > { %3766 = vmatmul.msk.bf16.vlgmr.msra.gmra.mxu0 %vm1895_vm13, %v1859_v41  ;;  %v1645_v41 = vsel %vm1628_vm7, %v6615_v21, %v3960_v60  ;;  %v1664_v52 = vsel %vm1661_vm6, %v1631_v55, %v4005_v48  ;;  %v4166_v54 = vunpack.i.h.bf16 %v6410_v5  ;;  %v1679_v21 = vsel %vm1661_vm6, %v1646_v40, %v4041_v0 }
 0x213   : > { %v1678_v26 = vsel %vm1661_vm6, %v1645_v41, %v4040_v63  ;;  %v4246_v60 = vunpack.i.h.bf16 %v6511_v28  ;;  %v4121_v62 = vunpack.i.h.bf16 %v6363_v47  ;;  %v4120_v55 = vunpack.i.l.bf16 %v6363_v47 }
 0x214   : > { %v6673_v61 = vpop.permute.xlu1 %4413  ;;  %v4326_v1 = vunpack.i.h.bf16 %v6553_v13  ;;  %v4325_v48 = vunpack.i.l.bf16 %v6553_v13  ;;  %v1697_v5 = vsel %vm1694_vm8, %v1664_v52, %v4085_v36  ;;  %v1698_v38 = vsel %vm1694_vm8, %v1665_v4, %v4086_v42 }
 0x215   : > { %v4405_v63 = vunpack.i.l.bf16 %v4404_v44  ;;  %v1730_v0 = vsel %vm1727_vm10, %v1697_v5, %v4165_v35  ;;  %v1731_v40 = vsel %vm1727_vm10, %v1698_v38, %v4166_v54  ;;  %v4201_v28 = vunpack.i.h.bf16 %v6475_v51  ;;  %v8828_v5 = vld [vmem:[#allocation29_spill] sm:$0xff] }
 0x216   : > { %v6684_v45 = vpop.permute.xlu0 %4423  ;;  %v4200_v41 = vunpack.i.l.bf16 %v6475_v51  ;;  %v1763_v47 = vsel %vm1760_vm9, %v1730_v0, %v4245_v31  ;;  %v1764_v20 = vsel %vm1760_vm9, %v1731_v40, %v4246_v60  ;;  %v4281_v13 = vunpack.i.h.bf16 %v6532_v7 }
 0x217   : > { %8827 = vst [vmem:[#allocation17_spill] sm:$0xff] %v6684_v45  ;;  %v4406_v45 = vunpack.i.h.bf16 %v4404_v44  ;;  %v4280_v52 = vunpack.i.l.bf16 %v6532_v7  ;;  %v4361_v42 = vunpack.i.h.bf16 %v6574_v30  ;;  %v4360_v4 = vunpack.i.l.bf16 %v6574_v30 }
 0x218   : > { %v1796_v35 = vsel %vm1793_vm11, %v1763_v47, %v4325_v48  ;;  %v1797_v54 = vsel %vm1793_vm11, %v1764_v20, %v4326_v1  ;;  %v1711_v36 = vsel %vm1694_vm8, %v1678_v26, %v4120_v55  ;;  %v1712_v51 = vsel %vm1694_vm8, %v1679_v21, %v4121_v62 }
 0x219   : > { %v1829_v31 = vsel %vm1826_vm12, %v1796_v35, %v4405_v63  ;;  %v1830_v44 = vsel %vm1826_vm12, %v1797_v54, %v4406_v45  ;;  %v3965_v60 = vunpack.i.l.bf16 %v8826_v23  ;;  %v4046_v7 = vunpack.i.h.bf16 %v8828_v5 }
 0x21a   : > { %v1744_v38 = vsel %vm1727_vm10, %v1711_v36, %v4200_v41  ;;  %v1745_v30 = vsel %vm1727_vm10, %v1712_v51, %v4201_v28  ;;  %v4045_v55 = vunpack.i.l.bf16 %v8828_v5  ;;  %v1860_v45 = vpack.c.bf16 %v1830_v44, %v1829_v31  ;;  %v5133_v51 = vld [vmem:[#allocation2 + $0xd8] sm:$0xff] }
 0x21b   : > { %v1777_v20 = vsel %vm1760_vm9, %v1744_v38, %v4280_v52  ;;  %v1778_v26 = vsel %vm1760_vm9, %v1745_v30, %v4281_v13  ;;  %v4011_v40 = vunpack.i.h.bf16 %v6316_v33  ;;  %v4010_v28 = vunpack.i.l.bf16 %v6316_v33 }
 0x21c   : > { %v6716_v0 = vpop.permute.xlu1 %4428  ;;  %v1810_v1 = vsel %vm1793_vm11, %v1777_v20, %v4360_v4  ;;  %v1811_v63 = vsel %vm1793_vm11, %v1778_v26, %v4361_v42  ;;  %v3855_v52 = vunpack.i.l.bf16 %v8822_v49  ;;  %v4091_v13 = vunpack.i.h.bf16 %v6340_v59  ;;  %v5132_v4 = vld [vmem:[#allocation2 + $0xe0] sm:$0xff] }
 0x21d   : > { %v4090_v35 = vunpack.i.l.bf16 %v6340_v59  ;;  %v8829_v42 = vunpack.i.h.bf16 %v8824_v6  ;;  %v8830_v33 = vunpack.i.l.bf16 %v8824_v6  ;;  %v4126_v44 = vunpack.i.h.bf16 %v6412_v39 }
 0x21e   : > { %v4439_v48 = vpop.permute.xlu0 %4438  ;;  %v4125_v5 = vunpack.i.l.bf16 %v6412_v39  ;;  %v8831_v38 = vunpack.i.h.bf16 %v8825_v2  ;;  %v8832_v30 = vunpack.i.l.bf16 %v8825_v2  ;;  %v8833_v6 = vunpack.i.h.bf16 %v8826_v23 }
 0x21f   : > { %v4441_v21 = vunpack.i.h.bf16 %v4439_v48  ;;  %v4440_v62 = vunpack.i.l.bf16 %v4439_v48  ;;  %v1615_v36 = vsel %vm280_vm0, %v5132_v4, %v8829_v42  ;;  %v1614_v31 = vsel %vm280_vm0, %v5133_v51, %v8830_v33 }
 0x220   : > { %v1634_v59 = vsel %vm1628_vm7, %v6650_v37, %v8831_v38  ;;  %v1633_v48 = vsel %vm1628_vm7, %v6654_v22, %v8832_v30  ;;  %v1647_v20 = vsel %vm1628_vm7, %v1614_v31, %v3965_v60  ;;  %v1648_v26 = vsel %vm1628_vm7, %v1615_v36, %v8833_v6 }
 0x221   : > { %v1843_v41 = vsel %vm1826_vm12, %v1810_v1, %v4440_v62  ;;  %v1844_v47 = vsel %vm1826_vm12, %v1811_v63, %v4441_v21  ;;  %v6751_v21 = vpop.permute.xlu2 %4418  ;;  %v1680_v39 = vsel %vm1661_vm6, %v1647_v20, %v4045_v55  ;;  %v1681_v62 = vsel %vm1661_vm6, %v1648_v26, %v4046_v7  ;;  %v8835_v26 = vld [vmem:[#allocation11_spill] sm:$0xff] }
 0x222   : > { %3767 = vmatmul.msk.bf16.gmra.mxu0 %vm1895_vm13, %v1860_v45  ;;  %v1867_v54 = vpack.c.bf16 %v1844_v47, %v1843_v41  ;;  %v1666_v37 = vsel %vm1661_vm6, %v1633_v48, %v4010_v28  ;;  %v1667_v2 = vsel %vm1661_vm6, %v1634_v59, %v4011_v40  ;;  %v4171_v23 = vunpack.i.h.bf16 %v6450_v24  ;;  %v5134_v48 = vld [vmem:[#allocation2 + $0x50] sm:$0xff] }
 0x223   : > { %v1699_v22 = vsel %vm1694_vm8, %v1666_v37, %v4090_v35  ;;  %v1700_v60 = vsel %vm1694_vm8, %v1667_v2, %v4091_v13  ;;  %v4170_v45 = vunpack.i.l.bf16 %v6450_v24  ;;  %v1713_v1 = vsel %vm1694_vm8, %v1680_v39, %v4125_v5 }
 0x224   : > { %3774 = vmatmul.msk.bf16.vlgmr.msra.gmra.mxu2 %vm1895_vm13, %v1867_v54  ;;  %v1714_v63 = vsel %vm1694_vm8, %v1681_v62, %v4126_v44  ;;  %v4251_v55 = vunpack.i.h.bf16 %v6521_v12  ;;  %v4250_v7 = vunpack.i.l.bf16 %v6521_v12  ;;  %v4206_v28 = vunpack.i.h.bf16 %v6485_v15  ;;  %v4444_v13 = vpop.permute.xlu1 %4443 }
 0x225   : > { %v4205_v40 = vunpack.i.l.bf16 %v6485_v15  ;;  %v4331_v41 = vunpack.i.h.bf16 %v6551_v58  ;;  %v4330_v47 = vunpack.i.l.bf16 %v6551_v58  ;;  %v4286_v35 = vunpack.i.h.bf16 %v6528_v18 }
 0x226   : > { %v4285_v24 = vunpack.i.l.bf16 %v6528_v18  ;;  %v4411_v54 = vunpack.i.h.bf16 %v6641_v14  ;;  %v4410_v4 = vunpack.i.l.bf16 %v6641_v14  ;;  %v1732_v42 = vsel %vm1727_vm10, %v1699_v22, %v4170_v45 }
 0x227   : > { %v1733_v12 = vsel %vm1727_vm10, %v1700_v60, %v4171_v23  ;;  %v4366_v36 = vunpack.i.h.bf16 %v6572_v43  ;;  %v4365_v15 = vunpack.i.l.bf16 %v6572_v43  ;;  %v1765_v51 = vsel %vm1760_vm9, %v1732_v42, %v4250_v7  ;;  %v8836_v60 = vld [vmem:[#allocation16_spill] sm:$0xff] }
 0x228   : > { %v1766_v58 = vsel %vm1760_vm9, %v1733_v12, %v4251_v55  ;;  %v4446_v33 = vunpack.i.h.bf16 %v4444_v13  ;;  %v4445_v31 = vunpack.i.l.bf16 %v4444_v13  ;;  %v1746_v18 = vsel %vm1727_vm10, %v1713_v1, %v4205_v40  ;;  %v8837_v55 = vld [vmem:[#allocation19_spill] sm:$0xff] }
 0x229   : > { %v1747_v44 = vsel %vm1727_vm10, %v1714_v63, %v4206_v28  ;;  %v1798_v14 = vsel %vm1793_vm11, %v1765_v51, %v4330_v47  ;;  %v1799_v5 = vsel %vm1793_vm11, %v1766_v58, %v4331_v41  ;;  %v1779_v38 = vsel %vm1760_vm9, %v1746_v18, %v4285_v24  ;;  %v6792_v62 = vpop.permute.xlu2 %4433  ;;  %v8838_v41 = vld [vmem:[#allocation23_spill] sm:$0xff]  ;;  %v5137_v58 = vld [vmem:[#allocation2 + $0xf0] sm:$0xff] }
 0x22a   : > { %v1780_v59 = vsel %vm1760_vm9, %v1747_v44, %v4286_v35  ;;  %v1831_v43 = vsel %vm1826_vm12, %v1798_v14, %v4410_v4  ;;  %v1832_v30 = vsel %vm1826_vm12, %v1799_v5, %v4411_v54  ;;  %v8834_v20 = vunpack.i.h.bf16 %v8822_v49  ;;  %v5135_v54 = vld [vmem:[#allocation2 + $0x48] sm:$0xff] }
 0x22b   : > { %v3891_v39 = vunpack.i.h.bf16 %v8835_v26  ;;  %v1812_v37 = vsel %vm1793_vm11, %v1779_v38, %v4365_v15  ;;  %v1813_v2 = vsel %vm1793_vm11, %v1780_v59, %v4366_v36  ;;  %v3890_v22 = vunpack.i.l.bf16 %v8835_v26  ;;  %v5136_v15 = vld [vmem:[#allocation2 + $0xf8] sm:$0xff] }
 0x22c   : > { %v1603_v6 = vsel %vm280_vm0, %v5134_v48, %v8834_v20  ;;  %v3971_v23 = vunpack.i.h.bf16 %v8836_v60  ;;  %v1845_v45 = vsel %vm1826_vm12, %v1812_v37, %v4445_v31  ;;  %v1846_v1 = vsel %vm1826_vm12, %v1813_v2, %v4446_v33 }
 0x22d   : > { %v3970_v63 = vunpack.i.l.bf16 %v8836_v60  ;;  %v3936_v7 = vunpack.i.h.bf16 %v8837_v55  ;;  %v3935_v28 = vunpack.i.l.bf16 %v8837_v55  ;;  %v1861_v40 = vpack.c.bf16 %v1832_v30, %v1831_v43 }
 0x22e   : > { %v4016_v47 = vunpack.i.h.bf16 %v8838_v41  ;;  %v4015_v13 = vunpack.i.l.bf16 %v8838_v41  ;;  %v4051_v35 = vunpack.i.h.bf16 %v6347_v17  ;;  %v4050_v24 = vunpack.i.l.bf16 %v6347_v17 }
 0x22f   : > { %v1602_v4 = vsel %vm280_vm0, %v5135_v54, %v3855_v52  ;;  %v4096_v42 = vunpack.i.h.bf16 %v6389_v9  ;;  %v4095_v12 = vunpack.i.l.bf16 %v6389_v9  ;;  %v1868_v36 = vpack.c.bf16 %v1846_v1, %v1845_v45  ;;  %v5138_v54 = vld [vmem:[#allocation2 + $0x78] sm:$0xff] }
 0x230   : > { %v1617_v51 = vsel %vm280_vm0, %v5136_v15, %v3891_v39  ;;  %v1616_v33 = vsel %vm280_vm0, %v5137_v58, %v3890_v22  ;;  %v4131_v17 = vunpack.i.h.bf16 %v6420_v50  ;;  %v4130_v31 = vunpack.i.l.bf16 %v6420_v50 }
 0x231   : > { %v1650_v49 = vsel %vm1628_vm7, %v1617_v51, %v3971_v23  ;;  %v1649_v52 = vsel %vm1628_vm7, %v1616_v33, %v3970_v63  ;;  %v1635_v18 = vsel %vm1628_vm7, %v1602_v4, %v3935_v28  ;;  %v1636_v9 = vsel %vm1628_vm7, %v1603_v6, %v3936_v7  ;;  %v4449_v60 = vpop.permute.xlu2 %4448  ;;  %v5139_v51 = vld [vmem:[#allocation2 + $0x110] sm:$0xff] }
 0x232   : > { %3768 = vmatmul.msk.bf16.gmra.mxu0 %vm1895_vm13, %v1861_v40  ;;  %v1669_v44 = vsel %vm1661_vm6, %v1636_v9, %v4016_v47  ;;  %v1668_v14 = vsel %vm1661_vm6, %v1635_v18, %v4015_v13  ;;  %v1683_v5 = vsel %vm1661_vm6, %v1650_v49, %v4051_v35  ;;  %v1682_v38 = vsel %vm1661_vm6, %v1649_v52, %v4050_v24  ;;  %v8842_v18 = vld [vmem:[#allocation25_spill] sm:$0xff] }
 0x233   : > { %v1702_v50 = vsel %vm1694_vm8, %v1669_v44, %v4096_v42  ;;  %v1701_v59 = vsel %vm1694_vm8, %v1668_v14, %v4095_v12  ;;  %v4176_v43 = vunpack.i.h.bf16 %v6459_v10  ;;  %v4175_v30 = vunpack.i.l.bf16 %v6459_v10 }
 0x234   : > { %3775 = vmatmul.msk.bf16.gmra.mxu2 %vm1895_vm13, %v1868_v36  ;;  %v1715_v48 = vsel %vm1694_vm8, %v1682_v38, %v4130_v31  ;;  %v1716_v20 = vsel %vm1694_vm8, %v1683_v5, %v4131_v17  ;;  %v4256_v6 = vunpack.i.h.bf16 %v6503_v56  ;;  %v4255_v26 = vunpack.i.l.bf16 %v6503_v56  ;;  %v8841_v17 = vld [vmem:[#allocation6_spill] sm:$0xff] }
 0x235   : > { %v4211_v39 = vunpack.i.h.bf16 %v6456_v46  ;;  %v4210_v37 = vunpack.i.l.bf16 %v6456_v46  ;;  %v4336_v2 = vunpack.i.h.bf16 %v6555_v29  ;;  %v4335_v22 = vunpack.i.l.bf16 %v6555_v29 }
 0x236   : > { %v4291_v23 = vunpack.i.h.bf16 %v6534_v11  ;;  %v4290_v10 = vunpack.i.l.bf16 %v6534_v11  ;;  %v4416_v45 = vunpack.i.h.bf16 %v6673_v61  ;;  %v4415_v1 = vunpack.i.l.bf16 %v6673_v61 }
 0x237   : > { %v1734_v63 = vsel %vm1727_vm10, %v1701_v59, %v4175_v30  ;;  %v1735_v56 = vsel %vm1727_vm10, %v1702_v50, %v4176_v43  ;;  %v4371_v55 = vunpack.i.h.bf16 %v6576_v8  ;;  %v4370_v46 = vunpack.i.l.bf16 %v6576_v8  ;;  %v5140_v59 = vld [vmem:[#allocation2 + $0x108] sm:$0xff] }
 0x238   : > { %v1767_v7 = vsel %vm1760_vm9, %v1734_v63, %v4255_v26  ;;  %v1768_v29 = vsel %vm1760_vm9, %v1735_v56, %v4256_v6  ;;  %v4451_v28 = vunpack.i.h.bf16 %v4449_v60  ;;  %v4450_v40 = vunpack.i.l.bf16 %v4449_v60  ;;  %v8843_v6 = vld [vmem:[#allocation4_spill] sm:$0xff] }
 0x239   : > { %v1748_v11 = vsel %vm1727_vm10, %v1715_v48, %v4210_v37  ;;  %v1749_v41 = vsel %vm1727_vm10, %v1716_v20, %v4211_v39  ;;  %v1800_v61 = vsel %vm1793_vm11, %v1767_v7, %v4335_v22  ;;  %v1801_v47 = vsel %vm1793_vm11, %v1768_v29, %v4336_v2  ;;  %v8845_v29 = vld [vmem:[#allocation49_spill] sm:$0xff] }
 0x23a   : > { %v1781_v13 = vsel %vm1760_vm9, %v1748_v11, %v4290_v10  ;;  %v1782_v35 = vsel %vm1760_vm9, %v1749_v41, %v4291_v23  ;;  %v1833_v8 = vsel %vm1826_vm12, %v1800_v61, %v4415_v1  ;;  %v1834_v24 = vsel %vm1826_vm12, %v1801_v47, %v4416_v45  ;;  %v8846_v11 = vld [vmem:[#allocation62_spill] sm:$0xff]  ;;  %v4454_v47 = vpop.permute.xlu0 %4453 }
 0x23b   : > { %v8839_v4 = vunpack.i.l.bf16 %v6114_v32  ;;  %v3895_v12 = vunpack.i.l.bf16 %v8820_v19  ;;  %v1814_v36 = vsel %vm1793_vm11, %v1781_v13, %v4370_v46  ;;  %v1815_v15 = vsel %vm1793_vm11, %v1782_v35, %v4371_v55  ;;  %v8844_v55 = vld [vmem:[#allocation54_spill] sm:$0xff] }
 0x23c   : > { %v8840_v58 = vunpack.i.h.bf16 %v8820_v19  ;;  %v3941_v31 = vunpack.i.h.bf16 %v8841_v17  ;;  %v1847_v49 = vsel %vm1826_vm12, %v1814_v36, %v4450_v40  ;;  %v1848_v32 = vsel %vm1826_vm12, %v1815_v15, %v4451_v28  ;;  %v8847_v13 = vld [vmem:[#allocation58_spill] sm:$0xff] }
 0x23d   : > { %v6859_v42 = vsel %vm280_vm0, %v5138_v54, %v8839_v4  ;;  %v3940_v52 = vunpack.i.l.bf16 %v8841_v17  ;;  %v3976_v9 = vunpack.i.h.bf16 %v8842_v18  ;;  %v3975_v44 = vunpack.i.l.bf16 %v8842_v18 }
 0x23e   : > { %v1619_v33 = vsel %vm280_vm0, %v5139_v51, %v8840_v58  ;;  %v1862_v14 = vpack.c.bf16 %v1834_v24, %v1833_v8  ;;  %v4021_v5 = vunpack.i.h.bf16 %v6318_v3  ;;  %v4020_v38 = vunpack.i.l.bf16 %v6318_v3 }
 0x23f   : > { %v4056_v19 = vunpack.i.h.bf16 %v6357_v27  ;;  %v4055_v50 = vunpack.i.l.bf16 %v6357_v27  ;;  %v1618_v43 = vsel %vm280_vm0, %v5140_v59, %v3895_v12  ;;  %v4136_v30 = vunpack.i.h.bf16 %v6381_v16  ;;  %v8848_v12 = vld [vmem:[#allocation67_spill] sm:$0xff] }
 0x240   : > { %v4135_v48 = vunpack.i.l.bf16 %v6381_v16  ;;  %v1869_v20 = vpack.c.bf16 %v1848_v32, %v1847_v49  ;;  %v3911_v26 = vunpack.i.h.bf16 %v8843_v6  ;;  %v3910_v39 = vunpack.i.l.bf16 %v8843_v6 }
 0x241   : > { %v4101_v3 = vunpack.i.h.bf16 %v6396_v57  ;;  %v4100_v37 = vunpack.i.l.bf16 %v6396_v57  ;;  %v1638_v27 = vsel %vm1628_vm7, %v6592_v34, %v3941_v31  ;;  %v1637_v2 = vsel %vm1628_vm7, %v6601_v53, %v3940_v52 }
 0x242   : > { %3769 = vmatmul.msk.bf16.gmra.mxu0 %vm1895_vm13, %v1862_v14  ;;  %v1652_v22 = vsel %vm1628_vm7, %v1619_v33, %v3976_v9  ;;  %v1651_v16 = vsel %vm1628_vm7, %v1618_v43, %v3975_v44  ;;  %v1671_v60 = vsel %vm1661_vm6, %v1638_v27, %v4021_v5  ;;  %v1670_v23 = vsel %vm1661_vm6, %v1637_v2, %v4020_v38  ;;  %v8849_v14 = vld [vmem:[#allocation8_spill] sm:$0xff]  ;;  %v8850_v38 = vld [vmem:[#allocation9_spill] sm:$0xff]  ;;  %v8852_v27 = vld [vmem:[#allocation27_spill] sm:$0xff] }
 0x243   : > { %v1684_v10 = vsel %vm1661_vm6, %v1651_v16, %v4055_v50  ;;  %v1685_v57 = vsel %vm1661_vm6, %v1652_v22, %v4056_v19  ;;  %v4181_v53 = vunpack.i.h.bf16 %v6426_v25  ;;  %v4180_v1 = vunpack.i.l.bf16 %v6426_v25 }
 0x244   : > { %3776 = vmatmul.msk.bf16.gmra.mxu2 %vm1895_vm13, %v1869_v20  ;;  %v1717_v45 = vsel %vm1694_vm8, %v1684_v10, %v4135_v48  ;;  %v1718_v34 = vsel %vm1694_vm8, %v1685_v57, %v4136_v30  ;;  %v1703_v63 = vsel %vm1694_vm8, %v1670_v23, %v4100_v37  ;;  %v1704_v56 = vsel %vm1694_vm8, %v1671_v60, %v4101_v3  ;;  %v8851_v30 = vld [vmem:[#allocation20_spill] sm:$0xff]  ;;  %v8854_v57 = vld [vmem:[#allocation34_spill] sm:$0xff] }
 0x245   : > { %v4261_v46 = vunpack.i.h.bf16 %v8844_v55  ;;  %v4260_v7 = vunpack.i.l.bf16 %v8844_v55  ;;  %v4216_v28 = vunpack.i.h.bf16 %v8845_v29  ;;  %v4215_v40 = vunpack.i.l.bf16 %v8845_v29  ;;  %v8853_v60 = vld [vmem:[#allocation32_spill] sm:$0xff] }
 0x246   : > { %v4341_v41 = vunpack.i.h.bf16 %v8846_v11  ;;  %v4340_v61 = vunpack.i.l.bf16 %v8846_v11  ;;  %v4296_v35 = vunpack.i.h.bf16 %v8847_v13  ;;  %v4295_v25 = vunpack.i.l.bf16 %v8847_v13  ;;  %v5142_v29 = vld [vmem:[#allocation2 + $0x120] sm:$0xff] }
 0x247   : > { %v4421_v8 = vunpack.i.h.bf16 %v6751_v21  ;;  %v4420_v24 = vunpack.i.l.bf16 %v6751_v21  ;;  %v1736_v54 = vsel %vm1727_vm10, %v1703_v63, %v4180_v1  ;;  %v1737_v4 = vsel %vm1727_vm10, %v1704_v56, %v4181_v53  ;;  %v8855_v1 = vld [vmem:[#allocation36_spill] sm:$0xff] }
 0x248   : > { %v4376_v36 = vunpack.i.h.bf16 %v8848_v12  ;;  %v4375_v15 = vunpack.i.l.bf16 %v8848_v12  ;;  %v1769_v51 = vsel %vm1760_vm9, %v1736_v54, %v4260_v7  ;;  %v1770_v58 = vsel %vm1760_vm9, %v1737_v4, %v4261_v46  ;;  %v5141_v46 = vld [vmem:[#allocation2 + $0x128] sm:$0xff] }
 0x249   : > { %v4456_v33 = vunpack.i.h.bf16 %v4454_v47  ;;  %v4455_v17 = vunpack.i.l.bf16 %v4454_v47  ;;  %v1750_v31 = vsel %vm1727_vm10, %v1717_v45, %v4215_v40  ;;  %v1751_v49 = vsel %vm1727_vm10, %v1718_v34, %v4216_v28  ;;  %v8856_v40 = vld [vmem:[#allocation42_spill] sm:$0xff] }
 0x24a   : > { %v1802_v21 = vsel %vm1793_vm11, %v1769_v51, %v4340_v61  ;;  %v1803_v32 = vsel %vm1793_vm11, %v1770_v58, %v4341_v41  ;;  %v1783_v52 = vsel %vm1760_vm9, %v1750_v31, %v4295_v25  ;;  %v1784_v18 = vsel %vm1760_vm9, %v1751_v49, %v4296_v35  ;;  %v8857_v61 = vld [vmem:[#allocation69_spill] sm:$0xff] }
 0x24b   : > { %v1835_v9 = vsel %vm1826_vm12, %v1802_v21, %v4420_v24  ;;  %v1836_v44 = vsel %vm1826_vm12, %v1803_v32, %v4421_v8  ;;  %v3871_v5 = vunpack.i.h.bf16 %v8849_v14  ;;  %v3901_v19 = vunpack.i.h.bf16 %v8850_v38  ;;  %v8860_v21 = vld [vmem:[#allocation50_spill] sm:$0xff] }
 0x24c   : > { %v1816_v50 = vsel %vm1793_vm11, %v1783_v52, %v4375_v15  ;;  %v1817_v59 = vsel %vm1793_vm11, %v1784_v18, %v4376_v36  ;;  %v3900_v43 = vunpack.i.l.bf16 %v8850_v38  ;;  %v3946_v48 = vunpack.i.h.bf16 %v8851_v30  ;;  %v8858_v15 = vld [vmem:[#allocation46_spill] sm:$0xff]  ;;  %v8861_v18 = vld [vmem:[#allocation63_spill] sm:$0xff]  ;;  %v4459_v38 = vpop.permute.xlu1 %4458 }
 0x24d   : > { %v1849_v20 = vsel %vm1826_vm12, %v1816_v50, %v4455_v17  ;;  %v1850_v3 = vsel %vm1826_vm12, %v1817_v59, %v4456_v33  ;;  %v3945_v37 = vunpack.i.l.bf16 %v8851_v30  ;;  %v3981_v2 = vunpack.i.h.bf16 %v8852_v27  ;;  %v8859_v17 = vld [vmem:[#allocation55_spill] sm:$0xff] }
 0x24e   : > { %v3980_v22 = vunpack.i.l.bf16 %v8852_v27  ;;  %v1863_v16 = vpack.c.bf16 %v1836_v44, %v1835_v9  ;;  %v4061_v23 = vunpack.i.h.bf16 %v8853_v60  ;;  %v4060_v10 = vunpack.i.l.bf16 %v8853_v60 }
 0x24f   : > { %v4026_v45 = vunpack.i.h.bf16 %v8854_v57  ;;  %v4025_v34 = vunpack.i.l.bf16 %v8854_v57  ;;  %v3870_v53 = vunpack.i.l.bf16 %v8849_v14  ;;  %v4106_v63 = vunpack.i.h.bf16 %v8855_v1 }
 0x250   : > { %v4105_v56 = vunpack.i.l.bf16 %v8855_v1  ;;  %v1870_v55 = vpack.c.bf16 %v1850_v3, %v1849_v20  ;;  %v1621_v7 = vsel %vm280_vm0, %v5141_v46, %v3901_v19  ;;  %v1620_v28 = vsel %vm280_vm0, %v5142_v29, %v3900_v43  ;;  %v8862_v19 = vld [vmem:[#allocation57_spill] sm:$0xff]  ;;  %v5143_v46 = vld [vmem:[#allocation2 + $0x98] sm:$0xff]  ;;  %v8865_v29 = vld [vmem:[#allocation14_spill] sm:$0xff] }
 0x251   : > { %v4141_v11 = vunpack.i.h.bf16 %v8856_v40  ;;  %v4140_v41 = vunpack.i.l.bf16 %v8856_v40  ;;  %v1640_v47 = vsel %vm1628_vm7, %v8857_v61, %v3946_v48  ;;  %v1639_v13 = vsel %vm1628_vm7, %v6859_v42, %v3945_v37  ;;  %v8863_v43 = vld [vmem:[#allocation17_spill] sm:$0xff]  ;;  %v8864_v37 = vld [vmem:[#allocation66_spill] sm:$0xff]  ;;  %v8866_v61 = vld [vmem:[#allocation15_spill] sm:$0xff] }
 0x252   : > { %3770 = vmatmul.msk.bf16.gmra.mxu0 %vm1895_vm13, %v1863_v16  ;;  %v1653_v35 = vsel %vm1628_vm7, %v1620_v28, %v3980_v22  ;;  %v1654_v25 = vsel %vm1628_vm7, %v1621_v7, %v3981_v2  ;;  %v1672_v54 = vsel %vm1661_vm6, %v1639_v13, %v4025_v34  ;;  %v1673_v4 = vsel %vm1661_vm6, %v1640_v47, %v4026_v45 }
 0x253   : > { %v1686_v8 = vsel %vm1661_vm6, %v1653_v35, %v4060_v10  ;;  %v1687_v24 = vsel %vm1661_vm6, %v1654_v25, %v4061_v23  ;;  %v1705_v12 = vsel %vm1694_vm8, %v1672_v54, %v4105_v56  ;;  %v1706_v36 = vsel %vm1694_vm8, %v1673_v4, %v4106_v63  ;;  %v8868_v4 = vld [vmem:[#allocation26_spill] sm:$0xff] }
 0x254   : > { %3777 = vmatmul.msk.bf16.gmra.mxu2 %vm1895_vm13, %v1870_v55  ;;  %v4186_v42 = vunpack.i.h.bf16 %v8858_v15  ;;  %v4185_v51 = vunpack.i.l.bf16 %v8858_v15  ;;  %v1719_v58 = vsel %vm1694_vm8, %v1686_v8, %v4140_v41  ;;  %v1720_v33 = vsel %vm1694_vm8, %v1687_v24, %v4141_v11  ;;  %v8867_v8 = vld [vmem:[#allocation21_spill] sm:$0xff] }
 0x255   : > { %v4266_v31 = vunpack.i.h.bf16 %v8859_v17  ;;  %v4265_v49 = vunpack.i.l.bf16 %v8859_v17  ;;  %v4221_v32 = vunpack.i.h.bf16 %v8860_v21  ;;  %v4220_v52 = vunpack.i.l.bf16 %v8860_v21  ;;  %v8869_v15 = vld [vmem:[#allocation37_spill] sm:$0xff]  ;;  %v8870_v17 = vld [vmem:[#allocation40_spill] sm:$0xff] }
 0x256   : > { %v4346_v9 = vunpack.i.h.bf16 %v8861_v18  ;;  %v4345_v44 = vunpack.i.l.bf16 %v8861_v18  ;;  %v4301_v50 = vunpack.i.h.bf16 %v8862_v19  ;;  %v4300_v59 = vunpack.i.l.bf16 %v8862_v19  ;;  %v5146_v18 = vld [vmem:[#allocation2 + $0x138] sm:$0xff] }
 0x257   : > { %v4426_v30 = vunpack.i.h.bf16 %v8863_v43  ;;  %v4425_v48 = vunpack.i.l.bf16 %v8863_v43  ;;  %v1738_v20 = vsel %vm1727_vm10, %v1705_v12, %v4185_v51  ;;  %v1739_v3 = vsel %vm1727_vm10, %v1706_v36, %v4186_v42 }
 0x258   : > { %v4381_v27 = vunpack.i.h.bf16 %v8864_v37  ;;  %v4380_v2 = vunpack.i.l.bf16 %v8864_v37  ;;  %v1771_v22 = vsel %vm1760_vm9, %v1738_v20, %v4265_v49  ;;  %v1772_v16 = vsel %vm1760_vm9, %v1739_v3, %v4266_v31 }
 0x259   : > { %v4461_v60 = vunpack.i.h.bf16 %v4459_v38  ;;  %v4460_v23 = vunpack.i.l.bf16 %v4459_v38  ;;  %v1752_v10 = vsel %vm1727_vm10, %v1719_v58, %v4220_v52  ;;  %v1753_v57 = vsel %vm1727_vm10, %v1720_v33, %v4221_v32  ;;  %v5144_v58 = vld [vmem:[#allocation2 + $0x90] sm:$0xff]  ;;  %v5145_v32 = vld [vmem:[#allocation2 + $0x140] sm:$0xff] }
 0x25a   : > { %v1804_v45 = vsel %vm1793_vm11, %v1771_v22, %v4345_v44  ;;  %v1805_v34 = vsel %vm1793_vm11, %v1772_v16, %v4346_v9  ;;  %v1785_v1 = vsel %vm1760_vm9, %v1752_v10, %v4300_v59  ;;  %v1786_v63 = vsel %vm1760_vm9, %v1753_v57, %v4301_v50  ;;  %v8871_v44 = vld [vmem:[#allocation43_spill] sm:$0xff] }
 0x25b   : > { %v1837_v56 = vsel %vm1826_vm12, %v1804_v45, %v4425_v48  ;;  %v1838_v55 = vsel %vm1826_vm12, %v1805_v34, %v4426_v30  ;;  %v1609_v7 = vsel %vm280_vm0, %v5143_v46, %v3871_v5  ;;  %v3906_v28 = vunpack.i.h.bf16 %v8865_v29  ;;  %v8874_v45 = vld [vmem:[#allocation48_spill] sm:$0xff]  ;;  %v4464_v46 = vpop.permute.xlu2 %4463 }
 0x25c   : > { %v1818_v40 = vsel %vm1793_vm11, %v1785_v1, %v4380_v2  ;;  %v1819_v11 = vsel %vm1793_vm11, %v1786_v63, %v4381_v27  ;;  %v3905_v41 = vunpack.i.l.bf16 %v8865_v29  ;;  %v3986_v47 = vunpack.i.h.bf16 %v8866_v61  ;;  %v8872_v27 = vld [vmem:[#allocation47_spill] sm:$0xff]  ;;  %v8875_v63 = vld [vmem:[#allocation64_spill] sm:$0xff] }
 0x25d   : > { %v1851_v13 = vsel %vm1826_vm12, %v1818_v40, %v4460_v23  ;;  %v1852_v35 = vsel %vm1826_vm12, %v1819_v11, %v4461_v60  ;;  %v3985_v25 = vunpack.i.l.bf16 %v8866_v61  ;;  %v3951_v24 = vunpack.i.h.bf16 %v8867_v8  ;;  %v8873_v23 = vld [vmem:[#allocation53_spill] sm:$0xff] }
 0x25e   : > { %v3950_v5 = vunpack.i.l.bf16 %v8867_v8  ;;  %v1864_v54 = vpack.c.bf16 %v1838_v55, %v1837_v56  ;;  %v4031_v12 = vunpack.i.h.bf16 %v8868_v4  ;;  %v4030_v36 = vunpack.i.l.bf16 %v8868_v4 }
 0x25f   : > { %v4066_v42 = vunpack.i.h.bf16 %v8869_v15  ;;  %v4065_v51 = vunpack.i.l.bf16 %v8869_v15  ;;  %v1608_v33 = vsel %vm280_vm0, %v5144_v58, %v3870_v53  ;;  %v4111_v31 = vunpack.i.h.bf16 %v8870_v17  ;;  %v5147_v58 = vld [vmem:[#allocation2 + $0x158] sm:$0xff] }
 0x260   : > { %v4110_v49 = vunpack.i.l.bf16 %v8870_v17  ;;  %v1871_v21 = vpack.c.bf16 %v1852_v35, %v1851_v13  ;;  %v1623_v52 = vsel %vm280_vm0, %v5145_v32, %v3906_v28  ;;  %v1622_v9 = vsel %vm280_vm0, %v5146_v18, %v3905_v41  ;;  %v8878_v17 = vld [vmem:[#allocation10_spill] sm:$0xff] }
 0x261   : > { %v4146_v38 = vunpack.i.h.bf16 %v8871_v44  ;;  %v4145_v19 = vunpack.i.l.bf16 %v8871_v44  ;;  %v1656_v14 = vsel %vm1628_vm7, %v1623_v52, %v3986_v47  ;;  %v1655_v53 = vsel %vm1628_vm7, %v1622_v9, %v3985_v25  ;;  %v8877_v47 = vld [vmem:[#allocation68_spill] sm:$0xff]  ;;  %v8879_v52 = vld [vmem:[#allocation13_spill] sm:$0xff] }
 0x262   : > { %3771 = vmatmul.msk.bf16.gmra.mxu0 %vm1895_vm13, %v1864_v54  ;;  %v1641_v50 = vsel %vm1628_vm7, %v1608_v33, %v3950_v5  ;;  %v1642_v59 = vsel %vm1628_vm7, %v1609_v7, %v3951_v24  ;;  %v1689_v48 = vsel %vm1661_vm6, %v1656_v14, %v4066_v42  ;;  %v1688_v20 = vsel %vm1661_vm6, %v1655_v53, %v4065_v51  ;;  %v8876_v7 = vld [vmem:[#allocation59_spill] sm:$0xff] }
 0x263   : > { %v1674_v43 = vsel %vm1661_vm6, %v1641_v50, %v4030_v36  ;;  %v1675_v30 = vsel %vm1661_vm6, %v1642_v59, %v4031_v12  ;;  %v4191_v2 = vunpack.i.h.bf16 %v8872_v27  ;;  %v4190_v22 = vunpack.i.l.bf16 %v8872_v27  ;;  %v8881_v50 = vld [vmem:[#allocation35_spill] sm:$0xff] }
 0x264   : > { %3778 = vmatmul.msk.bf16.gmra.mxu2 %vm1895_vm13, %v1871_v21  ;;  %v1707_v3 = vsel %vm1694_vm8, %v1674_v43, %v4110_v49  ;;  %v1708_v37 = vsel %vm1694_vm8, %v1675_v30, %v4111_v31  ;;  %v1721_v16 = vsel %vm1694_vm8, %v1688_v20, %v4145_v19  ;;  %v1722_v60 = vsel %vm1694_vm8, %v1689_v48, %v4146_v38  ;;  %v8880_v19 = vld [vmem:[#allocation28_spill] sm:$0xff]  ;;  %v8882_v30 = vld [vmem:[#allocation38_spill] sm:$0xff]  ;;  %v8883_v27 = vld [vmem:[#allocation39_spill] sm:$0xff] }
 0x265   : > { %v4271_v10 = vunpack.i.h.bf16 %v8873_v23  ;;  %v4270_v57 = vunpack.i.l.bf16 %v8873_v23  ;;  %v4226_v34 = vunpack.i.h.bf16 %v8874_v45  ;;  %v4225_v1 = vunpack.i.l.bf16 %v8874_v45  ;;  %v8884_v45 = vld [vmem:[#allocation41_spill] sm:$0xff] }
 0x266   : > { %v4351_v56 = vunpack.i.h.bf16 %v8875_v63  ;;  %v4350_v55 = vunpack.i.l.bf16 %v8875_v63  ;;  %v4306_v29 = vunpack.i.h.bf16 %v8876_v7  ;;  %v4305_v28 = vunpack.i.l.bf16 %v8876_v7 }
 0x267   : > { %v4431_v40 = vunpack.i.h.bf16 %v6716_v0  ;;  %v4430_v11 = vunpack.i.l.bf16 %v6716_v0  ;;  %v1740_v41 = vsel %vm1727_vm10, %v1707_v3, %v4190_v22  ;;  %v1741_v61 = vsel %vm1727_vm10, %v1708_v37, %v4191_v2  ;;  %v5148_v3 = vld [vmem:[#allocation2 + $0x150] sm:$0xff] }
 0x268   : > { %v4386_v13 = vunpack.i.h.bf16 %v8877_v47  ;;  %v4385_v35 = vunpack.i.l.bf16 %v8877_v47  ;;  %v1773_v25 = vsel %vm1760_vm9, %v1740_v41, %v4270_v57  ;;  %v1774_v8 = vsel %vm1760_vm9, %v1741_v61, %v4271_v10  ;;  %v5150_v10 = vld [vmem:[#allocation2 + $0xa8] sm:$0xff] }
 0x269   : > { %v4466_v24 = vunpack.i.h.bf16 %v4464_v46  ;;  %v4465_v5 = vunpack.i.l.bf16 %v4464_v46  ;;  %v1754_v54 = vsel %vm1727_vm10, %v1721_v16, %v4225_v1  ;;  %v1755_v4 = vsel %vm1727_vm10, %v1722_v60, %v4226_v34  ;;  %v5149_v60 = vld [vmem:[#allocation2 + $0xb0] sm:$0xff] }
 0x26a   : > { %v1806_v0 = vsel %vm1793_vm11, %v1773_v25, %v4350_v55  ;;  %v1807_v12 = vsel %vm1793_vm11, %v1774_v8, %v4351_v56  ;;  %v1787_v36 = vsel %vm1760_vm9, %v1754_v54, %v4305_v28  ;;  %v1788_v15 = vsel %vm1760_vm9, %v1755_v4, %v4306_v29  ;;  %v8888_v4 = vld [vmem:[#allocation65_spill] sm:$0xff] }
 0x26b   : > { %v1839_v42 = vsel %vm1826_vm12, %v1806_v0, %v4430_v11  ;;  %v1840_v51 = vsel %vm1826_vm12, %v1807_v12, %v4431_v40  ;;  %v1625_v33 = vsel %vm280_vm0, %v5147_v58, %v3911_v26  ;;  %v3876_v31 = vunpack.i.h.bf16 %v8878_v17  ;;  %v8885_v11 = vld [vmem:[#allocation45_spill] sm:$0xff] }
 0x26c   : > { %v1820_v49 = vsel %vm1793_vm11, %v1787_v36, %v4385_v35  ;;  %v1821_v21 = vsel %vm1793_vm11, %v1788_v15, %v4386_v13  ;;  %v3875_v32 = vunpack.i.l.bf16 %v8878_v17  ;;  %v3956_v18 = vunpack.i.h.bf16 %v8879_v52  ;;  %v8886_v35 = vld [vmem:[#allocation56_spill] sm:$0xff]  ;;  %v4469_v36 = vpop.permute.xlu0 %4468  ;;  %v8889_v15 = vld [vmem:[#allocation61_spill] sm:$0xff] }
 0x26d   : > { %v1853_v9 = vsel %vm1826_vm12, %v1820_v49, %v4465_v5  ;;  %v1854_v44 = vsel %vm1826_vm12, %v1821_v21, %v4466_v24  ;;  %v3955_v38 = vunpack.i.l.bf16 %v8879_v52  ;;  %v3991_v14 = vunpack.i.h.bf16 %v8880_v19  ;;  %v8887_v24 = vld [vmem:[#allocation51_spill] sm:$0xff] }
 0x26e   : > { %v3990_v26 = vunpack.i.l.bf16 %v8880_v19  ;;  %v1865_v53 = vpack.c.bf16 %v1840_v51, %v1839_v42  ;;  %v4036_v59 = vunpack.i.h.bf16 %v8881_v50  ;;  %v4035_v43 = vunpack.i.l.bf16 %v8881_v50  ;;  %v8890_v49 = vld [vmem:[#allocation71_spill] sm:$0xff] }
 0x26f   : > { %v4071_v48 = vunpack.i.h.bf16 %v8882_v30  ;;  %v4070_v20 = vunpack.i.l.bf16 %v8882_v30  ;;  %v1624_v37 = vsel %vm280_vm0, %v5148_v3, %v3910_v39  ;;  %v4151_v2 = vunpack.i.h.bf16 %v8883_v27 }
 0x270   : > { %v4150_v22 = vunpack.i.l.bf16 %v8883_v27  ;;  %v1872_v16 = vpack.c.bf16 %v1854_v44, %v1853_v9  ;;  %v1611_v23 = vsel %vm280_vm0, %v5149_v60, %v3876_v31  ;;  %v1610_v57 = vsel %vm280_vm0, %v5150_v10, %v3875_v32  ;;  %v8891_v27 = vld [vmem:[#allocation12_spill] sm:$0xff]  ;;  %v8893_v10 = vld [vmem:[#allocation33_spill] sm:$0xff] }
 0x271   : > { %v4116_v34 = vunpack.i.h.bf16 %v8884_v45  ;;  %v4115_v1 = vunpack.i.l.bf16 %v8884_v45  ;;  %v1644_v6 = vsel %vm1628_vm7, %v1611_v23, %v3956_v18  ;;  %v1643_v39 = vsel %vm1628_vm7, %v1610_v57, %v3955_v38 }
 0x272   : > { %3772 = vmatmul.msk.bf16.gmra.mxu0 %vm1895_vm13, %v1865_v53  ;;  %v1658_v63 = vsel %vm1628_vm7, %v1625_v33, %v3991_v14  ;;  %v1657_v56 = vsel %vm1628_vm7, %v1624_v37, %v3990_v26  ;;  %v1677_v55 = vsel %vm1661_vm6, %v1644_v6, %v4036_v59  ;;  %v1676_v46 = vsel %vm1661_vm6, %v1643_v39, %v4035_v43  ;;  %v5151_v39 = vld [vmem:[#allocation2 + $0x170] sm:$0xff] }
 0x273   : > { %v1690_v7 = vsel %vm1661_vm6, %v1657_v56, %v4070_v20  ;;  %v1691_v29 = vsel %vm1661_vm6, %v1658_v63, %v4071_v48  ;;  %v4196_v41 = vunpack.i.h.bf16 %v8885_v11  ;;  %v4195_v61 = vunpack.i.l.bf16 %v8885_v11  ;;  %v5152_v56 = vld [vmem:[#allocation2 + $0x168] sm:$0xff] }
 0x274   : > { %3779 = vmatmul.msk.bf16.gmra.mxu2 %vm1895_vm13, %v1872_v16  ;;  %v1723_v28 = vsel %vm1694_vm8, %v1690_v7, %v4150_v22  ;;  %v1724_v40 = vsel %vm1694_vm8, %v1691_v29, %v4151_v2  ;;  %v1709_v47 = vsel %vm1694_vm8, %v1676_v46, %v4115_v1  ;;  %v1710_v13 = vsel %vm1694_vm8, %v1677_v55, %v4116_v34  ;;  %v8892_v16 = vld [vmem:[#allocation30_spill] sm:$0xff]  ;;  %v8894_v34 = vld [vmem:[#allocation44_spill] sm:$0xff] }
 0x275   : > { %v4276_v25 = vunpack.i.h.bf16 %v8886_v35  ;;  %v4275_v8 = vunpack.i.l.bf16 %v8886_v35  ;;  %v4231_v5 = vunpack.i.h.bf16 %v8887_v24  ;;  %v4230_v54 = vunpack.i.l.bf16 %v8887_v24  ;;  %v8895_v46 = vld [vmem:[#allocation52_spill] sm:$0xff] }
 0x276   : > { %v4356_v0 = vunpack.i.h.bf16 %v8888_v4  ;;  %v4355_v12 = vunpack.i.l.bf16 %v8888_v4  ;;  %v4311_v42 = vunpack.i.h.bf16 %v8889_v15  ;;  %v4310_v51 = vunpack.i.l.bf16 %v8889_v15  ;;  %v7155_v15 = vld [vmem:[%s8587_s5] ss:$0 sm:$0xff] }
 0x277   : > { %v4436_v58 = vunpack.i.h.bf16 %v6792_v62  ;;  %v4435_v33 = vunpack.i.l.bf16 %v6792_v62  ;;  %v1742_v17 = vsel %vm1727_vm10, %v1709_v47, %v4195_v61  ;;  %v1743_v31 = vsel %vm1727_vm10, %v1710_v13, %v4196_v41  ;;  %v8896_v41 = vld [vmem:[#allocation60_spill] sm:$0xff] }
 0x278   : > { %v4391_v21 = vunpack.i.h.bf16 %v8890_v49  ;;  %v4390_v32 = vunpack.i.l.bf16 %v8890_v49  ;;  %v1775_v52 = vsel %vm1760_vm9, %v1742_v17, %v4275_v8  ;;  %v1776_v18 = vsel %vm1760_vm9, %v1743_v31, %v4276_v25  ;;  %v8897_v25 = vld [vmem:[#allocation70_spill] sm:$0xff]  ;;  %v7164_v17 = vld [vmem:[%s8588_s6] ss:$0 sm:$0xff] }
 0x279   : > { %v4471_v9 = vunpack.i.h.bf16 %v4469_v36  ;;  %v4470_v44 = vunpack.i.l.bf16 %v4469_v36  ;;  %v1756_v38 = vsel %vm1727_vm10, %v1723_v28, %v4230_v54  ;;  %v1757_v19 = vsel %vm1727_vm10, %v1724_v40, %v4231_v5  ;;  %v4474_v28 = vpop.permute.xlu1 %4473 }
 0x27a   : > { %v1808_v62 = vsel %vm1793_vm11, %v1775_v52, %v4355_v12  ;;  %v1809_v14 = vsel %vm1793_vm11, %v1776_v18, %v4356_v0  ;;  %v1789_v26 = vsel %vm1760_vm9, %v1756_v38, %v4310_v51  ;;  %v1790_v53 = vsel %vm1760_vm9, %v1757_v19, %v4311_v42 }
 0x27b   : > { %v1841_v50 = vsel %vm1826_vm12, %v1808_v62, %v4435_v33  ;;  %v1842_v59 = vsel %vm1826_vm12, %v1809_v14, %v4436_v58  ;;  %v1822_v43 = vsel %vm1793_vm11, %v1789_v26, %v4390_v32  ;;  %v1823_v30 = vsel %vm1793_vm11, %v1790_v53, %v4391_v21  ;;  %v7175_v26 = vld [vmem:[#allocation3] sm:$0xff]  ;;  %v7177_v53 = vld [vmem:[#allocation3 + $0x8] sm:$0xff] }
 0x27c   : > { %v1855_v48 = vsel %vm1826_vm12, %v1822_v43, %v4470_v44  ;;  %v1856_v20 = vsel %vm1826_vm12, %v1823_v30, %v4471_v9  ;;  %v1866_v3 = vpack.c.bf16 %v1842_v59, %v1841_v50  ;;  %v3916_v2 = vunpack.i.h.bf16 %v8891_v27  ;;  %v7179_v50 = vld [vmem:[#allocation3 + $0x10] sm:$0x3] }
 0x27d   : > { %v1873_v37 = vpack.c.bf16 %v1856_v20, %v1855_v48  ;;  %v3915_v22 = vunpack.i.l.bf16 %v8891_v27  ;;  %v3996_v60 = vunpack.i.h.bf16 %v8892_v16  ;;  %v3995_v23 = vunpack.i.l.bf16 %v8892_v16 }
 0x27e   : > { %v4076_v57 = vunpack.i.h.bf16 %v8893_v10  ;;  %v4075_v45 = vunpack.i.l.bf16 %v8893_v10  ;;  %v4156_v1 = vunpack.i.h.bf16 %v8894_v34  ;;  %v4155_v6 = vunpack.i.l.bf16 %v8894_v34 }
 0x27f   : > { %v1627_v63 = vsel %vm280_vm0, %v5151_v39, %v3916_v2  ;;  %v1626_v55 = vsel %vm280_vm0, %v5152_v56, %v3915_v22  ;;  %v4236_v7 = vunpack.i.h.bf16 %v8895_v46  ;;  %v4235_v29 = vunpack.i.l.bf16 %v8895_v46 }
 0x280   : > { %v1659_v40 = vsel %vm1628_vm7, %v1626_v55, %v3995_v23  ;;  %v1660_v11 = vsel %vm1628_vm7, %v1627_v63, %v3996_v60  ;;  %v4316_v61 = vunpack.i.h.bf16 %v8896_v41  ;;  %v4315_v47 = vunpack.i.l.bf16 %v8896_v41 }
 0x281   : > { %v1692_v13 = vsel %vm1661_vm6, %v1659_v40, %v4075_v45  ;;  %v1693_v35 = vsel %vm1661_vm6, %v1660_v11, %v4076_v57  ;;  %v4396_v8 = vunpack.i.h.bf16 %v8897_v25  ;;  %v4395_v24 = vunpack.i.l.bf16 %v8897_v25 }
 0x282   : > { %3773 = vmatmul.msk.bf16.gmra.mxu0 %vm1895_vm13, %v1866_v3  ;;  %v1725_v5 = vsel %vm1694_vm8, %v1692_v13, %v4155_v6  ;;  %v1726_v54 = vsel %vm1694_vm8, %v1693_v35, %v4156_v1  ;;  %v4476_v4 = vunpack.i.h.bf16 %v4474_v28  ;;  %v4475_v0 = vunpack.i.l.bf16 %v4474_v28 }
 0x283   : > { %v1758_v12 = vsel %vm1727_vm10, %v1725_v5, %v4235_v29  ;;  %v1759_v36 = vsel %vm1727_vm10, %v1726_v54, %v4236_v7  ;;  %v2276_v43 = vrot.slane %v7175_v26, 1  ;;  %v2277_v30 = vrot.slane %v7177_v53, 1 }
 0x284   : > { %3780 = vmatmul.msk.bf16.gmra.mxu2 %vm1895_vm13, %v1873_v37  ;;  %v1791_v42 = vsel %vm1760_vm9, %v1758_v12, %v4315_v47  ;;  %v1792_v51 = vsel %vm1760_vm9, %v1759_v36, %v4316_v61  ;;  %v2279_v48 = vrot.slane %v7179_v50, 1 }
 0x285   : > { %v1824_v58 = vsel %vm1793_vm11, %v1791_v42, %v4395_v24  ;;  %v1825_v33 = vsel %vm1793_vm11, %v1792_v51, %v4396_v8  ;;  %v2278_v37 = vsel %vm640_vm3, %v2276_v43, %v2277_v30 }
 0x286   : > { %v1857_v49 = vsel %vm1826_vm12, %v1824_v58, %v4475_v0  ;;  %v1858_v21 = vsel %vm1826_vm12, %v1825_v33, %v4476_v4  ;;  %v2280_v27 = vsel %vm640_vm3, %v2277_v30, %v2279_v48 }
 0x287   : > { %v1874_v18 = vpack.c.bf16 %v1858_v21, %v1857_v49  ;;  %v4477_v2 = vpack.i.bf16 %v2280_v27, %v2278_v37 }
 0x289   : > { %4478 = vrot.lane.b32.xlu2 %v4477_v2, %s5224_s26 }
 0x28f   : > { %v1957_v31 = vpop.f32.mrf.mxu0 }
 0x290   : > { %v2041_v32 = vmul.f32 %v7155_v15, %v1957_v31 }
 0x292   : > { %v2077_v52 = vadd.f32 %v7164_v17, %v2041_v32 }
 0x294   : > { %v2109_v9 = vmax.f32 %v2077_v52, 0.0  ;;  %3781 = vmatmul.msk.bf16.gmra.mxu2 %vm1895_vm13, %v1874_v18 }
 0x296   : > { %2142 = vst.msk [vmem:[#allocation3 + $0x19] sm:$0xff] %vm280_vm0, %v2109_v9 }
 0x297   : > { %v1959_v44 = vpop.f32.mrf.mxu0 }
 0x298   : > { %v2042_v38 = vmul.f32 %v7155_v15, %v1959_v44 }
 0x29a   : > { %v2078_v19 = vadd.f32 %v7164_v17, %v2042_v38 }
 0x29c   : > { %v2110_v62 = vmax.f32 %v2078_v19, 0.0 }
 0x29d   : > { %v7186_v3 = vld [vmem:[#allocation3 + $0x18] sm:$0xff] }
 0x29e   : > { %2143 = vst.msk [vmem:[#allocation3 + $0x21] sm:$0xff] %vm280_vm0, %v2110_v62  ;;  %v2281_v23 = vrot.slane %v7186_v3, 1  ;;  %v2457_v39 = vrot.slane %v7186_v3, 2 }
 0x29f   : > { %v1962_v14 = vpop.f32.mrf.mxu0 }
 0x2a0   : > { %v2043_v59 = vmul.f32 %v7155_v15, %v1962_v14 }
 0x2a2   : > { %v2079_v20 = vadd.f32 %v7164_v17, %v2043_v59 }
 0x2a4   : > { %v2111_v22 = vmax.f32 %v2079_v20, 0.0 }
 0x2a5   : > { %v7190_v16 = vld [vmem:[#allocation3 + $0x20] sm:$0xff]  ;;  %v2179_v60 = vld [vmem:[#allocation3 + $0x28] sm:$0x3] }
 0x2a6   : > { %2144 = vst.msk [vmem:[#allocation3 + $0x31] sm:$0xff] %vm280_vm0, %v2111_v22  ;;  %v2282_v10 = vrot.slane %v7190_v16, 1  ;;  %v2284_v57 = vrot.slane %v2179_v60, 1  ;;  %v2458_v45 = vrot.slane %v7190_v16, 2  ;;  %v2460_v34 = vrot.slane %v2179_v60, 2 }
 0x2a7   : > { %v1997_v1 = vpop.f32.mrf.mxu2  ;;  %v1964_v6 = vpop.f32.mrf.mxu0 }
 0x2a8   : > { %v2057_v63 = vmul.f32 %v7155_v15, %v1997_v1  ;;  %v2044_v56 = vmul.f32 %v7155_v15, %v1964_v6  ;;  %v2283_v55 = vsel %vm640_vm3, %v2281_v23, %v2282_v10  ;;  %v2285_v46 = vsel %vm640_vm3, %v2282_v10, %v2284_v57 }
 0x2a9   : > { %v7202_v7 = vpack.i.bf16 %v2285_v46, %v2283_v55  ;;  %v2459_v29 = vsel %vm817_vm4, %v2457_v39, %v2458_v45  ;;  %v2461_v28 = vsel %vm817_vm4, %v2458_v45, %v2460_v34 }
 0x2aa   : > { %v2093_v40 = vadd.f32 %v7164_v17, %v2057_v63  ;;  %v2080_v11 = vadd.f32 %v7164_v17, %v2044_v56  ;;  %v7208_v41 = vpack.i.bf16 %v2461_v28, %v2459_v29 }
 0x2ab   : > { %4483 = vrot.lane.b32.xlu0 %v7202_v7, %s5224_s26 }
 0x2ac   : > { %8898 = vst [vmem:[#allocation22_spill] sm:$0xff] %v7208_v41  ;;  %v2125_v61 = vmax.f32 %v2093_v40, 0.0  ;;  %v2112_v47 = vmax.f32 %v2080_v11, 0.0 }
 0x2ad   : > { %v7218_v54 = vld [vmem:[#allocation3 + $0x30] sm:$0xff] }
 0x2ae   : > { %2158 = vst.msk [vmem:[#allocation3 + $0xd9] sm:$0xff] %vm280_vm0, %v2125_v61  ;;  %v2286_v42 = vrot.slane %v7218_v54, 1  ;;  %v2462_v51 = vrot.slane %v7218_v54, 2 }
 0x2af   : > { %2145 = vst.msk [vmem:[#allocation3 + $0x39] sm:$0xff] %vm280_vm0, %v2112_v47  ;;  %v1999_v13 = vpop.f32.mrf.mxu2  ;;  %v1967_v35 = vpop.f32.mrf.mxu0 }
 0x2b0   : > { %v2058_v25 = vmul.f32 %v7155_v15, %v1999_v13  ;;  %v2045_v8 = vmul.f32 %v7155_v15, %v1967_v35 }
 0x2b2   : > { %v2094_v24 = vadd.f32 %v7164_v17, %v2058_v25  ;;  %v2081_v5 = vadd.f32 %v7164_v17, %v2045_v8 }
 0x2b4   : > { %v2126_v4 = vmax.f32 %v2094_v24, 0.0  ;;  %v2113_v0 = vmax.f32 %v2081_v5, 0.0 }
 0x2b5   : > { %v7238_v43 = vld [vmem:[#allocation3 + $0xd8] sm:$0xff] }
 0x2b6   : > { %2159 = vst.msk [vmem:[#allocation3 + $0xe1] sm:$0xff] %vm280_vm0, %v2126_v4  ;;  %v7221_v12 = vld [vmem:[#allocation3 + $0x38] sm:$0xff]  ;;  %v2182_v36 = vld [vmem:[#allocation3 + $0x40] sm:$0x3]  ;;  %v2321_v2 = vrot.slane %v7238_v43, 1  ;;  %v2497_v34 = vrot.slane %v7238_v43, 2 }
 0x2b7   : > { %2146 = vst.msk [vmem:[#allocation3 + $0x49] sm:$0xff] %vm280_vm0, %v2113_v0  ;;  %v2002_v58 = vpop.f32.mrf.mxu2  ;;  %v1969_v33 = vpop.f32.mrf.mxu0  ;;  %v2287_v31 = vrot.slane %v7221_v12, 1  ;;  %v2289_v49 = vrot.slane %v2182_v36, 1  ;;  %v2463_v21 = vrot.slane %v7221_v12, 2  ;;  %v2465_v32 = vrot.slane %v2182_v36, 2 }
 0x2b8   : > { %v2059_v52 = vmul.f32 %v7155_v15, %v2002_v58  ;;  %v2046_v18 = vmul.f32 %v7155_v15, %v1969_v33 }
 0x2b9   : > { %v2288_v9 = vsel %vm640_vm3, %v2286_v42, %v2287_v31  ;;  %v2290_v44 = vsel %vm640_vm3, %v2287_v31, %v2289_v49  ;;  %v2464_v38 = vsel %vm817_vm4, %v2462_v51, %v2463_v21  ;;  %v2466_v19 = vsel %vm817_vm4, %v2463_v21, %v2465_v32 }
 0x2ba   : > { %v2095_v62 = vadd.f32 %v7164_v17, %v2059_v52  ;;  %v2082_v14 = vadd.f32 %v7164_v17, %v2046_v18  ;;  %v7236_v59 = vpack.i.bf16 %v2290_v44, %v2288_v9  ;;  %v7240_v30 = vpack.i.bf16 %v2466_v19, %v2464_v38 }
 0x2bc   : > { %8899 = vst [vmem:[#allocation5_spill] sm:$0xff] %v7240_v30  ;;  %v2127_v48 = vmax.f32 %v2095_v62, 0.0  ;;  %v2114_v20 = vmax.f32 %v2082_v14, 0.0  ;;  %4488 = vrot.lane.b32.xlu1 %v7236_v59, %s5224_s26 }
 0x2bd   : > { %v7244_v37 = vld [vmem:[#allocation3 + $0xe0] sm:$0xff]  ;;  %v2203_v27 = vld [vmem:[#allocation3 + $0xe8] sm:$0x3] }
 0x2be   : > { %2160 = vst.msk [vmem:[#allocation3 + $0xf1] sm:$0xff] %vm280_vm0, %v2127_v48  ;;  %v2322_v22 = vrot.slane %v7244_v37, 1  ;;  %v2324_v60 = vrot.slane %v2203_v27, 1  ;;  %v2500_v23 = vrot.slane %v2203_v27, 2  ;;  %v2498_v10 = vrot.slane %v7244_v37, 2  ;;  %v7264_v11 = vld [vmem:[#allocation3 + $0x48] sm:$0xff] }
 0x2bf   : > { %2147 = vst.msk [vmem:[#allocation3 + $0x51] sm:$0xff] %vm280_vm0, %v2114_v20  ;;  %v2004_v57 = vpop.f32.mrf.mxu2  ;;  %v1972_v45 = vpop.f32.mrf.mxu0  ;;  %v2291_v25 = vrot.slane %v7264_v11, 1  ;;  %v2467_v8 = vrot.slane %v7264_v11, 2 }
 0x2c0   : > { %v2060_v1 = vmul.f32 %v7155_v15, %v2004_v57  ;;  %v2047_v6 = vmul.f32 %v7155_v15, %v1972_v45  ;;  %v2323_v39 = vsel %vm640_vm3, %v2321_v2, %v2322_v22  ;;  %v2325_v63 = vsel %vm640_vm3, %v2322_v22, %v2324_v60 }
 0x2c1   : > { %v2499_v56 = vsel %vm817_vm4, %v2497_v34, %v2498_v10  ;;  %v2501_v55 = vsel %vm817_vm4, %v2498_v10, %v2500_v23  ;;  %v7258_v46 = vpack.i.bf16 %v2325_v63, %v2323_v39 }
 0x2c2   : > { %v2096_v29 = vadd.f32 %v7164_v17, %v2060_v1  ;;  %v2083_v28 = vadd.f32 %v7164_v17, %v2047_v6  ;;  %v7262_v40 = vpack.i.bf16 %v2501_v55, %v2499_v56 }
 0x2c3   : > { %8900 = vst [vmem:[#allocation31_spill] sm:$0xff] %v7258_v46 }
 0x2c4   : > { %v2128_v61 = vmax.f32 %v2096_v29, 0.0  ;;  %v2115_v47 = vmax.f32 %v2083_v28, 0.0 }
 0x2c5   : > { %v7284_v9 = vld [vmem:[#allocation3 + $0xf0] sm:$0xff] }
 0x2c6   : > { %2161 = vst.msk [vmem:[#allocation3 + $0xf9] sm:$0xff] %vm280_vm0, %v2128_v61  ;;  %v7267_v13 = vld [vmem:[#allocation3 + $0x50] sm:$0xff]  ;;  %v2185_v35 = vld [vmem:[#allocation3 + $0x58] sm:$0x3]  ;;  %v2326_v48 = vrot.slane %v7284_v9, 1  ;;  %v2502_v10 = vrot.slane %v7284_v9, 2 }
 0x2c7   : > { %2148 = vst.msk [vmem:[#allocation3 + $0x61] sm:$0xff] %vm280_vm0, %v2115_v47  ;;  %v2007_v24 = vpop.f32.mrf.mxu2  ;;  %v1974_v5 = vpop.f32.mrf.mxu0  ;;  %v2292_v4 = vrot.slane %v7267_v13, 1  ;;  %v2294_v0 = vrot.slane %v2185_v35, 1  ;;  %v2468_v36 = vrot.slane %v7267_v13, 2  ;;  %v2470_v42 = vrot.slane %v2185_v35, 2 }
 0x2c8   : > { %v2061_v51 = vmul.f32 %v7155_v15, %v2007_v24  ;;  %v2048_v58 = vmul.f32 %v7155_v15, %v1974_v5 }
 0x2c9   : > { %v2293_v33 = vsel %vm640_vm3, %v2291_v25, %v2292_v4  ;;  %v2295_v31 = vsel %vm640_vm3, %v2292_v4, %v2294_v0  ;;  %v2469_v49 = vsel %vm817_vm4, %v2467_v8, %v2468_v36  ;;  %v2471_v21 = vsel %vm817_vm4, %v2468_v36, %v2470_v42 }
 0x2ca   : > { %v2097_v32 = vadd.f32 %v7164_v17, %v2061_v51  ;;  %v2084_v52 = vadd.f32 %v7164_v17, %v2048_v58  ;;  %v7282_v18 = vpack.i.bf16 %v2295_v31, %v2293_v33  ;;  %v7286_v44 = vpack.i.bf16 %v2471_v21, %v2469_v49 }
 0x2cc   : > { %8901 = vst [vmem:[#allocation7_spill] sm:$0xff] %v7286_v44  ;;  %v2129_v38 = vmax.f32 %v2097_v32, 0.0  ;;  %v2116_v19 = vmax.f32 %v2084_v52, 0.0  ;;  %4493 = vrot.lane.b32.xlu2 %v7282_v18, %s5224_s26 }
 0x2cd   : > { %v7290_v62 = vld [vmem:[#allocation3 + $0xf8] sm:$0xff]  ;;  %v2206_v14 = vld [vmem:[#allocation3 + $0x100] sm:$0x3] }
 0x2ce   : > { %2162 = vst.msk [vmem:[#allocation3 + $0x109] sm:$0xff] %vm280_vm0, %v2129_v38  ;;  %v2327_v20 = vrot.slane %v7290_v62, 1  ;;  %v2329_v27 = vrot.slane %v2206_v14, 1  ;;  %v2505_v2 = vrot.slane %v2206_v14, 2  ;;  %v2503_v22 = vrot.slane %v7290_v62, 2  ;;  %v7310_v28 = vld [vmem:[#allocation3 + $0x60] sm:$0xff] }
 0x2cf   : > { %2149 = vst.msk [vmem:[#allocation3 + $0x69] sm:$0xff] %vm280_vm0, %v2116_v19  ;;  %v2009_v60 = vpop.f32.mrf.mxu2  ;;  %v1977_v23 = vpop.f32.mrf.mxu0  ;;  %v2296_v8 = vrot.slane %v7310_v28, 1  ;;  %v2472_v24 = vrot.slane %v7310_v28, 2 }
 0x2d0   : > { %v2062_v57 = vmul.f32 %v7155_v15, %v2009_v60  ;;  %v2049_v45 = vmul.f32 %v7155_v15, %v1977_v23  ;;  %v2328_v34 = vsel %vm640_vm3, %v2326_v48, %v2327_v20  ;;  %v2330_v1 = vsel %vm640_vm3, %v2327_v20, %v2329_v27 }
 0x2d1   : > { %v2504_v6 = vsel %vm817_vm4, %v2502_v10, %v2503_v22  ;;  %v2506_v39 = vsel %vm817_vm4, %v2503_v22, %v2505_v2  ;;  %v7304_v63 = vpack.i.bf16 %v2330_v1, %v2328_v34 }
 0x2d2   : > { %v2098_v56 = vadd.f32 %v7164_v17, %v2062_v57  ;;  %v2085_v55 = vadd.f32 %v7164_v17, %v2049_v45  ;;  %v7308_v29 = vpack.i.bf16 %v2506_v39, %v2504_v6 }
 0x2d4   : > { %8902 = vst [vmem:[#allocation18_spill] sm:$0xff] %v7308_v29  ;;  %v2130_v61 = vmax.f32 %v2098_v56, 0.0  ;;  %v2117_v47 = vmax.f32 %v2085_v55, 0.0  ;;  %4503 = vrot.lane.b32.xlu2 %v7258_v46, %s5224_s26 }
 0x2d5   : > { %v7332_v14 = vld [vmem:[#allocation3 + $0x108] sm:$0xff] }
 0x2d6   : > { %2163 = vst.msk [vmem:[#allocation3 + $0x111] sm:$0xff] %vm280_vm0, %v2130_v61  ;;  %v7315_v35 = vld [vmem:[#allocation3 + $0x68] sm:$0xff]  ;;  %v2188_v25 = vld [vmem:[#allocation3 + $0x70] sm:$0x3]  ;;  %v2331_v60 = vrot.slane %v7332_v14, 1  ;;  %v2507_v6 = vrot.slane %v7332_v14, 2 }
 0x2d7   : > { %2150 = vst.msk [vmem:[#allocation3 + $0x79] sm:$0xff] %vm280_vm0, %v2117_v47  ;;  %v2012_v5 = vpop.f32.mrf.mxu2  ;;  %v1979_v4 = vpop.f32.mrf.mxu0  ;;  %v2297_v0 = vrot.slane %v7315_v35, 1  ;;  %v2299_v36 = vrot.slane %v2188_v25, 1  ;;  %v2473_v42 = vrot.slane %v7315_v35, 2  ;;  %v2475_v51 = vrot.slane %v2188_v25, 2 }
 0x2d8   : > { %v2063_v58 = vmul.f32 %v7155_v15, %v2012_v5  ;;  %v2050_v33 = vmul.f32 %v7155_v15, %v1979_v4 }
 0x2d9   : > { %v2298_v31 = vsel %vm640_vm3, %v2296_v8, %v2297_v0  ;;  %v2300_v49 = vsel %vm640_vm3, %v2297_v0, %v2299_v36  ;;  %v2474_v21 = vsel %vm817_vm4, %v2472_v24, %v2473_v42  ;;  %v2476_v32 = vsel %vm817_vm4, %v2473_v42, %v2475_v51 }
 0x2da   : > { %v2099_v52 = vadd.f32 %v7164_v17, %v2063_v58  ;;  %v2086_v38 = vadd.f32 %v7164_v17, %v2050_v33  ;;  %v7330_v19 = vpack.i.bf16 %v2300_v49, %v2298_v31  ;;  %v7334_v48 = vpack.i.bf16 %v2476_v32, %v2474_v21 }
 0x2dc   : > { %8903 = vst [vmem:[#allocation24_spill] sm:$0xff] %v7330_v19  ;;  %v2131_v20 = vmax.f32 %v2099_v52, 0.0  ;;  %v2118_v27 = vmax.f32 %v2086_v38, 0.0  ;;  %4498 = vrot.lane.b32.xlu0 %v7330_v19, %s5224_s26 }
 0x2dd   : > { %8904 = vst [vmem:[#allocation29_spill] sm:$0xff] %v7334_v48  ;;  %v7338_v2 = vld [vmem:[#allocation3 + $0x110] sm:$0xff]  ;;  %v2209_v22 = vld [vmem:[#allocation3 + $0x118] sm:$0x3] }
 0x2de   : > { %2164 = vst.msk [vmem:[#allocation3 + $0x121] sm:$0xff] %vm280_vm0, %v2131_v20  ;;  %v2332_v23 = vrot.slane %v7338_v2, 1  ;;  %v2334_v10 = vrot.slane %v2209_v22, 1  ;;  %v2510_v57 = vrot.slane %v2209_v22, 2  ;;  %v2508_v45 = vrot.slane %v7338_v2, 2  ;;  %v7362_v42 = vld [vmem:[#allocation3 + $0x78] sm:$0xff] }
 0x2df   : > { %2151 = vst.msk [vmem:[#allocation3 + $0x81] sm:$0xff] %vm280_vm0, %v2118_v27  ;;  %v2014_v34 = vpop.f32.mrf.mxu2  ;;  %v1982_v1 = vpop.f32.mrf.mxu0  ;;  %v2301_v49 = vrot.slane %v7362_v42, 1 }
 0x2e0   : > { %v2064_v39 = vmul.f32 %v7155_v15, %v2014_v34  ;;  %v2051_v56 = vmul.f32 %v7155_v15, %v1982_v1  ;;  %v2333_v55 = vsel %vm640_vm3, %v2331_v60, %v2332_v23  ;;  %v2335_v61 = vsel %vm640_vm3, %v2332_v23, %v2334_v10 }
 0x2e1   : > { %v7350_v47 = vpack.i.bf16 %v2335_v61, %v2333_v55  ;;  %v2509_v25 = vsel %vm817_vm4, %v2507_v6, %v2508_v45  ;;  %v2511_v8 = vsel %vm817_vm4, %v2508_v45, %v2510_v57  ;;  %v2477_v23 = vrot.slane %v7362_v42, 2 }
 0x2e2   : > { %v2100_v24 = vadd.f32 %v7164_v17, %v2064_v39  ;;  %v2087_v5 = vadd.f32 %v7164_v17, %v2051_v56  ;;  %v7356_v4 = vpack.i.bf16 %v2511_v8, %v2509_v25 }
 0x2e3   : > { %8905 = vst [vmem:[#allocation11_spill] sm:$0xff] %v7350_v47  ;;  %4513 = vrot.lane.b32.xlu1 %v7350_v47, %s5224_s26 }
 0x2e4   : > { %8906 = vst [vmem:[#allocation16_spill] sm:$0xff] %v7356_v4  ;;  %v2132_v0 = vmax.f32 %v2100_v24, 0.0  ;;  %v2119_v36 = vmax.f32 %v2087_v5, 0.0  ;;  %4508 = vrot.lane.b32.xlu0 %v7304_v63, %s5224_s26 }
 0x2e5   : > { %v7380_v34 = vld [vmem:[#allocation3 + $0x120] sm:$0xff] }
 0x2e6   : > { %2165 = vst.msk [vmem:[#allocation3 + $0x129] sm:$0xff] %vm280_vm0, %v2132_v0  ;;  %v7365_v51 = vld [vmem:[#allocation3 + $0x80] sm:$0xff]  ;;  %v2191_v58 = vld [vmem:[#allocation3 + $0x88] sm:$0x3]  ;;  %v2336_v25 = vrot.slane %v7380_v34, 1 }
 0x2e7   : > { %2152 = vst.msk [vmem:[#allocation3 + $0x91] sm:$0xff] %vm280_vm0, %v2119_v36  ;;  %v2017_v33 = vpop.f32.mrf.mxu2  ;;  %v1984_v31 = vpop.f32.mrf.mxu0  ;;  %v2302_v21 = vrot.slane %v7365_v51, 1  ;;  %v2304_v32 = vrot.slane %v2191_v58, 1  ;;  %v2478_v20 = vrot.slane %v7365_v51, 2  ;;  %v2480_v27 = vrot.slane %v2191_v58, 2 }
 0x2e8   : > { %v2065_v52 = vmul.f32 %v7155_v15, %v2017_v33  ;;  %v2052_v38 = vmul.f32 %v7155_v15, %v1984_v31  ;;  %v2512_v31 = vrot.slane %v7380_v34, 2 }
 0x2e9   : > { %v2303_v22 = vsel %vm640_vm3, %v2301_v49, %v2302_v21  ;;  %v2305_v60 = vsel %vm640_vm3, %v2302_v21, %v2304_v32  ;;  %v2479_v1 = vsel %vm817_vm4, %v2477_v23, %v2478_v20  ;;  %v2481_v6 = vsel %vm817_vm4, %v2478_v20, %v2480_v27 }
 0x2ea   : > { %v2101_v10 = vadd.f32 %v7164_v17, %v2065_v52  ;;  %v2088_v57 = vadd.f32 %v7164_v17, %v2052_v38  ;;  %v7378_v45 = vpack.i.bf16 %v2305_v60, %v2303_v22  ;;  %v7389_v8 = vpack.i.bf16 %v2481_v6, %v2479_v1 }
 0x2ec   : > { %8907 = vst [vmem:[#allocation19_spill] sm:$0xff] %v7378_v45  ;;  %v2133_v39 = vmax.f32 %v2101_v10, 0.0  ;;  %v2120_v56 = vmax.f32 %v2088_v57, 0.0  ;;  %4523 = vrot.lane.b32.xlu1 %v7378_v45, %s5224_s26 }
 0x2ed   : > { %v7386_v55 = vld [vmem:[#allocation3 + $0x128] sm:$0xff]  ;;  %v2212_v61 = vld [vmem:[#allocation3 + $0x130] sm:$0x3]  ;;  %8908 = vst [vmem:[#allocation23_spill] sm:$0xff] %v7389_v8 }
 0x2ee   : > { %2166 = vst.msk [vmem:[#allocation3 + $0x139] sm:$0xff] %vm280_vm0, %v2133_v39  ;;  %v2337_v24 = vrot.slane %v7386_v55, 1  ;;  %v2339_v5 = vrot.slane %v2212_v61, 1  ;;  %v2515_v0 = vrot.slane %v2212_v61, 2  ;;  %v2513_v36 = vrot.slane %v7386_v55, 2  ;;  %v7410_v10 = vld [vmem:[#allocation3 + $0x90] sm:$0xff] }
 0x2ef   : > { %2153 = vst.msk [vmem:[#allocation3 + $0x99] sm:$0xff] %vm280_vm0, %v2120_v56  ;;  %v2019_v58 = vpop.f32.mrf.mxu2  ;;  %v1987_v33 = vpop.f32.mrf.mxu0  ;;  %v2306_v56 = vrot.slane %v7410_v10, 1  ;;  %v2482_v61 = vrot.slane %v7410_v10, 2 }
 0x2f0   : > { %v2066_v49 = vmul.f32 %v7155_v15, %v2019_v58  ;;  %v2053_v21 = vmul.f32 %v7155_v15, %v1987_v33  ;;  %v2338_v32 = vsel %vm640_vm3, %v2336_v25, %v2337_v24  ;;  %v2340_v52 = vsel %vm640_vm3, %v2337_v24, %v2339_v5 }
 0x2f1   : > { %v7400_v38 = vpack.i.bf16 %v2340_v52, %v2338_v32  ;;  %v2514_v20 = vsel %vm817_vm4, %v2512_v31, %v2513_v36  ;;  %v2516_v27 = vsel %vm817_vm4, %v2513_v36, %v2515_v0 }
 0x2f2   : > { %v2102_v22 = vadd.f32 %v7164_v17, %v2066_v49  ;;  %v2089_v60 = vadd.f32 %v7164_v17, %v2053_v21  ;;  %v7406_v23 = vpack.i.bf16 %v2516_v27, %v2514_v20 }
 0x2f3   : > { %8909 = vst [vmem:[#allocation6_spill] sm:$0xff] %v7400_v38  ;;  %4518 = vrot.lane.b32.xlu2 %v7400_v38, %s5224_s26 }
 0x2f4   : > { %v2134_v57 = vmax.f32 %v2102_v22, 0.0  ;;  %v2121_v1 = vmax.f32 %v2089_v60, 0.0  ;;  %4538 = vrot.lane.b32.xlu1 %v7208_v41, %s5225_s12 }
 0x2f5   : > { %v7430_v22 = vld [vmem:[#allocation3 + $0x138] sm:$0xff] }
 0x2f6   : > { %2167 = vst.msk [vmem:[#allocation3 + $0x141] sm:$0xff] %vm280_vm0, %v2134_v57  ;;  %v7415_v6 = vld [vmem:[#allocation3 + $0x98] sm:$0xff]  ;;  %v2194_v39 = vld [vmem:[#allocation3 + $0xa0] sm:$0x3] }
 0x2f7   : > { %2154 = vst.msk [vmem:[#allocation3 + $0xa9] sm:$0xff] %vm280_vm0, %v2121_v1  ;;  %v2022_v25 = vpop.f32.mrf.mxu2  ;;  %v1989_v24 = vpop.f32.mrf.mxu0  ;;  %v2307_v5 = vrot.slane %v7415_v6, 1  ;;  %v2309_v0 = vrot.slane %v2194_v39, 1  ;;  %v2485_v36 = vrot.slane %v2194_v39, 2  ;;  %v2483_v58 = vrot.slane %v7415_v6, 2 }
 0x2f8   : > { %v2067_v33 = vmul.f32 %v7155_v15, %v2022_v25  ;;  %v2054_v31 = vmul.f32 %v7155_v15, %v1989_v24  ;;  %v2341_v25 = vrot.slane %v7430_v22, 1 }
 0x2f9   : > { %v2308_v49 = vsel %vm640_vm3, %v2306_v56, %v2307_v5  ;;  %v2310_v21 = vsel %vm640_vm3, %v2307_v5, %v2309_v0  ;;  %v2484_v32 = vsel %vm817_vm4, %v2482_v61, %v2483_v58  ;;  %v2486_v52 = vsel %vm817_vm4, %v2483_v58, %v2485_v36 }
 0x2fa   : > { %v2103_v20 = vadd.f32 %v7164_v17, %v2067_v33  ;;  %v2090_v27 = vadd.f32 %v7164_v17, %v2054_v31  ;;  %v7434_v60 = vpack.i.bf16 %v2310_v21, %v2308_v49  ;;  %v7436_v57 = vpack.i.bf16 %v2486_v52, %v2484_v32 }
 0x2fb   : > { %4543 = vrot.lane.b32.xlu2 %v7240_v30, %s5225_s12  ;;  %v2452_v31 = vrot.slane %v7175_v26, 2  ;;  %v2453_v49 = vrot.slane %v7177_v53, 2  ;;  %v2455_v21 = vrot.slane %v7179_v50, 2  ;;  %v2517_v32 = vrot.slane %v7430_v22, 2 }
 0x2fc   : > { %8910 = vst [vmem:[#allocation25_spill] sm:$0xff] %v7434_v60  ;;  %v2135_v1 = vmax.f32 %v2103_v20, 0.0  ;;  %v2122_v39 = vmax.f32 %v2090_v27, 0.0  ;;  %4553 = vrot.lane.b32.xlu1 %v7334_v48, %s5225_s12 }
 0x2fd   : > { %8911 = vst [vmem:[#allocation4_spill] sm:$0xff] %v7436_v57  ;;  %v7440_v56 = vld [vmem:[#allocation3 + $0x140] sm:$0xff]  ;;  %v2215_v61 = vld [vmem:[#allocation3 + $0x148] sm:$0x3] }
 0x2fe   : > { %2168 = vst.msk [vmem:[#allocation3 + $0x151] sm:$0xff] %vm280_vm0, %v2135_v1  ;;  %v2342_v24 = vrot.slane %v7440_v56, 1  ;;  %v2344_v5 = vrot.slane %v2215_v61, 1  ;;  %v2520_v0 = vrot.slane %v2215_v61, 2  ;;  %v2518_v36 = vrot.slane %v7440_v56, 2 }
 0x2ff   : > { %2155 = vst.msk [vmem:[#allocation3 + $0xb1] sm:$0xff] %vm280_vm0, %v2122_v39  ;;  %v2024_v58 = vpop.f32.mrf.mxu2  ;;  %v1992_v33 = vpop.f32.mrf.mxu0 }
 0x300   : > { %v2068_v52 = vmul.f32 %v7155_v15, %v2024_v58  ;;  %v2055_v20 = vmul.f32 %v7155_v15, %v1992_v33  ;;  %v2343_v27 = vsel %vm640_vm3, %v2341_v25, %v2342_v24  ;;  %v2345_v1 = vsel %vm640_vm3, %v2342_v24, %v2344_v5  ;;  %v7467_v5 = vld [vmem:[#allocation3 + $0xa8] sm:$0xff] }
 0x301   : > { %v7455_v61 = vpack.i.bf16 %v2345_v1, %v2343_v27  ;;  %v2519_v39 = vsel %vm817_vm4, %v2517_v32, %v2518_v36  ;;  %v2521_v50 = vsel %vm817_vm4, %v2518_v36, %v2520_v0  ;;  %v2454_v25 = vsel %vm817_vm4, %v2452_v31, %v2453_v49 }
 0x302   : > { %v2104_v26 = vadd.f32 %v7164_v17, %v2068_v52  ;;  %v2091_v53 = vadd.f32 %v7164_v17, %v2055_v20  ;;  %v2456_v24 = vsel %vm817_vm4, %v2453_v49, %v2455_v21  ;;  %v7469_v32 = vpack.i.bf16 %v2521_v50, %v2519_v39 }
 0x303   : > { %8912 = vst [vmem:[#allocation54_spill] sm:$0xff] %v7455_v61  ;;  %4528 = vrot.lane.b32.xlu0 %v7455_v61, %s5224_s26  ;;  %4558 = vrot.lane.b32.xlu2 %v7434_v60, %s5224_s26  ;;  %v4532_v52 = vpack.i.bf16 %v2456_v24, %v2454_v25  ;;  %v2487_v20 = vrot.slane %v7467_v5, 2  ;;  %v2311_v27 = vrot.slane %v7467_v5, 1 }
 0x304   : > { %v2136_v58 = vmax.f32 %v2104_v26, 0.0  ;;  %v2123_v33 = vmax.f32 %v2091_v53, 0.0 }
 0x305   : > { %v7487_v41 = vld [vmem:[#allocation3 + $0x150] sm:$0xff] }
 0x306   : > { %2169 = vst.msk [vmem:[#allocation3 + $0x159] sm:$0xff] %vm280_vm0, %v2136_v58  ;;  %v7472_v0 = vld [vmem:[#allocation3 + $0xb0] sm:$0xff]  ;;  %v2197_v36 = vld [vmem:[#allocation3 + $0xb8] sm:$0x3] }
 0x307   : > { %2156 = vst.msk [vmem:[#allocation3 + $0xc1] sm:$0xff] %vm280_vm0, %v2123_v33  ;;  %v2027_v31 = vpop.f32.mrf.mxu2  ;;  %v1994_v49 = vpop.f32.mrf.mxu0  ;;  %v2488_v21 = vrot.slane %v7472_v0, 2  ;;  %v2490_v1 = vrot.slane %v2197_v36, 2  ;;  %v2312_v39 = vrot.slane %v7472_v0, 1  ;;  %v2314_v26 = vrot.slane %v2197_v36, 1 }
 0x308   : > { %v2069_v53 = vmul.f32 %v7155_v15, %v2027_v31  ;;  %v2056_v50 = vmul.f32 %v7155_v15, %v1994_v49 }
 0x309   : > { %v2489_v25 = vsel %vm817_vm4, %v2487_v20, %v2488_v21  ;;  %v2491_v24 = vsel %vm817_vm4, %v2488_v21, %v2490_v1  ;;  %v2313_v58 = vsel %vm640_vm3, %v2311_v27, %v2312_v39  ;;  %v2315_v33 = vsel %vm640_vm3, %v2312_v39, %v2314_v26 }
 0x30a   : > { %v2105_v48 = vadd.f32 %v7164_v17, %v2069_v53  ;;  %v2092_v30 = vadd.f32 %v7164_v17, %v2056_v50  ;;  %v7492_v36 = vpack.i.bf16 %v2315_v33, %v2313_v58  ;;  %v7494_v20 = vpack.i.bf16 %v2491_v24, %v2489_v25 }
 0x30b   : > { %4533 = vrot.lane.b32.xlu0 %v4532_v52, %s5225_s12  ;;  %4563 = vrot.lane.b32.xlu2 %v7389_v8, %s5225_s12  ;;  %v2346_v1 = vrot.slane %v7487_v41, 1  ;;  %v2522_v39 = vrot.slane %v7487_v41, 2 }
 0x30c   : > { %8913 = vst [vmem:[#allocation49_spill] sm:$0xff] %v7492_v36  ;;  %v2137_v31 = vmax.f32 %v2105_v48, 0.0  ;;  %v2124_v49 = vmax.f32 %v2092_v30, 0.0 }
 0x30d   : > { %8914 = vst [vmem:[#allocation62_spill] sm:$0xff] %v7494_v20  ;;  %v7496_v27 = vld [vmem:[#allocation3 + $0x158] sm:$0xff]  ;;  %v2218_v21 = vld [vmem:[#allocation3 + $0x160] sm:$0x3] }
 0x30e   : > { %2170 = vst.msk [vmem:[#allocation3 + $0x169] sm:$0xff] %vm280_vm0, %v2137_v31  ;;  %v2347_v52 = vrot.slane %v7496_v27, 1  ;;  %v2349_v26 = vrot.slane %v2218_v21, 1  ;;  %v2525_v53 = vrot.slane %v2218_v21, 2  ;;  %v2523_v50 = vrot.slane %v7496_v27, 2 }
 0x30f   : > { %2157 = vst.msk [vmem:[#allocation3 + $0xc9] sm:$0xff] %vm280_vm0, %v2124_v49  ;;  %v2029_v25 = vpop.f32.mrf.mxu2  ;;  %v7518_v49 = vld [vmem:[#allocation3 + $0xc0] sm:$0xff] }
 0x310   : > { %v2070_v30 = vmul.f32 %v7155_v15, %v2029_v25  ;;  %v2348_v48 = vsel %vm640_vm3, %v2346_v1, %v2347_v52  ;;  %v2350_v24 = vsel %vm640_vm3, %v2347_v52, %v2349_v26  ;;  %v2524_v58 = vsel %vm817_vm4, %v2522_v39, %v2523_v50 }
 0x311   : > { %v7508_v33 = vpack.i.bf16 %v2350_v24, %v2348_v48  ;;  %v2526_v31 = vsel %vm817_vm4, %v2523_v50, %v2525_v53  ;;  %v2492_v26 = vrot.slane %v7518_v49, 2  ;;  %v2316_v53 = vrot.slane %v7518_v49, 1 }
 0x312   : > { %v2106_v8 = vadd.f32 %v7164_v17, %v2070_v30  ;;  %v7512_v21 = vpack.i.bf16 %v2526_v31, %v2524_v58 }
 0x313   : > { %8915 = vst [vmem:[#allocation58_spill] sm:$0xff] %v7508_v33  ;;  %4548 = vrot.lane.b32.xlu0 %v7286_v44, %s5225_s12  ;;  %4568 = vrot.lane.b32.xlu1 %v7508_v33, %s5224_s26 }
 0x314   : > { %v2138_v1 = vmax.f32 %v2106_v8, 0.0  ;;  %4598 = vrot.lane.b32.xlu2 %v7356_v4, %s5225_s12 }
 0x316   : > { %2171 = vst.msk [vmem:[#allocation3 + $0x171] sm:$0xff] %vm280_vm0, %v2138_v1  ;;  %v7523_v39 = vld [vmem:[#allocation3 + $0xc8] sm:$0xff]  ;;  %v2200_v52 = vld [vmem:[#allocation3 + $0xd0] sm:$0x3] }
 0x317   : > { %v2032_v50 = vpop.f32.mrf.mxu2  ;;  %v2493_v25 = vrot.slane %v7523_v39, 2  ;;  %v2495_v30 = vrot.slane %v2200_v52, 2  ;;  %v2317_v48 = vrot.slane %v7523_v39, 1  ;;  %v2319_v24 = vrot.slane %v2200_v52, 1  ;;  %v7541_v52 = vld [vmem:[#allocation3 + $0x168] sm:$0xff] }
 0x318   : > { %v2071_v8 = vmul.f32 %v7155_v15, %v2032_v50 }
 0x319   : > { %v2494_v58 = vsel %vm817_vm4, %v2492_v26, %v2493_v25  ;;  %v2496_v31 = vsel %vm817_vm4, %v2493_v25, %v2495_v30  ;;  %v2318_v1 = vsel %vm640_vm3, %v2316_v53, %v2317_v48  ;;  %v2320_v4 = vsel %vm640_vm3, %v2317_v48, %v2319_v24 }
 0x31a   : > { %v2107_v44 = vadd.f32 %v7164_v17, %v2071_v8  ;;  %v7535_v33 = vpack.i.bf16 %v2320_v4, %v2318_v1  ;;  %v7543_v50 = vpack.i.bf16 %v2496_v31, %v2494_v58  ;;  %v2351_v30 = vrot.slane %v7541_v52, 1 }
 0x31b   : > { %4588 = vrot.lane.b32.xlu1 %v7494_v20, %s5225_s12  ;;  %4573 = vrot.lane.b32.xlu0 %v7492_v36, %s5224_s26  ;;  %v2527_v8 = vrot.slane %v7541_v52, 2 }
 0x31c   : > { %8916 = vst [vmem:[#allocation67_spill] sm:$0xff] %v7535_v33  ;;  %v2139_v26 = vmax.f32 %v2107_v44, 0.0 }
 0x31d   : > { %v7545_v25 = vld [vmem:[#allocation3 + $0x170] sm:$0xff]  ;;  %v2221_v53 = vld [vmem:[#allocation3 + $0x178] sm:$0x3] }
 0x31e   : > { %2172 = vst.msk [vmem:[#allocation3 + $0x181] sm:$0xff] %vm280_vm0, %v2139_v26  ;;  %v2352_v4 = vrot.slane %v7545_v25, 1  ;;  %v2354_v48 = vrot.slane %v2221_v53, 1  ;;  %v2528_v1 = vrot.slane %v7545_v25, 2  ;;  %v2530_v20 = vrot.slane %v2221_v53, 2 }
 0x31f   : > { %v2034_v24 = vpop.f32.mrf.mxu2 }
 0x320   : > { %v2072_v58 = vmul.f32 %v7155_v15, %v2034_v24  ;;  %v2353_v44 = vsel %vm640_vm3, %v2351_v30, %v2352_v4  ;;  %v2355_v31 = vsel %vm640_vm3, %v2352_v4, %v2354_v48  ;;  %v2529_v61 = vsel %vm817_vm4, %v2527_v8, %v2528_v1 }
 0x321   : > { %v2531_v26 = vsel %vm817_vm4, %v2528_v1, %v2530_v20  ;;  %v7558_v47 = vpack.i.bf16 %v2355_v31, %v2353_v44  ;;  %v7578_v31 = vpop.permute.xlu2 %4478 }
 0x322   : > { %v2108_v38 = vadd.f32 %v7164_v17, %v2072_v58  ;;  %v7564_v53 = vpack.i.bf16 %v2531_v26, %v2529_v61 }
 0x323   : > { %8917 = vst [vmem:[#allocation8_spill] sm:$0xff] %v7558_v47  ;;  %4593 = vrot.lane.b32.xlu1 %v7308_v29, %s5225_s12  ;;  %4578 = vrot.lane.b32.xlu0 %v7436_v57, %s5225_s12 }
 0x324   : > { %v2140_v15 = vmax.f32 %v2108_v38, 0.0  ;;  %4608 = vrot.lane.b32.xlu2 %v7558_v47, %s5224_s26 }
 0x325   : > { %v2222_v30 = vld [vmem:[#allocation3 + $0x180] sm:$0xff] }
 0x326   : > { %2173 = vst.msk [vmem:[#allocation3 + $0x189] sm:$0xff] %vm280_vm0, %v2140_v15  ;;  %v2727_v61 = vrot.slane %v2222_v30, 1  ;;  %v2828_v48 = vrot.slane %v2222_v30, 2 }
 0x32b   : > { %4583 = vrot.lane.b32.xlu0 %v7262_v40, %s5225_s12  ;;  %4613 = vrot.lane.b32.xlu1 %v7535_v33, %s5224_s26 }
 0x32c   : > { %4623 = vrot.lane.b32.xlu2 %v7543_v50, %s5225_s12 }
 0x32d   : > { %v2223_v17 = vld [vmem:[#allocation3 + $0x188] sm:$0xff]  ;;  %v2224_v20 = vld [vmem:[#allocation3 + $0x190] sm:$0x3] }
 0x32e   : > { %v2728_v4 = vrot.slane %v2223_v17, 1  ;;  %v2730_v38 = vrot.slane %v2224_v20, 1  ;;  %v2829_v24 = vrot.slane %v2223_v17, 2  ;;  %v2831_v44 = vrot.slane %v2224_v20, 2 }
 0x32f   : > { %v7581_v15 = vpack.i.bf16 %v2223_v17, %v2222_v30  ;;  %v4637_v20 = vpack.i.bf16 %v7190_v16, %v7186_v3  ;;  %v4642_v30 = vpack.i.bf16 %v7221_v12, %v7218_v54  ;;  %v7597_v17 = vpop.permute.xlu2 %4493  ;;  %v4657_v3 = vpack.i.bf16 %v7365_v51, %v7362_v42 }
 0x330   : > { %v2729_v8 = vsel %vm640_vm3, %v2727_v61, %v2728_v4  ;;  %v2731_v1 = vsel %vm640_vm3, %v2728_v4, %v2730_v38  ;;  %v2830_v58 = vsel %vm817_vm4, %v2828_v48, %v2829_v24  ;;  %v2832_v26 = vsel %vm817_vm4, %v2829_v24, %v2831_v44 }
 0x331   : > { %8918 = vst [vmem:[#allocation9_spill] sm:$0xff] %v7581_v15  ;;  %v7583_v29 = vpack.i.bf16 %v2731_v1, %v2729_v8  ;;  %v7589_v61 = vpack.i.bf16 %v2832_v26, %v2830_v58  ;;  %v4647_v4 = vpack.i.bf16 %v7267_v13, %v7264_v11  ;;  %v4652_v38 = vpack.i.bf16 %v7315_v35, %v7310_v28  ;;  %v4489_v1 = vpop.permute.xlu1 %4488 }
 0x332   : > { %v4662_v48 = vpack.i.bf16 %v7415_v6, %v7410_v10  ;;  %v4667_v11 = vpack.i.bf16 %v7472_v0, %v7467_v5  ;;  %v4672_v24 = vpack.i.bf16 %v7523_v39, %v7518_v49  ;;  %v4677_v58 = vpack.i.bf16 %v7244_v37, %v7238_v43 }
 0x333   : > { %8919 = vst [vmem:[#allocation20_spill] sm:$0xff] %v7583_v29  ;;  %4603 = vrot.lane.b32.xlu0 %v7406_v23, %s5225_s12  ;;  %4618 = vrot.lane.b32.xlu1 %v7469_v32, %s5225_s12  ;;  %v4682_v44 = vpack.i.bf16 %v7290_v62, %v7284_v9  ;;  %v4687_v26 = vpack.i.bf16 %v7338_v2, %v7332_v14 }
 0x334   : > { %8920 = vst [vmem:[#allocation27_spill] sm:$0xff] %v7589_v61  ;;  %4628 = vrot.lane.b32.xlu2 %v7512_v21, %s5225_s12 }
 0x337   : > { %v7612_v16 = vpop.permute.xlu2 %4503 }
 0x33b   : > { %4633 = vrot.lane.b32.xlu0 %v7564_v53, %s5225_s12  ;;  %4638 = vrot.lane.b32.xlu1 %v4637_v20, %s5226_s13  ;;  %v4491_v20 = vunpack.i.h.bf16 %v4489_v1 }
 0x33c   : > { %4643 = vrot.lane.b32.xlu2 %v4642_v30, %s5226_s13  ;;  %v4490_v30 = vunpack.i.l.bf16 %v4489_v1  ;;  %v4702_v1 = vpack.i.bf16 %v7496_v27, %v7487_v41 }
 0x33d   : > { %v3235_v43 = vsel %vm280_vm0, %v7221_v12, %v4491_v20 }
 0x33e   : > { %v3234_v37 = vsel %vm280_vm0, %v7218_v54, %v4490_v30 }
 0x343   : > { %4648 = vrot.lane.b32.xlu0 %v4647_v4, %s5226_s13  ;;  %4653 = vrot.lane.b32.xlu1 %v4652_v38, %s5226_s13 }
 0x344   : > { %4658 = vrot.lane.b32.xlu2 %v4657_v3, %s5226_s13 }
 0x34b   : > { %4663 = vrot.lane.b32.xlu0 %v4662_v48, %s5226_s13  ;;  %4668 = vrot.lane.b32.xlu1 %v4667_v11, %s5226_s13  ;;  %v4692_v11 = vpack.i.bf16 %v7386_v55, %v7380_v34 }
 0x34c   : > { %4673 = vrot.lane.b32.xlu2 %v4672_v24, %s5226_s13  ;;  %v4697_v24 = vpack.i.bf16 %v7440_v56, %v7430_v22 }
 0x34d   : > { %v7623_v8 = vpop.permute.xlu2 %4518 }
 0x353   : > { %4678 = vrot.lane.b32.xlu0 %v4677_v58, %s5226_s13  ;;  %4683 = vrot.lane.b32.xlu1 %v4682_v44, %s5226_s13  ;;  %v4484_v58 = vpop.permute.xlu0 %4483  ;;  %v7657_v44 = vpack.i.bf16 %v7545_v25, %v7541_v52 }
 0x354   : > { %4688 = vrot.lane.b32.xlu2 %v4687_v26, %s5226_s13 }
 0x355   : > { %v4544_v4 = vpop.permute.xlu2 %4543  ;;  %v4514_v38 = vpop.permute.xlu1 %4513  ;;  %8923 = vst [vmem:[#allocation36_spill] sm:$0xff] %v7657_v44 }
 0x356   : > { %v4546_v3 = vunpack.i.h.bf16 %v4544_v4  ;;  %v4545_v48 = vunpack.i.l.bf16 %v4544_v4  ;;  %v4486_v4 = vunpack.i.h.bf16 %v4484_v58 }
 0x358   : > { %v7639_v9 = vsel %vm1628_vm7, %v3235_v43, %v4546_v3  ;;  %v7642_v62 = vsel %vm1628_vm7, %v3234_v37, %v4545_v48  ;;  %v4485_v3 = vunpack.i.l.bf16 %v4484_v58 }
 0x359   : > { %8921 = vst [vmem:[#allocation32_spill] sm:$0xff] %v7639_v9 }
 0x35a   : > { %8922 = vst [vmem:[#allocation34_spill] sm:$0xff] %v7642_v62  ;;  %v5154_v62 = vld [vmem:[#allocation3 + $0x18] sm:$0xff] }
 0x35b   : > { %4693 = vrot.lane.b32.xlu0 %v4692_v11, %s5226_s13  ;;  %4698 = vrot.lane.b32.xlu1 %v4697_v24, %s5226_s13  ;;  %v4499_v26 = vpop.permute.xlu0 %4498  ;;  %v3232_v58 = vsel %vm280_vm0, %v5154_v62, %v4485_v3 }
 0x35c   : > { %4703 = vrot.lane.b32.xlu2 %v4702_v1, %s5226_s13  ;;  %v4500_v62 = vunpack.i.l.bf16 %v4499_v26 }
 0x35d   : > { %v7653_v54 = vpop.permute.xlu2 %4558 }
 0x35e   : > { %v4524_v12 = vpop.permute.xlu1 %4523 }
 0x35f   : > { %v4526_v20 = vunpack.i.h.bf16 %v4524_v12  ;;  %v4525_v30 = vunpack.i.l.bf16 %v4524_v12 }
 0x361   : > { %v3241_v24 = vsel %vm280_vm0, %v7365_v51, %v4526_v20  ;;  %v3240_v1 = vsel %vm280_vm0, %v7362_v42, %v4525_v30  ;;  %v4501_v42 = vunpack.i.h.bf16 %v4499_v26  ;;  %v4515_v20 = vunpack.i.l.bf16 %v4514_v38 }
 0x363   : > { %4708 = vrot.lane.b32.xlu0 %v7657_v44, %s5226_s13  ;;  %4713 = vrot.lane.b32.xlu1 %v7581_v15, %s5226_s13  ;;  %v5153_v44 = vld [vmem:[#allocation3 + $0x20] sm:$0xff]  ;;  %v7689_v30 = vpop.permute.xlu0 %4508  ;;  %v3252_v26 = vsel %vm280_vm0, %v7332_v14, %v4515_v20  ;;  %v4481_v14 = vunpack.i.h.bf16 %v7578_v31 }
 0x364   : > { %4718 = vrot.lane.b32.xlu2 %v7202_v7, %s5227_s14  ;;  %v3233_v15 = vsel %vm280_vm0, %v5153_v44, %v4486_v4  ;;  %v4516_v44 = vunpack.i.h.bf16 %v4514_v38 }
 0x365   : > { %v4564_v48 = vpop.permute.xlu2 %4563 }
 0x366   : > { %v4566_v43 = vunpack.i.h.bf16 %v4564_v48  ;;  %v4565_v37 = vunpack.i.l.bf16 %v4564_v48  ;;  %v4539_v11 = vpop.permute.xlu1 %4538  ;;  %v3253_v38 = vsel %vm280_vm0, %v7338_v2, %v4516_v44  ;;  %v4480_v2 = vunpack.i.l.bf16 %v7578_v31 }
 0x367   : > { %v4541_v12 = vunpack.i.h.bf16 %v4539_v11  ;;  %v4540_v61 = vunpack.i.l.bf16 %v4539_v11  ;;  %v3239_v11 = vsel %vm280_vm0, %v7315_v35, %v4501_v42 }
 0x368   : > { %v7672_v7 = vsel %vm1628_vm7, %v3241_v24, %v4566_v43  ;;  %v7675_v48 = vsel %vm1628_vm7, %v3240_v1, %v4565_v37  ;;  %v3238_v24 = vsel %vm280_vm0, %v7310_v28, %v4500_v62 }
 0x369   : > { %v7678_v9 = vsel %vm1628_vm7, %v3233_v15, %v4541_v12  ;;  %v7681_v51 = vsel %vm1628_vm7, %v3232_v58, %v4540_v61 }
 0x36b   : > { %4723 = vrot.lane.b32.xlu0 %v7236_v59, %s5227_s14  ;;  %4728 = vrot.lane.b32.xlu1 %v7282_v18, %s5227_s14 }
 0x36c   : > { %4733 = vrot.lane.b32.xlu2 %v7330_v19, %s5227_s14 }
 0x36e   : > { %v4599_v15 = vpop.permute.xlu2 %4598  ;;  %v4554_v4 = vpop.permute.xlu1 %4553 }
 0x36f   : > { %v4601_v3 = vunpack.i.h.bf16 %v4599_v15  ;;  %v4600_v61 = vunpack.i.l.bf16 %v4599_v15  ;;  %v4556_v43 = vunpack.i.h.bf16 %v4554_v4  ;;  %v4555_v37 = vunpack.i.l.bf16 %v4554_v4  ;;  %v5155_v15 = vld [vmem:[#allocation3 + $0x8] sm:$0xff] }
 0x370   : > { %v3231_v4 = vsel %vm280_vm0, %v5155_v15, %v4481_v14 }
 0x371   : > { %v7700_v1 = vsel %vm1628_vm7, %v3253_v38, %v4601_v3  ;;  %v7703_v12 = vsel %vm1628_vm7, %v3252_v26, %v4600_v61  ;;  %v7706_v58 = vsel %vm1628_vm7, %v3239_v11, %v4556_v43  ;;  %v7709_v35 = vsel %vm1628_vm7, %v3238_v24, %v4555_v37  ;;  %v5156_v3 = vld [vmem:[#allocation3] sm:$0xff]  ;;  %v8924_v24 = vld [vmem:[#allocation11_spill] sm:$0xff] }
 0x372   : > { %v3230_v31 = vsel %vm280_vm0, %v5156_v3, %v4480_v2  ;;  %v4496_v37 = vunpack.i.h.bf16 %v7597_v17  ;;  %v4495_v11 = vunpack.i.l.bf16 %v7597_v17  ;;  %v8925_v38 = vld [vmem:[#allocation6_spill] sm:$0xff] }
 0x373   : > { %4738 = vrot.lane.b32.xlu0 %v7378_v45, %s5227_s14  ;;  %4743 = vrot.lane.b32.xlu1 %v7434_v60, %s5227_s14  ;;  %v8926_v26 = vld [vmem:[#allocation54_spill] sm:$0xff] }
 0x374   : > { %4748 = vrot.lane.b32.xlu2 %v7492_v36, %s5227_s14 }
 0x375   : > { %v7717_v28 = vpop.permute.xlu0 %4528 }
 0x37b   : > { %4753 = vrot.lane.b32.xlu0 %v7535_v33, %s5227_s14  ;;  %4758 = vrot.lane.b32.xlu1 %v7258_v46, %s5227_s14  ;;  %v8927_v46 = vld [vmem:[#allocation58_spill] sm:$0xff] }
 0x37c   : > { %4763 = vrot.lane.b32.xlu2 %v7304_v63, %s5227_s14 }
 0x37d   : > { %v4534_v42 = vpop.permute.xlu0 %4533 }
 0x37e   : > { %v4536_v62 = vunpack.i.h.bf16 %v4534_v42  ;;  %v4535_v44 = vunpack.i.l.bf16 %v4534_v42  ;;  %v7727_v20 = vpop.permute.xlu2 %4608 }
 0x380   : > { %v7732_v61 = vsel %vm1628_vm7, %v3231_v4, %v4536_v62  ;;  %v7735_v43 = vsel %vm1628_vm7, %v3230_v31, %v4535_v44  ;;  %v3237_v44 = vsel %vm280_vm0, %v7267_v13, %v4496_v37  ;;  %v7749_v4 = vld [vmem:[#allocation3 + $0x48] sm:$0xff] }
 0x381   : > { %v3236_v17 = vsel %vm280_vm0, %v7749_v4, %v4495_v11 }
 0x383   : > { %4768 = vrot.lane.b32.xlu0 %v8924_v24, %s5227_s14  ;;  %4773 = vrot.lane.b32.xlu1 %v8925_v38, %s5227_s14 }
 0x384   : > { %4778 = vrot.lane.b32.xlu2 %v8926_v26, %s5227_s14 }
 0x385   : > { %v4549_v14 = vpop.permute.xlu0 %4548  ;;  %v4569_v2 = vpop.permute.xlu1 %4568 }
 0x386   : > { %v4551_v42 = vunpack.i.h.bf16 %v4549_v14  ;;  %v4550_v62 = vunpack.i.l.bf16 %v4549_v14  ;;  %v7745_v15 = vpop.permute.xlu2 %4623  ;;  %v4571_v14 = vunpack.i.h.bf16 %v4569_v2  ;;  %v4570_v33 = vunpack.i.l.bf16 %v4569_v2 }
 0x388   : > { %v7754_v3 = vsel %vm1628_vm7, %v3237_v44, %v4551_v42  ;;  %v7757_v31 = vsel %vm1628_vm7, %v3236_v17, %v4550_v62  ;;  %v4511_v62 = vunpack.i.h.bf16 %v7689_v30  ;;  %v4510_v17 = vunpack.i.l.bf16 %v7689_v30 }
 0x389   : > { %v3258_v2 = vsel %vm280_vm0, %v7487_v41, %v4570_v33  ;;  %v4561_v41 = vunpack.i.h.bf16 %v7653_v54  ;;  %v4560_v33 = vunpack.i.l.bf16 %v7653_v54 }
 0x38b   : > { %4783 = vrot.lane.b32.xlu0 %v8927_v46, %s5227_s14  ;;  %4788 = vrot.lane.b32.xlu1 %v7558_v47, %s5227_s14  ;;  %v3259_v47 = vsel %vm280_vm0, %v7496_v27, %v4571_v14 }
 0x38c   : > { %4793 = vrot.lane.b32.xlu2 %v7583_v29, %s5227_s14 }
 0x38d   : > { %v4589_v13 = vpop.permute.xlu1 %4588  ;;  %v4574_v37 = vpop.permute.xlu0 %4573 }
 0x38e   : > { %v4591_v11 = vunpack.i.h.bf16 %v4589_v13  ;;  %v4590_v36 = vunpack.i.l.bf16 %v4589_v13  ;;  %v4576_v42 = vunpack.i.h.bf16 %v4574_v37  ;;  %v4575_v44 = vunpack.i.l.bf16 %v4574_v37  ;;  %v4629_v60 = vpop.permute.xlu2 %4628 }
 0x38f   : > { %v4631_v46 = vunpack.i.h.bf16 %v4629_v60  ;;  %v4630_v45 = vunpack.i.l.bf16 %v4629_v60 }
 0x390   : > { %v3245_v29 = vsel %vm280_vm0, %v7472_v0, %v4576_v42  ;;  %v3244_v13 = vsel %vm280_vm0, %v7467_v5, %v4575_v44  ;;  %v8929_v0 = vld [vmem:[#allocation22_spill] sm:$0xff]  ;;  %v8930_v5 = vld [vmem:[#allocation5_spill] sm:$0xff] }
 0x391   : > { %v7776_v37 = vsel %vm1628_vm7, %v3259_v47, %v4631_v46  ;;  %v7779_v26 = vsel %vm1628_vm7, %v3258_v2, %v4630_v45  ;;  %v7782_v60 = vsel %vm1628_vm7, %v3244_v13, %v4590_v36  ;;  %v7785_v27 = vsel %vm1628_vm7, %v3245_v29, %v4591_v11  ;;  %v8931_v46 = vld [vmem:[#allocation7_spill] sm:$0xff]  ;;  %v7795_v47 = vld [vmem:[#allocation3 + $0xf8] sm:$0xff]  ;;  %v7799_v29 = vld [vmem:[#allocation3 + $0xf0] sm:$0xff] }
 0x392   : > { %8928 = vst [vmem:[#allocation42_spill] sm:$0xff] %v7776_v37  ;;  %v3251_v45 = vsel %vm280_vm0, %v7795_v47, %v4511_v62  ;;  %v3250_v36 = vsel %vm280_vm0, %v7799_v29, %v4510_v17  ;;  %v3243_v13 = vsel %vm280_vm0, %v7415_v6, %v4561_v41  ;;  %v4505_v6 = vunpack.i.l.bf16 %v7612_v16 }
 0x393   : > { %4798 = vrot.lane.b32.xlu0 %v8929_v0, %s5228_s15  ;;  %4803 = vrot.lane.b32.xlu1 %v8930_v5, %s5228_s15  ;;  %v3242_v0 = vsel %vm280_vm0, %v7410_v10, %v4560_v33  ;;  %v8932_v33 = vld [vmem:[#allocation29_spill] sm:$0xff] }
 0x394   : > { %4808 = vrot.lane.b32.xlu2 %v8931_v46, %s5228_s15 }
 0x395   : > { %v4594_v54 = vpop.permute.xlu1 %4593  ;;  %v4579_v30 = vpop.permute.xlu0 %4578 }
 0x396   : > { %v4596_v14 = vunpack.i.h.bf16 %v4594_v54  ;;  %v4595_v11 = vunpack.i.l.bf16 %v4594_v54  ;;  %v4581_v42 = vunpack.i.h.bf16 %v4579_v30  ;;  %v4580_v44 = vunpack.i.l.bf16 %v4579_v30  ;;  %v4644_v2 = vpop.permute.xlu2 %4643 }
 0x397   : > { %v4646_v19 = vunpack.i.h.bf16 %v4644_v2  ;;  %v4645_v62 = vunpack.i.l.bf16 %v4644_v2  ;;  %v4506_v30 = vunpack.i.h.bf16 %v7612_v16 }
 0x398   : > { %v7808_v38 = vsel %vm1628_vm7, %v3251_v45, %v4596_v14  ;;  %v7811_v17 = vsel %vm1628_vm7, %v3250_v36, %v4595_v11  ;;  %v7814_v37 = vsel %vm1628_vm7, %v3243_v13, %v4581_v42  ;;  %v7817_v54 = vsel %vm1628_vm7, %v3242_v0, %v4580_v44  ;;  %v8933_v45 = vld [vmem:[#allocation23_spill] sm:$0xff]  ;;  %v7835_v36 = vld [vmem:[#allocation3 + $0xe0] sm:$0xff] }
 0x399   : > { %v7823_v10 = vsel %vm1661_vm6, %v7678_v9, %v4646_v19  ;;  %v7827_v41 = vsel %vm1661_vm6, %v7681_v51, %v4645_v62  ;;  %8934 = vst [vmem:[#allocation69_spill] sm:$0xff] %v7835_v36  ;;  %v3249_v16 = vsel %vm280_vm0, %v7835_v36, %v4506_v30  ;;  %v7839_v19 = vld [vmem:[#allocation3 + $0xd8] sm:$0xff]  ;;  %v4521_v51 = vunpack.i.h.bf16 %v7623_v8 }
 0x39a   : > { %v3248_v9 = vsel %vm280_vm0, %v7839_v19, %v4505_v6  ;;  %v4520_v14 = vunpack.i.l.bf16 %v7623_v8  ;;  %v4625_v30 = vunpack.i.l.bf16 %v7745_v15 }
 0x39b   : > { %4813 = vrot.lane.b32.xlu0 %v8932_v33, %s5228_s15  ;;  %4818 = vrot.lane.b32.xlu1 %v8933_v45, %s5228_s15 }
 0x39c   : > { %4823 = vrot.lane.b32.xlu2 %v7436_v57, %s5228_s15  ;;  %v4626_v57 = vunpack.i.h.bf16 %v7745_v15 }
 0x39d   : > { %v4584_v11 = vpop.permute.xlu0 %4583  ;;  %v4614_v42 = vpop.permute.xlu1 %4613 }
 0x39e   : > { %v4586_v44 = vunpack.i.h.bf16 %v4584_v11  ;;  %v4585_v2 = vunpack.i.l.bf16 %v4584_v11  ;;  %v4659_v13 = vpop.permute.xlu2 %4658  ;;  %v4616_v0 = vunpack.i.h.bf16 %v4614_v42  ;;  %v4615_v62 = vunpack.i.l.bf16 %v4614_v42 }
 0x39f   : > { %v4661_v36 = vunpack.i.h.bf16 %v4659_v13  ;;  %v4660_v45 = vunpack.i.l.bf16 %v4659_v13 }
 0x3a0   : > { %v7848_v33 = vsel %vm1628_vm7, %v3249_v16, %v4586_v44  ;;  %v7851_v6 = vsel %vm1628_vm7, %v3248_v9, %v4585_v2  ;;  %v3247_v8 = vsel %vm280_vm0, %v7523_v39, %v4616_v0  ;;  %v3246_v11 = vsel %vm280_vm0, %v7518_v49, %v4615_v62  ;;  %v8935_v49 = vld [vmem:[#allocation62_spill] sm:$0xff] }
 0x3a1   : > { %v7859_v42 = vsel %vm1661_vm6, %v7706_v58, %v4661_v36  ;;  %v7863_v15 = vsel %vm1661_vm6, %v7709_v35, %v4660_v45  ;;  %v7866_v16 = vsel %vm1628_vm7, %v3246_v11, %v4625_v30  ;;  %v7869_v9 = vsel %vm1628_vm7, %v3247_v8, %v4626_v57 }
 0x3a2   : > { %v4531_v44 = vunpack.i.h.bf16 %v7717_v28  ;;  %v4530_v39 = vunpack.i.l.bf16 %v7717_v28  ;;  %v3255_v58 = vsel %vm280_vm0, %v7386_v55, %v4521_v51  ;;  %v3254_v57 = vsel %vm280_vm0, %v7380_v34, %v4520_v14 }
 0x3a3   : > { %4828 = vrot.lane.b32.xlu0 %v8935_v49, %s5228_s15  ;;  %4833 = vrot.lane.b32.xlu1 %v7543_v50, %s5228_s15 }
 0x3a4   : > { %4838 = vrot.lane.b32.xlu2 %v7262_v40, %s5228_s15  ;;  %v3257_v62 = vsel %vm280_vm0, %v7440_v56, %v4531_v44  ;;  %v3256_v30 = vsel %vm280_vm0, %v7430_v22, %v4530_v39  ;;  %v4611_v22 = vunpack.i.h.bf16 %v7727_v20  ;;  %v4610_v44 = vunpack.i.l.bf16 %v7727_v20  ;;  %v8936_v39 = vld [vmem:[#allocation18_spill] sm:$0xff] }
 0x3a5   : > { %v4604_v35 = vpop.permute.xlu0 %4603  ;;  %v4619_v45 = vpop.permute.xlu1 %4618 }
 0x3a6   : > { %v4606_v36 = vunpack.i.h.bf16 %v4604_v35  ;;  %v4605_v2 = vunpack.i.l.bf16 %v4604_v35  ;;  %v4674_v28 = vpop.permute.xlu2 %4673  ;;  %v4621_v13 = vunpack.i.h.bf16 %v4619_v45  ;;  %v4620_v0 = vunpack.i.l.bf16 %v4619_v45 }
 0x3a7   : > { %v4676_v8 = vunpack.i.h.bf16 %v4674_v28  ;;  %v4675_v11 = vunpack.i.l.bf16 %v4674_v28  ;;  %v3260_v20 = vsel %vm280_vm0, %v7541_v52, %v4610_v44 }
 0x3a8   : > { %v7888_v55 = vsel %vm1628_vm7, %v3255_v58, %v4606_v36  ;;  %v7891_v34 = vsel %vm1628_vm7, %v3254_v57, %v4605_v2  ;;  %v3289_v51 = vsel %vm1628_vm7, %v3257_v62, %v4621_v13  ;;  %v3288_v14 = vsel %vm1628_vm7, %v3256_v30, %v4620_v0  ;;  %v8937_v58 = vld [vmem:[#allocation16_spill] sm:$0xff] }
 0x3a9   : > { %v7897_v35 = vsel %vm1661_vm6, %v7785_v27, %v4676_v8  ;;  %v7901_v56 = vsel %vm1661_vm6, %v7782_v60, %v4675_v11  ;;  %v3261_v13 = vsel %vm280_vm0, %v7545_v25, %v4611_v22 }
 0x3ab   : > { %4843 = vrot.lane.b32.xlu0 %v8936_v39, %s5228_s15  ;;  %4848 = vrot.lane.b32.xlu1 %v8937_v58, %s5228_s15 }
 0x3ac   : > { %4853 = vrot.lane.b32.xlu2 %v7406_v23, %s5228_s15 }
 0x3ad   : > { %v4634_v57 = vpop.permute.xlu0 %4633  ;;  %v4639_v27 = vpop.permute.xlu1 %4638 }
 0x3ae   : > { %v4636_v45 = vunpack.i.h.bf16 %v4634_v57  ;;  %v4635_v36 = vunpack.i.l.bf16 %v4634_v57  ;;  %v4689_v2 = vpop.permute.xlu2 %4688  ;;  %v4641_v60 = vunpack.i.h.bf16 %v4639_v27  ;;  %v4640_v28 = vunpack.i.l.bf16 %v4639_v27 }
 0x3af   : > { %v4691_v0 = vunpack.i.h.bf16 %v4689_v2  ;;  %v4690_v62 = vunpack.i.l.bf16 %v4689_v2 }
 0x3b0   : > { %v7916_v30 = vsel %vm1628_vm7, %v3261_v13, %v4636_v45  ;;  %v7919_v8 = vsel %vm1628_vm7, %v3260_v20, %v4635_v36  ;;  %v3295_v11 = vsel %vm1661_vm6, %v7732_v61, %v4641_v60  ;;  %v3294_v57 = vsel %vm1661_vm6, %v7735_v43, %v4640_v28  ;;  %v8939_v28 = vld [vmem:[#allocation34_spill] sm:$0xff] }
 0x3b1   : > { %v7927_v25 = vsel %vm1661_vm6, %v7808_v38, %v4691_v0  ;;  %v7931_v52 = vsel %vm1661_vm6, %v7811_v17, %v4690_v62  ;;  %v8938_v17 = vld [vmem:[#allocation32_spill] sm:$0xff] }
 0x3b3   : > { %4858 = vrot.lane.b32.xlu0 %v7469_v32, %s5228_s15  ;;  %4863 = vrot.lane.b32.xlu1 %v7512_v21, %s5228_s15 }
 0x3b4   : > { %4868 = vrot.lane.b32.xlu2 %v7564_v53, %s5228_s15 }
 0x3b5   : > { %v4649_v61 = vpop.permute.xlu0 %4648  ;;  %v4654_v22 = vpop.permute.xlu1 %4653 }
 0x3b6   : > { %v4651_v43 = vunpack.i.h.bf16 %v4649_v61  ;;  %v4650_v44 = vunpack.i.l.bf16 %v4649_v61  ;;  %v4704_v27 = vpop.permute.xlu2 %4703  ;;  %v4656_v38 = vunpack.i.h.bf16 %v4654_v22  ;;  %v4655_v45 = vunpack.i.l.bf16 %v4654_v22 }
 0x3b7   : > { %v4706_v36 = vunpack.i.h.bf16 %v4704_v27  ;;  %v4705_v2 = vunpack.i.l.bf16 %v4704_v27  ;;  %v4872_v22 = vpack.i.bf16 %v7795_v47, %v7799_v29 }
 0x3b8   : > { %v7941_v60 = vsel %vm1661_vm6, %v8938_v17, %v4651_v43  ;;  %v7945_v13 = vsel %vm1661_vm6, %v8939_v28, %v4650_v44  ;;  %v3301_v20 = vsel %vm1661_vm6, %v7754_v3, %v4656_v38  ;;  %v3300_v0 = vsel %vm1661_vm6, %v7757_v31, %v4655_v45  ;;  %v5162_v17 = vld [vmem:[#allocation3 + $0x30] sm:$0xff]  ;;  %v5163_v28 = vld [vmem:[#allocation3 + $0x38] sm:$0xff] }
 0x3b9   : > { %v7952_v62 = vsel %vm1661_vm6, %v3288_v14, %v4705_v2  ;;  %v7955_v61 = vsel %vm1661_vm6, %v3289_v51, %v4706_v36 }
 0x3bb   : > { %4873 = vrot.lane.b32.xlu0 %v4872_v22, %s5229_s16  ;;  %4878 = vrot.lane.b32.xlu1 %v7304_v63, %s5230_s17 }
 0x3bc   : > { %4883 = vrot.lane.b32.xlu2 %v8936_v39, %s5231_s18 }
 0x3bd   : > { %v4664_v3 = vpop.permute.xlu0 %4663  ;;  %v4669_v43 = vpop.permute.xlu1 %4668 }
 0x3be   : > { %v4666_v31 = vunpack.i.h.bf16 %v4664_v3  ;;  %v4665_v44 = vunpack.i.l.bf16 %v4664_v3  ;;  %v4719_v14 = vpop.permute.xlu2 %4718  ;;  %v4671_v27 = vunpack.i.h.bf16 %v4669_v43  ;;  %v4670_v38 = vunpack.i.l.bf16 %v4669_v43 }
 0x3bf   : > { %v4721_v51 = vunpack.i.h.bf16 %v4719_v14  ;;  %v4720_v45 = vunpack.i.l.bf16 %v4719_v14 }
 0x3c0   : > { %v7966_v47 = vsel %vm1661_vm6, %v7672_v7, %v4666_v31  ;;  %v7970_v29 = vsel %vm1661_vm6, %v7675_v48, %v4665_v44  ;;  %v3307_v63 = vsel %vm1661_vm6, %v7814_v37, %v4671_v27  ;;  %v3306_v39 = vsel %vm1661_vm6, %v7817_v54, %v4670_v38 }
 0x3c1   : > { %v7977_v36 = vsel %vm1694_vm8, %v3294_v57, %v4720_v45  ;;  %v7980_v2 = vsel %vm1694_vm8, %v3295_v11, %v4721_v51  ;;  %v4887_v7 = vpack.i.bf16 %v5163_v28, %v5162_v17  ;;  %v5164_v51 = vld [vmem:[#allocation3 + $0x108] sm:$0xff]  ;;  %v5165_v45 = vld [vmem:[#allocation3 + $0x110] sm:$0xff] }
 0x3c3   : > { %4888 = vrot.lane.b32.xlu0 %v4887_v7, %s5229_s16  ;;  %4893 = vrot.lane.b32.xlu1 %v7236_v59, %s5230_s17 }
 0x3c4   : > { %4898 = vrot.lane.b32.xlu2 %v8930_v5, %s5231_s18 }
 0x3c5   : > { %v4679_v48 = vpop.permute.xlu0 %4678  ;;  %v4684_v37 = vpop.permute.xlu1 %4683 }
 0x3c6   : > { %v4681_v54 = vunpack.i.h.bf16 %v4679_v48  ;;  %v4680_v22 = vunpack.i.l.bf16 %v4679_v48  ;;  %v4734_v57 = vpop.permute.xlu2 %4733  ;;  %v4686_v3 = vunpack.i.h.bf16 %v4684_v37  ;;  %v4685_v43 = vunpack.i.l.bf16 %v4684_v37 }
 0x3c7   : > { %v4736_v11 = vunpack.i.h.bf16 %v4734_v57  ;;  %v4735_v31 = vunpack.i.l.bf16 %v4734_v57 }
 0x3c8   : > { %v7989_v44 = vsel %vm1661_vm6, %v7866_v16, %v4680_v22  ;;  %v7993_v14 = vsel %vm1661_vm6, %v7869_v9, %v4681_v54  ;;  %v3313_v59 = vsel %vm1661_vm6, %v7848_v33, %v4686_v3  ;;  %v3312_v5 = vsel %vm1661_vm6, %v7851_v6, %v4685_v43  ;;  %v5166_v3 = vld [vmem:[#allocation3 + $0x50] sm:$0xff] }
 0x3c9   : > { %v8000_v27 = vsel %vm1694_vm8, %v3300_v0, %v4735_v31  ;;  %v8003_v38 = vsel %vm1694_vm8, %v3301_v20, %v4736_v11  ;;  %v4902_v16 = vpack.i.bf16 %v5165_v45, %v5164_v51  ;;  %v8940_v45 = vld [vmem:[#allocation42_spill] sm:$0xff] }
 0x3cb   : > { %4903 = vrot.lane.b32.xlu0 %v4902_v16, %s5229_s16  ;;  %4908 = vrot.lane.b32.xlu1 %v8924_v24, %s5230_s17 }
 0x3cc   : > { %4913 = vrot.lane.b32.xlu2 %v8937_v58, %s5231_s18 }
 0x3cd   : > { %v4694_v33 = vpop.permute.xlu0 %4693  ;;  %v4699_v9 = vpop.permute.xlu1 %4698 }
 0x3ce   : > { %v4696_v6 = vunpack.i.h.bf16 %v4694_v33  ;;  %v4695_v17 = vunpack.i.l.bf16 %v4694_v33  ;;  %v4749_v0 = vpop.permute.xlu2 %4748  ;;  %v4701_v28 = vunpack.i.h.bf16 %v4699_v9  ;;  %v4700_v7 = vunpack.i.l.bf16 %v4699_v9 }
 0x3cf   : > { %v4751_v20 = vunpack.i.h.bf16 %v4749_v0  ;;  %v4750_v48 = vunpack.i.l.bf16 %v4749_v0  ;;  %v8941_v0 = vld [vmem:[#allocation6_spill] sm:$0xff] }
 0x3d0   : > { %v8012_v37 = vsel %vm1661_vm6, %v7700_v1, %v4696_v6  ;;  %v8016_v54 = vsel %vm1661_vm6, %v7703_v12, %v4695_v17  ;;  %v3319_v24 = vsel %vm1661_vm6, %v7888_v55, %v4701_v28  ;;  %v3318_v58 = vsel %vm1661_vm6, %v7891_v34, %v4700_v7  ;;  %v5167_v6 = vld [vmem:[#allocation3 + $0x120] sm:$0xff]  ;;  %v5168_v17 = vld [vmem:[#allocation3 + $0x128] sm:$0xff] }
 0x3d1   : > { %v8023_v22 = vsel %vm1694_vm8, %v3306_v39, %v4750_v48  ;;  %v8026_v57 = vsel %vm1694_vm8, %v3307_v63, %v4751_v20  ;;  %v4917_v1 = vpack.i.bf16 %v5166_v3, %v7749_v4 }
 0x3d3   : > { %4918 = vrot.lane.b32.xlu0 %v4917_v1, %s5229_s16  ;;  %4923 = vrot.lane.b32.xlu1 %v7282_v18, %s5230_s17 }
 0x3d4   : > { %4928 = vrot.lane.b32.xlu2 %v8931_v46, %s5231_s18 }
 0x3d5   : > { %v4709_v12 = vpop.permute.xlu0 %4708  ;;  %v4714_v55 = vpop.permute.xlu1 %4713 }
 0x3d6   : > { %v4711_v34 = vunpack.i.h.bf16 %v4709_v12  ;;  %v4710_v43 = vunpack.i.l.bf16 %v4709_v12  ;;  %v4764_v39 = vpop.permute.xlu2 %4763  ;;  %v4716_v11 = vunpack.i.h.bf16 %v4714_v55  ;;  %v4715_v31 = vunpack.i.l.bf16 %v4714_v55 }
 0x3d7   : > { %v4766_v63 = vunpack.i.h.bf16 %v4764_v39  ;;  %v4765_v51 = vunpack.i.l.bf16 %v4764_v39  ;;  %v5169_v39 = vld [vmem:[#allocation3 + $0x60] sm:$0xff] }
 0x3d8   : > { %v8036_v4 = vsel %vm1661_vm6, %v7779_v26, %v4710_v43  ;;  %v8040_v16 = vsel %vm1661_vm6, %v8940_v45, %v4711_v34  ;;  %v3325_v18 = vsel %vm1661_vm6, %v7916_v30, %v4716_v11  ;;  %v3324_v46 = vsel %vm1661_vm6, %v7919_v8, %v4715_v31  ;;  %v5170_v11 = vld [vmem:[#allocation3 + $0x68] sm:$0xff]  ;;  %v8943_v31 = vld [vmem:[#allocation29_spill] sm:$0xff] }
 0x3d9   : > { %v8047_v33 = vsel %vm1694_vm8, %v3312_v5, %v4765_v51  ;;  %v8050_v9 = vsel %vm1694_vm8, %v3313_v59, %v4766_v63  ;;  %v4932_v26 = vpack.i.bf16 %v5168_v17, %v5167_v6 }
 0x3db   : > { %4933 = vrot.lane.b32.xlu0 %v4932_v26, %s5229_s16  ;;  %4938 = vrot.lane.b32.xlu1 %v8941_v0, %s5230_s17 }
 0x3dc   : > { %4943 = vrot.lane.b32.xlu2 %v7406_v23, %s5231_s18 }
 0x3dd   : > { %v4724_v30 = vpop.permute.xlu0 %4723  ;;  %v4729_v28 = vpop.permute.xlu1 %4728 }
 0x3de   : > { %v4726_v8 = vunpack.i.h.bf16 %v4724_v30  ;;  %v4725_v7 = vunpack.i.l.bf16 %v4724_v30  ;;  %v4779_v5 = vpop.permute.xlu2 %4778  ;;  %v4731_v20 = vunpack.i.h.bf16 %v4729_v28  ;;  %v4730_v48 = vunpack.i.l.bf16 %v4729_v28 }
 0x3df   : > { %v4781_v59 = vunpack.i.h.bf16 %v4779_v5  ;;  %v4780_v3 = vunpack.i.l.bf16 %v4779_v5  ;;  %v5171_v5 = vld [vmem:[#allocation3 + $0x138] sm:$0xff] }
 0x3e0   : > { %v8059_v1 = vsel %vm1694_vm8, %v7827_v41, %v4725_v7  ;;  %v8063_v12 = vsel %vm1694_vm8, %v7823_v10, %v4726_v8  ;;  %v3331_v23 = vsel %vm1694_vm8, %v7941_v60, %v4731_v20  ;;  %v3330_v55 = vsel %vm1694_vm8, %v7945_v13, %v4730_v48  ;;  %v8942_v10 = vld [vmem:[#allocation24_spill] sm:$0xff]  ;;  %v5172_v20 = vld [vmem:[#allocation3 + $0x140] sm:$0xff] }
 0x3e1   : > { %v8070_v34 = vsel %vm1694_vm8, %v3318_v58, %v4780_v3  ;;  %v8073_v43 = vsel %vm1694_vm8, %v3319_v24, %v4781_v59  ;;  %v4947_v41 = vpack.i.bf16 %v5170_v11, %v5169_v39 }
 0x3e3   : > { %4948 = vrot.lane.b32.xlu0 %v4947_v41, %s5229_s16  ;;  %4953 = vrot.lane.b32.xlu1 %v8942_v10, %s5230_s17  ;;  %v5173_v10 = vld [vmem:[#allocation3 + $0x78] sm:$0xff] }
 0x3e4   : > { %4958 = vrot.lane.b32.xlu2 %v8943_v31, %s5231_s18  ;;  %v5174_v31 = vld [vmem:[#allocation3 + $0x80] sm:$0xff] }
 0x3e5   : > { %v4739_v60 = vpop.permute.xlu0 %4738  ;;  %v4744_v63 = vpop.permute.xlu1 %4743 }
 0x3e6   : > { %v4741_v13 = vunpack.i.h.bf16 %v4739_v60  ;;  %v4740_v51 = vunpack.i.l.bf16 %v4739_v60  ;;  %v4794_v58 = vpop.permute.xlu2 %4793  ;;  %v4746_v45 = vunpack.i.h.bf16 %v4744_v63  ;;  %v4745_v6 = vunpack.i.l.bf16 %v4744_v63  ;;  %v8945_v63 = vld [vmem:[#allocation19_spill] sm:$0xff] }
 0x3e7   : > { %v4796_v24 = vunpack.i.h.bf16 %v4794_v58  ;;  %v4795_v17 = vunpack.i.l.bf16 %v4794_v58  ;;  %v4977_v60 = vpack.i.bf16 %v5174_v31, %v5173_v10 }
 0x3e8   : > { %v8082_v26 = vsel %vm1694_vm8, %v7863_v15, %v4740_v51  ;;  %v8086_v0 = vsel %vm1694_vm8, %v7859_v42, %v4741_v13  ;;  %v3337_v30 = vsel %vm1694_vm8, %v7966_v47, %v4746_v45  ;;  %v3336_v28 = vsel %vm1694_vm8, %v7970_v29, %v4745_v6  ;;  %v8944_v42 = vld [vmem:[#allocation54_spill] sm:$0xff] }
 0x3e9   : > { %v8093_v8 = vsel %vm1694_vm8, %v3324_v46, %v4795_v17  ;;  %v8096_v7 = vsel %vm1694_vm8, %v3325_v18, %v4796_v24  ;;  %v4962_v15 = vpack.i.bf16 %v5172_v20, %v5171_v5 }
 0x3eb   : > { %4963 = vrot.lane.b32.xlu0 %v4962_v15, %s5229_s16  ;;  %4968 = vrot.lane.b32.xlu1 %v8944_v42, %s5230_s17 }
 0x3ec   : > { %4973 = vrot.lane.b32.xlu2 %v7469_v32, %s5231_s18 }
 0x3ed   : > { %v4754_v47 = vpop.permute.xlu0 %4753  ;;  %v8103_v48 = vpop.permute.xlu1 %4758 }
 0x3ee   : > { %v4809_v29 = vpop.permute.xlu2 %4808  ;;  %v4756_v46 = vunpack.i.h.bf16 %v4754_v47  ;;  %v4755_v59 = vunpack.i.l.bf16 %v4754_v47 }
 0x3ef   : > { %v4811_v3 = vunpack.i.h.bf16 %v4809_v29  ;;  %v4810_v18 = vunpack.i.l.bf16 %v4809_v29  ;;  %v5176_v29 = vld [vmem:[#allocation3 + $0x158] sm:$0xff] }
 0x3f0   : > { %v8107_v39 = vsel %vm1694_vm8, %v7897_v35, %v4756_v46  ;;  %v8111_v11 = vsel %vm1694_vm8, %v7901_v56, %v4755_v59  ;;  %v8946_v35 = vld [vmem:[#allocation23_spill] sm:$0xff] }
 0x3f1   : > { %v8114_v41 = vsel %vm1727_vm10, %v3330_v55, %v4810_v18  ;;  %v8117_v32 = vsel %vm1727_vm10, %v3331_v23, %v4811_v3 }
 0x3f3   : > { %4978 = vrot.lane.b32.xlu0 %v4977_v60, %s5229_s16  ;;  %4983 = vrot.lane.b32.xlu1 %v8945_v63, %s5230_s17  ;;  %v5177_v63 = vld [vmem:[#allocation3 + $0x90] sm:$0xff] }
 0x3f4   : > { %4988 = vrot.lane.b32.xlu2 %v8946_v35, %s5231_s18  ;;  %v5178_v35 = vld [vmem:[#allocation3 + $0x98] sm:$0xff] }
 0x3f5   : > { %v4769_v13 = vpop.permute.xlu0 %4768  ;;  %v4774_v56 = vpop.permute.xlu1 %4773 }
 0x3f6   : > { %v4824_v51 = vpop.permute.xlu2 %4823  ;;  %v4771_v58 = vunpack.i.h.bf16 %v4769_v13  ;;  %v4770_v55 = vunpack.i.l.bf16 %v4769_v13  ;;  %v4776_v45 = vunpack.i.h.bf16 %v4774_v56  ;;  %v4775_v6 = vunpack.i.l.bf16 %v4774_v56  ;;  %v8948_v56 = vld [vmem:[#allocation25_spill] sm:$0xff] }
 0x3f7   : > { %v4826_v23 = vunpack.i.h.bf16 %v4824_v51  ;;  %v4825_v24 = vunpack.i.l.bf16 %v4824_v51  ;;  %v5007_v13 = vpack.i.bf16 %v5178_v35, %v5177_v63 }
 0x3f8   : > { %v8126_v17 = vsel %vm1694_vm8, %v7927_v25, %v4771_v58  ;;  %v8130_v5 = vsel %vm1694_vm8, %v7931_v52, %v4770_v55  ;;  %v8134_v20 = vsel %vm1694_vm8, %v8012_v37, %v4776_v45  ;;  %v8138_v15 = vsel %vm1694_vm8, %v8016_v54, %v4775_v6  ;;  %v5175_v25 = vld [vmem:[#allocation3 + $0x150] sm:$0xff]  ;;  %v8947_v52 = vld [vmem:[#allocation58_spill] sm:$0xff] }
 0x3f9   : > { %v8141_v42 = vsel %vm1727_vm10, %v3336_v28, %v4825_v24  ;;  %v8144_v47 = vsel %vm1727_vm10, %v3337_v30, %v4826_v23  ;;  %v4992_v46 = vpack.i.bf16 %v5176_v29, %v5175_v25  ;;  %v8950_v55 = vld [vmem:[#allocation36_spill] sm:$0xff] }
 0x3fa   : > { %v8951_v45 = vld [vmem:[#allocation8_spill] sm:$0xff] }
 0x3fb   : > { %4993 = vrot.lane.b32.xlu0 %v4992_v46, %s5229_s16  ;;  %4998 = vrot.lane.b32.xlu1 %v8947_v52, %s5230_s17 }
 0x3fc   : > { %5003 = vrot.lane.b32.xlu2 %v7512_v21, %s5231_s18 }
 0x3fd   : > { %v4784_v37 = vpop.permute.xlu0 %4783  ;;  %v4789_v54 = vpop.permute.xlu1 %4788 }
 0x3fe   : > { %v8151_v59 = vpop.permute.xlu2 %4838  ;;  %v4786_v28 = vunpack.i.h.bf16 %v4784_v37  ;;  %v4785_v3 = vunpack.i.l.bf16 %v4784_v37  ;;  %v4791_v18 = vunpack.i.h.bf16 %v4789_v54  ;;  %v4790_v30 = vunpack.i.l.bf16 %v4789_v54 }
 0x400   : > { %v8155_v10 = vsel %vm1694_vm8, %v7952_v62, %v4785_v3  ;;  %v8159_v31 = vsel %vm1694_vm8, %v7955_v61, %v4786_v28  ;;  %v3355_v60 = vsel %vm1694_vm8, %v8040_v16, %v4791_v18  ;;  %v3354_v21 = vsel %vm1694_vm8, %v8036_v4, %v4790_v30  ;;  %v8949_v62 = vld [vmem:[#allocation4_spill] sm:$0xff]  ;;  %v3506_v4 = vld [vmem:[%s8584_s2 + $0x10] sm:$0x3] }
 0x401   : > { %v3516_v16 = vunpack.c.l.b16 %v3506_v4 }
 0x403   : > { %5008 = vrot.lane.b32.xlu0 %v5007_v13, %s5229_s16  ;;  %5013 = vrot.lane.b32.xlu1 %v8948_v56, %s5230_s17  ;;  %v3519_v6 = vpack.c.b16 %v3516_v16, %v3516_v16  ;;  %v5180_v56 = vld [vmem:[#allocation3 + $0xb0] sm:$0xff] }
 0x404   : > { %5018 = vrot.lane.b32.xlu2 %v8949_v62, %s5231_s18 }
 0x405   : > { %v8170_v51 = vpop.permute.xlu0 %4798  ;;  %v8172_v61 = vpop.permute.xlu1 %4803  ;;  %v3571_v25 = vsel %vm1944_vm5, %v3519_v6, 0 }
 0x406   : > { %v8174_v58 = vpop.permute.xlu2 %4853  ;;  %3817 = vmatpush.bf16.msra.mxu3 %v3571_v25  ;;  %3578 = vmatpush.bf16.msra.mxu1 %v3571_v25 }
 0x40b   : > { %5023 = vrot.lane.b32.xlu0 %v8950_v55, %s5229_s16  ;;  %5028 = vrot.lane.b32.xlu1 %v8951_v45, %s5230_s17 }
 0x40c   : > { %5033 = vrot.lane.b32.xlu2 %v7564_v53, %s5231_s18 }
 0x40d   : > { %v4814_v23 = vpop.permute.xlu0 %4813  ;;  %v4819_v24 = vpop.permute.xlu1 %4818 }
 0x40e   : > { %v4869_v29 = vpop.permute.xlu2 %4868  ;;  %v4816_v46 = vunpack.i.h.bf16 %v4814_v23  ;;  %v4815_v52 = vunpack.i.l.bf16 %v4814_v23  ;;  %v4821_v37 = vunpack.i.h.bf16 %v4819_v24  ;;  %v4820_v54 = vunpack.i.l.bf16 %v4819_v24 }
 0x40f   : > { %v4871_v28 = vunpack.i.h.bf16 %v4869_v29  ;;  %v4870_v3 = vunpack.i.l.bf16 %v4869_v29  ;;  %v8954_v29 = vld [vmem:[#allocation9_spill] sm:$0xff] }
 0x410   : > { %v8188_v18 = vsel %vm1727_vm10, %v8000_v27, %v4815_v52  ;;  %v8192_v53 = vsel %vm1727_vm10, %v8003_v38, %v4816_v46  ;;  %v8196_v30 = vsel %vm1727_vm10, %v8086_v0, %v4821_v37  ;;  %v8200_v63 = vsel %vm1727_vm10, %v8082_v26, %v4820_v54  ;;  %v5179_v27 = vld [vmem:[#allocation3 + $0xa8] sm:$0xff]  ;;  %v3813_v38 = vld [vmem:[%s8584_s2 + $0x8] sm:$0xff]  ;;  %v3812_v26 = vld [vmem:[%s8584_s2] sm:$0xff] }
 0x411   : > { %v8203_v35 = vsel %vm1727_vm10, %v3354_v21, %v4870_v3  ;;  %v8206_v13 = vsel %vm1727_vm10, %v3355_v60, %v4871_v28  ;;  %v5037_v62 = vpack.i.bf16 %v5180_v56, %v5179_v27  ;;  %v8952_v0 = vld [vmem:[#allocation49_spill] sm:$0xff]  ;;  %3818 = vmatpush.bf16.msra.mxu3 %v3813_v38  ;;  %3579 = vmatpush.bf16.msra.mxu1 %v3813_v38  ;;  %v8956_v46 = vld [vmem:[#allocation27_spill] sm:$0xff]  ;;  %v2226_v37 = vld [vmem:[#allocation3 + $0x1a0] sm:$0xff] }
 0x412   : > { %v2227_v54 = vld [vmem:[#allocation3 + $0x1a8] sm:$0x3]  ;;  %v3029_v3 = vrot.slane %v2226_v37, 1  ;;  %v5181_v56 = vld [vmem:[#allocation3 + $0xc0] sm:$0xff] }
 0x413   : > { %5038 = vrot.lane.b32.xlu0 %v5037_v62, %s5229_s16  ;;  %5043 = vrot.lane.b32.xlu1 %v8952_v0, %s5230_s17  ;;  %v3031_v27 = vrot.slane %v2227_v54, 1  ;;  %v5182_v62 = vld [vmem:[#allocation3 + $0xc8] sm:$0xff] }
 0x414   : > { %5048 = vrot.lane.b32.xlu2 %v8935_v49, %s5231_s18  ;;  %v5067_v38 = vpack.i.bf16 %v5182_v62, %v5181_v56  ;;  %v8957_v0 = vld [vmem:[#allocation67_spill] sm:$0xff] }
 0x415   : > { %v4829_v60 = vpop.permute.xlu0 %4828  ;;  %v4834_v21 = vpop.permute.xlu1 %4833  ;;  %3819 = vmatpush.bf16.msra.mxu3 %v3812_v26  ;;  %3580 = vmatpush.bf16.msra.mxu1 %v3812_v26 }
 0x416   : > { %v8219_v4 = vpop.permute.xlu2 %4883  ;;  %v4831_v16 = vunpack.i.h.bf16 %v4829_v60  ;;  %v4830_v55 = vunpack.i.l.bf16 %v4829_v60  ;;  %v4836_v45 = vunpack.i.h.bf16 %v4834_v21  ;;  %v4835_v6 = vunpack.i.l.bf16 %v4834_v21 }
 0x417   : > { %v3032_v60 = vsel %vm640_vm3, %v3029_v3, %v3031_v27 }
 0x418   : > { %v8223_v23 = vsel %vm1727_vm10, %v8023_v22, %v4830_v55  ;;  %v8227_v49 = vsel %vm1727_vm10, %v8026_v57, %v4831_v16  ;;  %v8231_v24 = vsel %vm1727_vm10, %v8107_v39, %v4836_v45  ;;  %v8235_v25 = vsel %vm1727_vm10, %v8111_v11, %v4835_v6  ;;  %v8955_v22 = vld [vmem:[#allocation20_spill] sm:$0xff]  ;;  %v2225_v39 = vld [vmem:[#allocation3 + $0x198] sm:$0xff] }
 0x419   : > { %8953 = vst [vmem:[#allocation46_spill] sm:$0xff] %v8231_v24  ;;  %v3028_v28 = vrot.slane %v2225_v39, 1  ;;  %v5087_v55 = vpack.i.bf16 %v2226_v37, %v2225_v39  ;;  %v3130_v24 = vrot.slane %v2226_v37, 2  ;;  %v4760_v37 = vunpack.i.l.bf16 %v8103_v48 }
 0x41b   : > { %5053 = vrot.lane.b32.xlu0 %v8954_v29, %s5229_s16  ;;  %5058 = vrot.lane.b32.xlu1 %v8955_v22, %s5230_s17  ;;  %v3030_v26 = vsel %vm640_vm3, %v3028_v28, %v3029_v3 }
 0x41c   : > { %5063 = vrot.lane.b32.xlu2 %v8956_v46, %s5231_s18  ;;  %v5092_v62 = vpack.i.bf16 %v3032_v60, %v3030_v26 }
 0x41d   : > { %v8243_v57 = vpop.permute.xlu0 %4843  ;;  %v8245_v52 = vpop.permute.xlu1 %4848 }
 0x41e   : > { %v8247_v11 = vpop.permute.xlu2 %4898 }
 0x423   : > { %5068 = vrot.lane.b32.xlu0 %v5067_v38, %s5229_s16  ;;  %5073 = vrot.lane.b32.xlu1 %v8957_v0, %s5230_s17  ;;  %v3129_v38 = vrot.slane %v2225_v39, 2  ;;  %v3132_v0 = vrot.slane %v2227_v54, 2  ;;  %v4761_v39 = vunpack.i.h.bf16 %v8103_v48  ;;  %v4841_v54 = vunpack.i.h.bf16 %v8151_v59 }
 0x424   : > { %5078 = vrot.lane.b32.xlu2 %v7543_v50, %s5231_s18 }
 0x425   : > { %v4859_v21 = vpop.permute.xlu0 %4858  ;;  %v4864_v16 = vpop.permute.xlu1 %4863  ;;  %v3343_v48 = vsel %vm1694_vm8, %v7993_v14, %v4761_v39 }
 0x426   : > { %v8256_v45 = vpop.permute.xlu2 %4913  ;;  %v4861_v6 = vunpack.i.h.bf16 %v4859_v21  ;;  %v4860_v29 = vunpack.i.l.bf16 %v4859_v21  ;;  %v4866_v22 = vunpack.i.h.bf16 %v4864_v16  ;;  %v4865_v56 = vunpack.i.l.bf16 %v4864_v16 }
 0x428   : > { %v8260_v50 = vsel %vm1727_vm10, %v8070_v34, %v4860_v29  ;;  %v8264_v28 = vsel %vm1727_vm10, %v8073_v43, %v4861_v6  ;;  %v8268_v3 = vsel %vm1727_vm10, %v8155_v10, %v4865_v56  ;;  %v8272_v27 = vsel %vm1727_vm10, %v8159_v31, %v4866_v22 }
 0x429   : > { %v4840_v34 = vunpack.i.l.bf16 %v8151_v59  ;;  %v3131_v43 = vsel %vm817_vm4, %v3129_v38, %v3130_v24  ;;  %v3133_v10 = vsel %vm817_vm4, %v3130_v24, %v3132_v0  ;;  %v3342_v31 = vsel %vm1694_vm8, %v7989_v44, %v4760_v37  ;;  %v8958_v0 = vld [vmem:[#allocation69_spill] sm:$0xff] }
 0x42a   : > { %v3375_v6 = vsel %vm1727_vm10, %v3343_v48, %v4841_v54  ;;  %v5097_v29 = vpack.i.bf16 %v3133_v10, %v3131_v43  ;;  %v4886_v22 = vunpack.i.h.bf16 %v8219_v4  ;;  %v4885_v24 = vunpack.i.l.bf16 %v8219_v4  ;;  %v8959_v10 = vld [vmem:[#allocation31_spill] sm:$0xff] }
 0x42b   : > { %5083 = vrot.lane.b32.xlu0 %v8956_v46, %s5228_s15  ;;  %5088 = vrot.lane.b32.xlu1 %v5087_v55, %s5229_s16  ;;  %v3374_v55 = vsel %vm1727_vm10, %v3342_v31, %v4840_v34  ;;  %v5102_v39 = vpack.i.bf16 %v8958_v0, %v7839_v19  ;;  %v4801_v34 = vunpack.i.h.bf16 %v8170_v51  ;;  %v4800_v4 = vunpack.i.l.bf16 %v8170_v51 }
 0x42c   : > { %5093 = vrot.lane.b32.xlu2 %v5092_v62, %s5230_s17 }
 0x42d   : > { %v4874_v26 = vpop.permute.xlu0 %4873  ;;  %v4879_v60 = vpop.permute.xlu1 %4878  ;;  %v3359_v51 = vsel %vm1727_vm10, %v7980_v2, %v4801_v34  ;;  %v4846_v2 = vunpack.i.h.bf16 %v8243_v57 }
 0x42e   : > { %v4876_v59 = vunpack.i.h.bf16 %v4874_v26  ;;  %v4875_v21 = vunpack.i.l.bf16 %v4874_v26  ;;  %v4881_v16 = vunpack.i.h.bf16 %v4879_v60  ;;  %v4880_v46 = vunpack.i.l.bf16 %v4879_v60  ;;  %v8292_v56 = vpop.permute.xlu2 %4928 }
 0x430   : > { %v3406_v44 = vsel %vm1760_vm9, %v3374_v55, %v4875_v21  ;;  %v3407_v14 = vsel %vm1760_vm9, %v3375_v6, %v4876_v59  ;;  %v3358_v21 = vsel %vm1727_vm10, %v7977_v36, %v4800_v4  ;;  %v3377_v4 = vsel %vm1727_vm10, %v8050_v9, %v4846_v2 }
 0x431   : > { %v3438_v62 = vsel %vm1793_vm11, %v3406_v44, %v4880_v46  ;;  %v3439_v38 = vsel %vm1793_vm11, %v3407_v14, %v4881_v16  ;;  %v4901_v16 = vunpack.i.h.bf16 %v8247_v11  ;;  %v4900_v46 = vunpack.i.l.bf16 %v8247_v11 }
 0x432   : > { %v3470_v37 = vsel %vm1826_vm12, %v3438_v62, %v4885_v24  ;;  %v3471_v54 = vsel %vm1826_vm12, %v3439_v38, %v4886_v22  ;;  %v4845_v14 = vunpack.i.l.bf16 %v8243_v57  ;;  %v4916_v57 = vunpack.i.h.bf16 %v8256_v45 }
 0x433   : > { %5098 = vrot.lane.b32.xlu0 %v5097_v29, %s5231_s18  ;;  %5103 = vrot.lane.b32.xlu1 %v5102_v39, %s5229_s16  ;;  %v3494_v43 = vpack.c.bf16 %v3471_v54, %v3470_v37  ;;  %v4805_v9 = vunpack.i.l.bf16 %v8172_v61 }
 0x434   : > { %5108 = vrot.lane.b32.xlu2 %v8959_v10, %s5230_s17  ;;  %v3376_v34 = vsel %vm1727_vm10, %v8047_v33, %v4845_v14  ;;  %v4806_v33 = vunpack.i.h.bf16 %v8172_v61  ;;  %v4930_v61 = vunpack.i.l.bf16 %v8292_v56  ;;  %s8481_s17 = scalar_lea.vmem %s8589_s7, %s3808_s27 }
 0x435   : > { %v4889_v31 = vpop.permute.xlu0 %4888  ;;  %v4894_v48 = vpop.permute.xlu1 %4893  ;;  %3798 = vmatmul.msk.bf16.vlgmr.msra.gmra.mxu3 %vm1895_vm13, %v3494_v43  ;;  %v4915_v43 = vunpack.i.l.bf16 %v8256_v45 }
 0x436   : > { %v4891_v19 = vunpack.i.h.bf16 %v4889_v31  ;;  %v4890_v26 = vunpack.i.l.bf16 %v4889_v31  ;;  %v4896_v60 = vunpack.i.h.bf16 %v4894_v48  ;;  %v4895_v59 = vunpack.i.l.bf16 %v4894_v48  ;;  %v8319_v24 = vpop.permute.xlu2 %4943 }
 0x438   : > { %v3390_v55 = vsel %vm1760_vm9, %v3358_v21, %v4890_v26  ;;  %v3391_v6 = vsel %vm1760_vm9, %v3359_v51, %v4891_v19 }
 0x439   : > { %v3422_v29 = vsel %vm1793_vm11, %v3390_v55, %v4895_v59  ;;  %v3423_v22 = vsel %vm1793_vm11, %v3391_v6, %v4896_v60  ;;  %v3361_v6 = vsel %vm1727_vm10, %v8063_v12, %v4806_v33  ;;  %v4851_v12 = vunpack.i.h.bf16 %v8245_v52 }
 0x43a   : > { %v3454_v44 = vsel %vm1826_vm12, %v3422_v29, %v4900_v46  ;;  %v3455_v36 = vsel %vm1826_vm12, %v3423_v22, %v4901_v16  ;;  %v3360_v29 = vsel %vm1727_vm10, %v8059_v1, %v4805_v9  ;;  %v4931_v22 = vunpack.i.h.bf16 %v8292_v56 }
 0x43b   : > { %5113 = vrot.lane.b32.xlu0 %v7262_v40, %s5231_s18  ;;  %v3486_v11 = vpack.c.bf16 %v3455_v36, %v3454_v44  ;;  %v4850_v1 = vunpack.i.l.bf16 %v8245_v52  ;;  %v4945_v52 = vunpack.i.l.bf16 %v8319_v24 }
 0x43d   : > { %v4904_v62 = vpop.permute.xlu0 %4903  ;;  %v4909_v38 = vpop.permute.xlu1 %4908  ;;  %3790 = vmatmul.msk.bf16.vlgmr.msra.gmra.mxu1 %vm1895_vm13, %v3486_v11 }
 0x43e   : > { %v4906_v0 = vunpack.i.h.bf16 %v4904_v62  ;;  %v4905_v39 = vunpack.i.l.bf16 %v4904_v62  ;;  %v4911_v37 = vunpack.i.h.bf16 %v4909_v38  ;;  %v4910_v54 = vunpack.i.l.bf16 %v4909_v38  ;;  %v4959_v59 = vpop.permute.xlu2 %4958 }
 0x440   : > { %v3408_v40 = vsel %vm1760_vm9, %v3376_v34, %v4905_v39  ;;  %v3409_v10 = vsel %vm1760_vm9, %v3377_v4, %v4906_v0 }
 0x441   : > { %v3440_v31 = vsel %vm1793_vm11, %v3408_v40, %v4910_v54  ;;  %v3441_v48 = vsel %vm1793_vm11, %v3409_v10, %v4911_v37  ;;  %v4946_v40 = vunpack.i.h.bf16 %v8319_v24 }
 0x442   : > { %v3472_v19 = vsel %vm1826_vm12, %v3440_v31, %v4915_v43  ;;  %v3473_v26 = vsel %vm1826_vm12, %v3441_v48, %v4916_v57  ;;  %v3379_v57 = vsel %vm1727_vm10, %v8126_v17, %v4851_v12  ;;  %v3378_v43 = vsel %vm1727_vm10, %v8130_v5, %v4850_v1 }
 0x443   : > { %v3495_v60 = vpack.c.bf16 %v3473_v26, %v3472_v19 }
 0x445   : > { %v4919_v21 = vpop.permute.xlu0 %4918  ;;  %v4924_v45 = vpop.permute.xlu1 %4923  ;;  %3799 = vmatmul.msk.bf16.gmra.mxu3 %vm1895_vm13, %v3495_v60 }
 0x446   : > { %v4921_v51 = vunpack.i.h.bf16 %v4919_v21  ;;  %v4920_v16 = vunpack.i.l.bf16 %v4919_v21  ;;  %v4926_v46 = vunpack.i.h.bf16 %v4924_v45  ;;  %v4925_v55 = vunpack.i.l.bf16 %v4924_v45  ;;  %v4974_v56 = vpop.permute.xlu2 %4973 }
 0x448   : > { %v3392_v44 = vsel %vm1760_vm9, %v3360_v29, %v4920_v16  ;;  %v3393_v36 = vsel %vm1760_vm9, %v3361_v6, %v4921_v51  ;;  %v4961_v51 = vunpack.i.h.bf16 %v4959_v59  ;;  %v4960_v16 = vunpack.i.l.bf16 %v4959_v59 }
 0x449   : > { %v3424_v2 = vsel %vm1793_vm11, %v3392_v44, %v4925_v55  ;;  %v3425_v14 = vsel %vm1793_vm11, %v3393_v36, %v4926_v46  ;;  %v4856_v36 = vunpack.i.h.bf16 %v8174_v58 }
 0x44a   : > { %v3456_v11 = vsel %vm1826_vm12, %v3424_v2, %v4930_v61  ;;  %v3457_v62 = vsel %vm1826_vm12, %v3425_v14, %v4931_v22  ;;  %v4855_v2 = vunpack.i.l.bf16 %v8174_v58 }
 0x44b   : > { %v3487_v38 = vpack.c.bf16 %v3457_v62, %v3456_v11 }
 0x44c   : > { %v3380_v1 = vsel %vm1727_vm10, %v8138_v15, %v4855_v2 }
 0x44d   : > { %v4934_v0 = vpop.permute.xlu0 %4933  ;;  %v4939_v39 = vpop.permute.xlu1 %4938  ;;  %3791 = vmatmul.msk.bf16.gmra.mxu1 %vm1895_vm13, %v3487_v38  ;;  %v3381_v38 = vsel %vm1727_vm10, %v8134_v20, %v4856_v36 }
 0x44e   : > { %v4936_v37 = vunpack.i.h.bf16 %v4934_v0  ;;  %v4935_v54 = vunpack.i.l.bf16 %v4934_v0  ;;  %v4941_v34 = vunpack.i.h.bf16 %v4939_v39  ;;  %v4940_v4 = vunpack.i.l.bf16 %v4939_v39  ;;  %v4989_v46 = vpop.permute.xlu2 %4988 }
 0x44f   : > { %v4976_v0 = vunpack.i.h.bf16 %v4974_v56  ;;  %v4975_v39 = vunpack.i.l.bf16 %v4974_v56 }
 0x450   : > { %v3410_v10 = vsel %vm1760_vm9, %v3378_v43, %v4935_v54  ;;  %v3411_v31 = vsel %vm1760_vm9, %v3379_v57, %v4936_v37 }
 0x451   : > { %v3442_v48 = vsel %vm1793_vm11, %v3410_v10, %v4940_v4  ;;  %v3443_v19 = vsel %vm1793_vm11, %v3411_v31, %v4941_v34 }
 0x452   : > { %v3474_v26 = vsel %vm1826_vm12, %v3442_v48, %v4945_v52  ;;  %v3475_v33 = vsel %vm1826_vm12, %v3443_v19, %v4946_v40  ;;  %v4991_v48 = vunpack.i.h.bf16 %v4989_v46  ;;  %v4990_v19 = vunpack.i.l.bf16 %v4989_v46 }
 0x453   : > { %v3496_v17 = vpack.c.bf16 %v3475_v33, %v3474_v26 }
 0x455   : > { %v4949_v9 = vpop.permute.xlu0 %4948  ;;  %v4954_v60 = vpop.permute.xlu1 %4953  ;;  %3800 = vmatmul.msk.bf16.gmra.mxu3 %vm1895_vm13, %v3496_v17 }
 0x456   : > { %v4951_v5 = vunpack.i.h.bf16 %v4949_v9  ;;  %v4950_v21 = vunpack.i.l.bf16 %v4949_v9  ;;  %v4956_v24 = vunpack.i.h.bf16 %v4954_v60  ;;  %v4955_v45 = vunpack.i.l.bf16 %v4954_v60  ;;  %v5004_v4 = vpop.permute.xlu2 %5003 }
 0x458   : > { %v3394_v55 = vsel %vm1760_vm9, %v8114_v41, %v4950_v21  ;;  %v3395_v6 = vsel %vm1760_vm9, %v8117_v32, %v4951_v5 }
 0x459   : > { %v3426_v29 = vsel %vm1793_vm11, %v3394_v55, %v4955_v45  ;;  %v3427_v22 = vsel %vm1793_vm11, %v3395_v6, %v4956_v24  ;;  %v5006_v6 = vunpack.i.h.bf16 %v5004_v4 }
 0x45a   : > { %v3458_v61 = vsel %vm1826_vm12, %v3426_v29, %v4960_v16  ;;  %v3459_v44 = vsel %vm1826_vm12, %v3427_v22, %v4961_v51 }
 0x45b   : > { %v3488_v59 = vpack.c.bf16 %v3459_v44, %v3458_v61 }
 0x45d   : > { %v4964_v14 = vpop.permute.xlu0 %4963  ;;  %v4969_v11 = vpop.permute.xlu1 %4968  ;;  %3792 = vmatmul.msk.bf16.gmra.mxu1 %vm1895_vm13, %v3488_v59 }
 0x45e   : > { %v4966_v41 = vunpack.i.h.bf16 %v4964_v14  ;;  %v4965_v62 = vunpack.i.l.bf16 %v4964_v14  ;;  %v4971_v32 = vunpack.i.h.bf16 %v4969_v11  ;;  %v4970_v12 = vunpack.i.l.bf16 %v4969_v11  ;;  %v5019_v24 = vpop.permute.xlu2 %5018 }
 0x460   : > { %v3412_v37 = vsel %vm1760_vm9, %v3380_v1, %v4965_v62  ;;  %v3413_v58 = vsel %vm1760_vm9, %v3381_v38, %v4966_v41  ;;  %v5021_v1 = vunpack.i.h.bf16 %v5019_v24 }
 0x461   : > { %v3444_v54 = vsel %vm1793_vm11, %v3412_v37, %v4970_v12  ;;  %v3445_v34 = vsel %vm1793_vm11, %v3413_v58, %v4971_v32 }
 0x462   : > { %v3476_v57 = vsel %vm1826_vm12, %v3444_v54, %v4975_v39  ;;  %v3477_v43 = vsel %vm1826_vm12, %v3445_v34, %v4976_v0 }
 0x463   : > { %v3497_v40 = vpack.c.bf16 %v3477_v43, %v3476_v57 }
 0x465   : > { %v4979_v15 = vpop.permute.xlu0 %4978  ;;  %v4984_v52 = vpop.permute.xlu1 %4983  ;;  %3801 = vmatmul.msk.bf16.gmra.mxu3 %vm1895_vm13, %v3497_v40 }
 0x466   : > { %v4981_v20 = vunpack.i.h.bf16 %v4979_v15  ;;  %v4980_v56 = vunpack.i.l.bf16 %v4979_v15  ;;  %v4986_v10 = vunpack.i.h.bf16 %v4984_v52  ;;  %v4985_v31 = vunpack.i.l.bf16 %v4984_v52  ;;  %v5034_v41 = vpop.permute.xlu2 %5033 }
 0x467   : > { %v5036_v52 = vunpack.i.h.bf16 %v5034_v41 }
 0x468   : > { %v3396_v26 = vsel %vm1760_vm9, %v8188_v18, %v4980_v56  ;;  %v3397_v33 = vsel %vm1760_vm9, %v8192_v53, %v4981_v20  ;;  %v5005_v53 = vunpack.i.l.bf16 %v5004_v4  ;;  %v5035_v20 = vunpack.i.l.bf16 %v5034_v41 }
 0x469   : > { %v3428_v17 = vsel %vm1793_vm11, %v3396_v26, %v4985_v31  ;;  %v3429_v9 = vsel %vm1793_vm11, %v3397_v33, %v4986_v10 }
 0x46a   : > { %v3460_v60 = vsel %vm1826_vm12, %v3428_v17, %v4990_v19  ;;  %v3461_v5 = vsel %vm1826_vm12, %v3429_v9, %v4991_v48 }
 0x46b   : > { %v3489_v21 = vpack.c.bf16 %v3461_v5, %v3460_v60 }
 0x46d   : > { %v4994_v45 = vpop.permute.xlu0 %4993  ;;  %v4999_v51 = vpop.permute.xlu1 %4998  ;;  %3793 = vmatmul.msk.bf16.gmra.mxu1 %vm1895_vm13, %v3489_v21 }
 0x46e   : > { %v4996_v16 = vunpack.i.h.bf16 %v4994_v45  ;;  %v4995_v46 = vunpack.i.l.bf16 %v4994_v45  ;;  %v5001_v18 = vunpack.i.h.bf16 %v4999_v51  ;;  %v5000_v55 = vunpack.i.l.bf16 %v4999_v51 }
 0x470   : > { %v3414_v29 = vsel %vm1760_vm9, %v8260_v50, %v4995_v46  ;;  %v3415_v22 = vsel %vm1760_vm9, %v8264_v28, %v4996_v16  ;;  %v5020_v28 = vunpack.i.l.bf16 %v5019_v24 }
 0x471   : > { %v3446_v61 = vsel %vm1793_vm11, %v3414_v29, %v5000_v55  ;;  %v3447_v44 = vsel %vm1793_vm11, %v3415_v22, %v5001_v18 }
 0x472   : > { %v3478_v36 = vsel %vm1826_vm12, %v3446_v61, %v5005_v53  ;;  %v3479_v2 = vsel %vm1826_vm12, %v3447_v44, %v5006_v6 }
 0x473   : > { %v3498_v59 = vpack.c.bf16 %v3479_v2, %v3478_v36 }
 0x475   : > { %v5009_v14 = vpop.permute.xlu0 %5008  ;;  %v5014_v11 = vpop.permute.xlu1 %5013  ;;  %3802 = vmatmul.msk.bf16.gmra.mxu3 %vm1895_vm13, %v3498_v59 }
 0x476   : > { %v5011_v62 = vunpack.i.h.bf16 %v5009_v14  ;;  %v5010_v32 = vunpack.i.l.bf16 %v5009_v14  ;;  %v5016_v50 = vunpack.i.h.bf16 %v5014_v11  ;;  %v5015_v12 = vunpack.i.l.bf16 %v5014_v11 }
 0x478   : > { %v3398_v38 = vsel %vm1760_vm9, %v8200_v63, %v5010_v32  ;;  %v3399_v0 = vsel %vm1760_vm9, %v8196_v30, %v5011_v62  ;;  %v5049_v30 = vpop.permute.xlu2 %5048 }
 0x479   : > { %v3430_v39 = vsel %vm1793_vm11, %v3398_v38, %v5015_v12  ;;  %v3431_v37 = vsel %vm1793_vm11, %v3399_v0, %v5016_v50  ;;  %v5051_v24 = vunpack.i.h.bf16 %v5049_v30  ;;  %v5050_v45 = vunpack.i.l.bf16 %v5049_v30 }
 0x47a   : > { %v3462_v58 = vsel %vm1826_vm12, %v3430_v39, %v5020_v28  ;;  %v3463_v54 = vsel %vm1826_vm12, %v3431_v37, %v5021_v1 }
 0x47b   : > { %v3490_v34 = vpack.c.bf16 %v3463_v54, %v3462_v58 }
 0x47d   : > { %v5024_v4 = vpop.permute.xlu0 %5023  ;;  %v5029_v57 = vpop.permute.xlu1 %5028  ;;  %3794 = vmatmul.msk.bf16.gmra.mxu1 %vm1895_vm13, %v3490_v34 }
 0x47e   : > { %v5026_v43 = vunpack.i.h.bf16 %v5024_v4  ;;  %v5025_v40 = vunpack.i.l.bf16 %v5024_v4  ;;  %v5031_v15 = vunpack.i.h.bf16 %v5029_v57  ;;  %v5030_v63 = vunpack.i.l.bf16 %v5029_v57 }
 0x480   : > { %v3416_v56 = vsel %vm1760_vm9, %v8268_v3, %v5025_v40  ;;  %v3417_v10 = vsel %vm1760_vm9, %v8272_v27, %v5026_v43  ;;  %v5064_v18 = vpop.permute.xlu2 %5063 }
 0x481   : > { %v3448_v31 = vsel %vm1793_vm11, %v3416_v56, %v5030_v63  ;;  %v3449_v48 = vsel %vm1793_vm11, %v3417_v10, %v5031_v15  ;;  %v5066_v2 = vunpack.i.h.bf16 %v5064_v18 }
 0x482   : > { %v3480_v19 = vsel %vm1826_vm12, %v3448_v31, %v5035_v20  ;;  %v3481_v26 = vsel %vm1826_vm12, %v3449_v48, %v5036_v52 }
 0x483   : > { %v3499_v33 = vpack.c.bf16 %v3481_v26, %v3480_v19 }
 0x485   : > { %v5039_v17 = vpop.permute.xlu0 %5038  ;;  %v5044_v9 = vpop.permute.xlu1 %5043  ;;  %3803 = vmatmul.msk.bf16.gmra.mxu3 %vm1895_vm13, %v3499_v33 }
 0x486   : > { %v5041_v60 = vunpack.i.h.bf16 %v5039_v17  ;;  %v5040_v5 = vunpack.i.l.bf16 %v5039_v17  ;;  %v5046_v21 = vunpack.i.h.bf16 %v5044_v9  ;;  %v5045_v3 = vunpack.i.l.bf16 %v5044_v9 }
 0x488   : > { %v3400_v27 = vsel %vm1760_vm9, %v8141_v42, %v5040_v5  ;;  %v3401_v51 = vsel %vm1760_vm9, %v8144_v47, %v5041_v60  ;;  %v5065_v47 = vunpack.i.l.bf16 %v5064_v18  ;;  %v5079_v12 = vpop.permute.xlu2 %5078 }
 0x489   : > { %v3432_v16 = vsel %vm1793_vm11, %v3400_v27, %v5045_v3  ;;  %v3433_v46 = vsel %vm1793_vm11, %v3401_v51, %v5046_v21  ;;  %v5081_v37 = vunpack.i.h.bf16 %v5079_v12 }
 0x48a   : > { %v3464_v55 = vsel %vm1826_vm12, %v3432_v16, %v5050_v45  ;;  %v3465_v6 = vsel %vm1826_vm12, %v3433_v46, %v5051_v24  ;;  %v8960_v16 = vld [vmem:[#allocation46_spill] sm:$0xff] }
 0x48b   : > { %v3491_v53 = vpack.c.bf16 %v3465_v6, %v3464_v55 }
 0x48d   : > { %v5054_v29 = vpop.permute.xlu0 %5053  ;;  %v5059_v22 = vpop.permute.xlu1 %5058  ;;  %3795 = vmatmul.msk.bf16.gmra.mxu1 %vm1895_vm13, %v3491_v53 }
 0x48e   : > { %v5056_v61 = vunpack.i.h.bf16 %v5054_v29  ;;  %v5055_v44 = vunpack.i.l.bf16 %v5054_v29  ;;  %v5061_v42 = vunpack.i.h.bf16 %v5059_v22  ;;  %v5060_v36 = vunpack.i.l.bf16 %v5059_v22 }
 0x490   : > { %v3418_v59 = vsel %vm1760_vm9, %v8203_v35, %v5055_v44  ;;  %v3419_v14 = vsel %vm1760_vm9, %v8206_v13, %v5056_v61  ;;  %v5080_v13 = vunpack.i.l.bf16 %v5079_v12  ;;  %v5094_v30 = vpop.permute.xlu2 %5093  ;;  %v5186_v12 = vld [vmem:[%s5426_s30 + $0x8] sm:$0xff] }
 0x491   : > { %v3450_v11 = vsel %vm1793_vm11, %v3418_v59, %v5060_v36  ;;  %v3451_v41 = vsel %vm1793_vm11, %v3419_v14, %v5061_v42  ;;  %v5096_v31 = vunpack.i.h.bf16 %v5094_v30  ;;  %v5095_v48 = vunpack.i.l.bf16 %v5094_v30  ;;  %v5184_v14 = vld [vmem:[%s5426_s30] sm:$0xff] }
 0x492   : > { %v3482_v62 = vsel %vm1826_vm12, %v3450_v11, %v5065_v47  ;;  %v3483_v32 = vsel %vm1826_vm12, %v3451_v41, %v5066_v2  ;;  %v5183_v2 = vld [vmem:[%s5426_s30 + $0x80] sm:$0xff] }
 0x493   : > { %v3500_v50 = vpack.c.bf16 %v3483_v32, %v3482_v62  ;;  %v5185_v62 = vld [vmem:[%s5426_s30 + $0x88] sm:$0xff] }
 0x495   : > { %v5069_v1 = vpop.permute.xlu0 %5068  ;;  %v5074_v28 = vpop.permute.xlu1 %5073  ;;  %3804 = vmatmul.msk.bf16.gmra.mxu3 %vm1895_vm13, %v3500_v50 }
 0x496   : > { %v5071_v38 = vunpack.i.h.bf16 %v5069_v1  ;;  %v5070_v0 = vunpack.i.l.bf16 %v5069_v1  ;;  %v5076_v35 = vunpack.i.h.bf16 %v5074_v28  ;;  %v5075_v39 = vunpack.i.l.bf16 %v5074_v28 }
 0x498   : > { %v3402_v58 = vsel %vm1760_vm9, %v8223_v23, %v5070_v0  ;;  %v3403_v54 = vsel %vm1760_vm9, %v8227_v49, %v5071_v38  ;;  %v5109_v27 = vpop.permute.xlu2 %5108  ;;  %v5187_v38 = vld [vmem:[%s5426_s30 + $0x90] sm:$0xff] }
 0x499   : > { %v3434_v34 = vsel %vm1793_vm11, %v3402_v58, %v5075_v39  ;;  %v3435_v4 = vsel %vm1793_vm11, %v3403_v54, %v5076_v35  ;;  %v5111_v18 = vunpack.i.h.bf16 %v5109_v27  ;;  %v5110_v55 = vunpack.i.l.bf16 %v5109_v27  ;;  %v5188_v39 = vld [vmem:[%s5426_s30 + $0x10] sm:$0xff]  ;;  %v5189_v58 = vld [vmem:[%s5426_s30 + $0x98] sm:$0xff] }
 0x49a   : > { %v3466_v57 = vsel %vm1826_vm12, %v3434_v34, %v5080_v13  ;;  %v3467_v43 = vsel %vm1826_vm12, %v3435_v4, %v5081_v37  ;;  %v5190_v4 = vld [vmem:[%s5426_s30 + $0x18] sm:$0xff] }
 0x49b   : > { %v3492_v40 = vpack.c.bf16 %v3467_v43, %v3466_v57 }
 0x49d   : > { %v5084_v15 = vpop.permute.xlu0 %5083  ;;  %v5089_v63 = vpop.permute.xlu1 %5088  ;;  %3796 = vmatmul.msk.bf16.gmra.mxu1 %vm1895_vm13, %v3492_v40  ;;  %v5191_v40 = vld [vmem:[%s5426_s30 + $0xa0] sm:$0xff] }
 0x49e   : > { %v5086_v52 = vunpack.i.h.bf16 %v5084_v15  ;;  %v5085_v20 = vunpack.i.l.bf16 %v5084_v15  ;;  %v5091_v23 = vunpack.i.h.bf16 %v5089_v63  ;;  %v5090_v56 = vunpack.i.l.bf16 %v5089_v63 }
 0x4a0   : > { %v3388_v49 = vsel %vm1727_vm10, %v8093_v8, %v5085_v20  ;;  %v3389_v10 = vsel %vm1727_vm10, %v8096_v7, %v5086_v52  ;;  %v5192_v52 = vld [vmem:[%s5426_s30 + $0x20] sm:$0xff] }
 0x4a1   : > { %v3420_v19 = vsel %vm1760_vm9, %v3388_v49, %v5090_v56  ;;  %v3421_v26 = vsel %vm1760_vm9, %v3389_v10, %v5091_v23  ;;  %v5193_v23 = vld [vmem:[%s5426_s30 + $0xa8] sm:$0xff] }
 0x4a2   : > { %v3452_v5 = vsel %vm1793_vm11, %v3420_v19, %v5095_v48  ;;  %v3453_v21 = vsel %vm1793_vm11, %v3421_v26, %v5096_v31  ;;  %v5194_v10 = vld [vmem:[%s5426_s30 + $0x28] sm:$0xff]  ;;  %v5195_v19 = vld [vmem:[%s5426_s30 + $0xb0] sm:$0xff] }
 0x4a5   : > { %v5099_v33 = vpop.permute.xlu0 %5098  ;;  %v5104_v17 = vpop.permute.xlu1 %5103 }
 0x4a6   : > { %v5101_v9 = vunpack.i.h.bf16 %v5099_v33  ;;  %v5100_v60 = vunpack.i.l.bf16 %v5099_v33  ;;  %v5106_v3 = vunpack.i.h.bf16 %v5104_v17  ;;  %v5105_v24 = vunpack.i.l.bf16 %v5104_v17  ;;  %v5196_v17 = vld [vmem:[%s5426_s30 + $0x30] sm:$0xff] }
 0x4a8   : > { %v3484_v8 = vsel %vm1826_vm12, %v3452_v5, %v5100_v60  ;;  %v3485_v7 = vsel %vm1826_vm12, %v3453_v21, %v5101_v9  ;;  %v3404_v51 = vsel %vm1760_vm9, %v8235_v25, %v5105_v24  ;;  %v3405_v46 = vsel %vm1760_vm9, %v8960_v16, %v5106_v3  ;;  %v5197_v5 = vld [vmem:[%s5426_s30 + $0xb8] sm:$0xff]  ;;  %v5200_v16 = vld [vmem:[%s5426_s30 + $0x40] sm:$0xff] }
 0x4a9   : > { %v3501_v45 = vpack.c.bf16 %v3485_v7, %v3484_v8  ;;  %v3436_v22 = vsel %vm1793_vm11, %v3404_v51, %v5110_v55  ;;  %v3437_v61 = vsel %vm1793_vm11, %v3405_v46, %v5111_v18  ;;  %v5198_v24 = vld [vmem:[%s5426_s30 + $0x38] sm:$0xff]  ;;  %v5201_v55 = vld [vmem:[%s5426_s30 + $0xc8] sm:$0xff] }
 0x4ab   : > { %3805 = vmatmul.msk.bf16.gmra.mxu3 %vm1895_vm13, %v3501_v45  ;;  %v5199_v45 = vld [vmem:[%s5426_s30 + $0xc0] sm:$0xff] }
 0x4ad   : > { %v5114_v6 = vpop.permute.xlu0 %5113 }
 0x4ae   : > { %v5116_v53 = vunpack.i.h.bf16 %v5114_v6  ;;  %v5115_v29 = vunpack.i.l.bf16 %v5114_v6 }
 0x4b0   : > { %v3468_v44 = vsel %vm1826_vm12, %v3436_v22, %v5115_v29  ;;  %v3469_v42 = vsel %vm1826_vm12, %v3437_v61, %v5116_v53  ;;  %v5202_v29 = vld [vmem:[%s5426_s30 + $0x48] sm:$0xff] }
 0x4b1   : > { %v3493_v36 = vpack.c.bf16 %v3469_v42, %v3468_v44  ;;  %v5203_v44 = vld [vmem:[%s5426_s30 + $0xd0] sm:$0xff] }
 0x4b3   : > { %3797 = vmatmul.msk.bf16.gmra.mxu1 %vm1895_vm13, %v3493_v36 }
 0x4b8   : > { %v3622_v25 = vpop.f32.mrf.mxu3 }
 0x4b9   : > { %v3623_v47 = vadd.f32 %v5183_v2, %v3622_v25  ;;  %v5204_v25 = vld [vmem:[%s5426_s30 + $0x50] sm:$0xff] }
 0x4ba   : > { %v3582_v59 = vpop.f32.mrf.mxu1 }
 0x4bb   : > { %3678 = vst.msk [vmem:[%s8481_s17 + $0x80] sm:$0xff] %vm280_vm0, %v3623_v47  ;;  %v3583_v11 = vadd.f32 %v5184_v14, %v3582_v59  ;;  %v5205_v59 = vld [vmem:[%s5426_s30 + $0xd8] sm:$0xff] }
 0x4bd   : > { %3662 = vst.msk [vmem:[%s8481_s17] sm:$0xff] %vm280_vm0, %v3583_v11 }
 0x4c0   : > { %v3624_v41 = vpop.f32.mrf.mxu3 }
 0x4c1   : > { %v3625_v32 = vadd.f32 %v5185_v62, %v3624_v41  ;;  %v5206_v41 = vld [vmem:[%s5426_s30 + $0x58] sm:$0xff] }
 0x4c2   : > { %v3584_v50 = vpop.f32.mrf.mxu1 }
 0x4c3   : > { %3679 = vst.msk [vmem:[%s8481_s17 + $0x88] sm:$0xff] %vm280_vm0, %v3625_v32  ;;  %v3585_v1 = vadd.f32 %v5186_v12, %v3584_v50  ;;  %v5207_v50 = vld [vmem:[%s5426_s30 + $0xe0] sm:$0xff] }
 0x4c5   : > { %3663 = vst.msk [vmem:[%s8481_s17 + $0x8] sm:$0xff] %vm280_vm0, %v3585_v1 }
 0x4c8   : > { %v3627_v28 = vpop.f32.mrf.mxu3 }
 0x4c9   : > { %v3628_v0 = vadd.f32 %v5187_v38, %v3627_v28  ;;  %v5208_v28 = vld [vmem:[%s5426_s30 + $0x60] sm:$0xff] }
 0x4ca   : > { %v3587_v35 = vpop.f32.mrf.mxu1 }
 0x4cb   : > { %3680 = vst.msk [vmem:[%s8481_s17 + $0x90] sm:$0xff] %vm280_vm0, %v3628_v0  ;;  %v3588_v37 = vadd.f32 %v5188_v39, %v3587_v35  ;;  %v5209_v35 = vld [vmem:[%s5426_s30 + $0xe8] sm:$0xff] }
 0x4cd   : > { %3664 = vst.msk [vmem:[%s8481_s17 + $0x10] sm:$0xff] %vm280_vm0, %v3588_v37 }
 0x4d0   : > { %v3629_v13 = vpop.f32.mrf.mxu3 }
 0x4d1   : > { %v3630_v54 = vadd.f32 %v5189_v58, %v3629_v13  ;;  %v5210_v13 = vld [vmem:[%s5426_s30 + $0x68] sm:$0xff] }
 0x4d2   : > { %v3589_v34 = vpop.f32.mrf.mxu1 }
 0x4d3   : > { %3681 = vst.msk [vmem:[%s8481_s17 + $0x98] sm:$0xff] %vm280_vm0, %v3630_v54  ;;  %v3590_v57 = vadd.f32 %v5190_v4, %v3589_v34  ;;  %v5211_v34 = vld [vmem:[%s5426_s30 + $0xf0] sm:$0xff] }
 0x4d5   : > { %3665 = vst.msk [vmem:[%s8481_s17 + $0x18] sm:$0xff] %vm280_vm0, %v3590_v57 }
 0x4d8   : > { %v3632_v43 = vpop.f32.mrf.mxu3 }
 0x4d9   : > { %v3633_v15 = vadd.f32 %v5191_v40, %v3632_v43  ;;  %v5212_v43 = vld [vmem:[%s5426_s30 + $0x70] sm:$0xff] }
 0x4da   : > { %v3592_v63 = vpop.f32.mrf.mxu1 }
 0x4db   : > { %3682 = vst.msk [vmem:[%s8481_s17 + $0xa0] sm:$0xff] %vm280_vm0, %v3633_v15  ;;  %v3593_v20 = vadd.f32 %v5192_v52, %v3592_v63  ;;  %v5213_v63 = vld [vmem:[%s5426_s30 + $0xf8] sm:$0xff] }
 0x4dd   : > { %3666 = vst.msk [vmem:[%s8481_s17 + $0x20] sm:$0xff] %vm280_vm0, %v3593_v20 }
 0x4e0   : > { %v3634_v30 = vpop.f32.mrf.mxu3 }
 0x4e1   : > { %v3635_v56 = vadd.f32 %v5193_v23, %v3634_v30  ;;  %v5214_v30 = vld [vmem:[%s5426_s30 + $0x78] sm:$0xff] }
 0x4e2   : > { %v3594_v49 = vpop.f32.mrf.mxu1 }
 0x4e3   : > { %3683 = vst.msk [vmem:[%s8481_s17 + $0xa8] sm:$0xff] %vm280_vm0, %v3635_v56  ;;  %v3595_v31 = vadd.f32 %v5194_v10, %v3594_v49 }
 0x4e5   : > { %3667 = vst.msk [vmem:[%s8481_s17 + $0x28] sm:$0xff] %vm280_vm0, %v3595_v31 }
 0x4e8   : > { %v3637_v48 = vpop.f32.mrf.mxu3 }
 0x4e9   : > { %v3638_v26 = vadd.f32 %v5195_v19, %v3637_v48 }
 0x4ea   : > { %v3597_v33 = vpop.f32.mrf.mxu1 }
 0x4eb   : > { %3684 = vst.msk [vmem:[%s8481_s17 + $0xb0] sm:$0xff] %vm280_vm0, %v3638_v26  ;;  %v3598_v9 = vadd.f32 %v5196_v17, %v3597_v33 }
 0x4ed   : > { %3668 = vst.msk [vmem:[%s8481_s17 + $0x30] sm:$0xff] %vm280_vm0, %v3598_v9 }
 0x4f0   : > { %v3639_v60 = vpop.f32.mrf.mxu3 }
 0x4f1   : > { %v3640_v21 = vadd.f32 %v5197_v5, %v3639_v60 }
 0x4f2   : > { %v3599_v3 = vpop.f32.mrf.mxu1 }
 0x4f3   : > { %3685 = vst.msk [vmem:[%s8481_s17 + $0xb8] sm:$0xff] %vm280_vm0, %v3640_v21  ;;  %v3600_v8 = vadd.f32 %v5198_v24, %v3599_v3 }
 0x4f5   : > { %3669 = vst.msk [vmem:[%s8481_s17 + $0x38] sm:$0xff] %vm280_vm0, %v3600_v8 }
 0x4f8   : > { %v3642_v7 = vpop.f32.mrf.mxu3 }
 0x4f9   : > { %v3643_v27 = vadd.f32 %v5199_v45, %v3642_v7 }
 0x4fa   : > { %v3602_v51 = vpop.f32.mrf.mxu1 }
 0x4fb   : > { %3686 = vst.msk [vmem:[%s8481_s17 + $0xc0] sm:$0xff] %vm280_vm0, %v3643_v27  ;;  %v3603_v46 = vadd.f32 %v5200_v16, %v3602_v51 }
 0x4fd   : > { %3670 = vst.msk [vmem:[%s8481_s17 + $0x40] sm:$0xff] %vm280_vm0, %v3603_v46 }
 0x500   : > { %v3644_v18 = vpop.f32.mrf.mxu3 }
 0x501   : > { %v3645_v6 = vadd.f32 %v5201_v55, %v3644_v18 }
 0x502   : > { %v3604_v53 = vpop.f32.mrf.mxu1 }
 0x503   : > { %3687 = vst.msk [vmem:[%s8481_s17 + $0xc8] sm:$0xff] %vm280_vm0, %v3645_v6  ;;  %v3605_v22 = vadd.f32 %v5202_v29, %v3604_v53 }
 0x505   : > { %3671 = vst.msk [vmem:[%s8481_s17 + $0x48] sm:$0xff] %vm280_vm0, %v3605_v22 }
 0x508   : > { %v3647_v61 = vpop.f32.mrf.mxu3 }
 0x509   : > { %v3648_v42 = vadd.f32 %v5203_v44, %v3647_v61 }
 0x50a   : > { %v3607_v36 = vpop.f32.mrf.mxu1 }
 0x50b   : > { %3688 = vst.msk [vmem:[%s8481_s17 + $0xd0] sm:$0xff] %vm280_vm0, %v3648_v42  ;;  %v3608_v2 = vadd.f32 %v5204_v25, %v3607_v36 }
 0x50d   : > { %3672 = vst.msk [vmem:[%s8481_s17 + $0x50] sm:$0xff] %vm280_vm0, %v3608_v2 }
 0x510   : > { %v3649_v47 = vpop.f32.mrf.mxu3 }
 0x511   : > { %v3650_v14 = vadd.f32 %v5205_v59, %v3649_v47 }
 0x512   : > { %v3609_v11 = vpop.f32.mrf.mxu1 }
 0x513   : > { %3689 = vst.msk [vmem:[%s8481_s17 + $0xd8] sm:$0xff] %vm280_vm0, %v3650_v14  ;;  %v3610_v62 = vadd.f32 %v5206_v41, %v3609_v11 }
 0x515   : > { %3673 = vst.msk [vmem:[%s8481_s17 + $0x58] sm:$0xff] %vm280_vm0, %v3610_v62 }
 0x518   : > { %v3652_v32 = vpop.f32.mrf.mxu3 }
 0x519   : > { %v3653_v12 = vadd.f32 %v5207_v50, %v3652_v32 }
 0x51a   : > { %v3612_v1 = vpop.f32.mrf.mxu1 }
 0x51b   : > { %3690 = vst.msk [vmem:[%s8481_s17 + $0xe0] sm:$0xff] %vm280_vm0, %v3653_v12  ;;  %v3613_v38 = vadd.f32 %v5208_v28, %v3612_v1 }
 0x51d   : > { %3674 = vst.msk [vmem:[%s8481_s17 + $0x60] sm:$0xff] %vm280_vm0, %v3613_v38 }
 0x520   : > { %v3654_v0 = vpop.f32.mrf.mxu3 }
 0x521   : > { %v3655_v39 = vadd.f32 %v5209_v35, %v3654_v0 }
 0x522   : > { %v3614_v37 = vpop.f32.mrf.mxu1 }
 0x523   : > { %3691 = vst.msk [vmem:[%s8481_s17 + $0xe8] sm:$0xff] %vm280_vm0, %v3655_v39  ;;  %v3615_v58 = vadd.f32 %v5210_v13, %v3614_v37 }
 0x525   : > { %3675 = vst.msk [vmem:[%s8481_s17 + $0x68] sm:$0xff] %vm280_vm0, %v3615_v58 }
 0x52e   : > { %v3657_v54 = vpop.f32.mrf.mxu3 }
 0x52f   : > { %v3658_v4 = vadd.f32 %v5211_v34, %v3657_v54 }
 0x530   : > { %v3617_v57 = vpop.f32.mrf.mxu1 }
 0x531   : > { %3692 = vst.msk [vmem:[%s8481_s17 + $0xf0] sm:$0xff] %vm280_vm0, %v3658_v4  ;;  %v3618_v40 = vadd.f32 %v5212_v43, %v3617_v57 }
 0x533   : > { %3676 = vst.msk [vmem:[%s8481_s17 + $0x70] sm:$0xff] %vm280_vm0, %v3618_v40 }
 0x536   : > { %v3659_v15 = vpop.f32.mrf.mxu3 }
 0x537   : > { %v3660_v52 = vadd.f32 %v5213_v63, %v3659_v15 }
 0x538   : > { %v3619_v20 = vpop.f32.mrf.mxu1 }
 0x539   : > { %3693 = vst.msk [vmem:[%s8481_s17 + $0xf8] sm:$0xff] %vm280_vm0, %v3660_v52  ;;  %v3620_v23 = vadd.f32 %v5214_v30, %v3619_v20 }
 0x53b   : > { %3677 = vst.msk [vmem:[%s8481_s17 + $0x78] sm:$0xff] %vm280_vm0, %v3620_v23 }
 0x53c PF: > { %s17_s24 = sadd.s32 1, %s5221_s24  }
 0x53d   : > { %p14_p4 = scmp.ge.s32.totalorder %s17_s24, 4  }
 0x53f   :  { %16 = sbr.rel (!%p14_p4) target bundleno = 1 (0x1), region = 82 }

</bundles_post_ra>
